<compile_context>
chip_gen: v5e
topology: v5e:2x2
jax: 0.10.0
libtpu: 0.0.40
codegen_flags: <defaults>
</compile_context>

<pallas_src>
import numpy as np

import jax
import jax.numpy as jnp
from jax.experimental import pallas as pl
from jax.experimental.pallas import tpu as pltpu

# ----------------------------- problem constants ----------------------------
H_IN = W_IN = 148                                # input spatial size (NOTE above)
KH1 = KW1 = 32                                   # conv1 kernel
S1, P1 = 4, 4                                    # conv1 stride / padding
C1_IN, C1_OUT = 1, 3
OH1 = OW1 = (H_IN + 2 * P1 - KH1) // S1 + 1      # 32
K1 = C1_IN * KH1 * KW1                           # 1024  (im2col depth)
M1 = OH1 * OW1                                   # 1024  (conv1 output positions)
K1_CHUNK = 512                                   # conv1 contraction tile -> grid (2,)

KH2 = KW2 = 32                                   # conv2 kernel
S2, P2 = 2, 1                                    # conv2 stride / padding
C2_OUT = 3
OH2 = OW2 = (OH1 + 2 * P2 - KH2) // S2 + 1       # 2
N2 = C2_OUT * OH2 * OW2                          # 12 real outputs
N2_LANES = 128                                   # lane-padded width per channel
CPAD = 8                                         # conv1 out-channels -> sublane tile

A_PH = KH1 // S1                                 # 8  phase-window extent
R_PH = OH1 + A_PH                                # 40 phase-grid rows/cols
XPAD = S1 * R_PH                                 # 160 padded image side


# ------------------------------ Pallas kernel --------------------------------

def _fused_model_kernel(pt_ref, w1_ref, b1_ref, w2_ref, b2_ref, o_ref, v1_acc):
    """Fused conv1 (K-chunked) + conv2 + tanh-GELU tail (last chunk only)."""
    k_step = pl.program_id(0)

    @pl.when(k_step == 0)
    def _init():
        v1_acc[...] = jnp.zeros_like(v1_acc)

    # conv1 partial product on the MXU: (8, Kc) @ (Kc, 1024) -> (8, 1024) f32.
    v1_acc[...] += jnp.dot(w1_ref[...], pt_ref[...],
                           preferred_element_type=jnp.float32)

    # conv2 + elementwise tail exactly once, on the final K chunk.
    @pl.when(k_step == pl.num_programs(0) - 1)
    def _epilogue():
        v1 = v1_acc[...] + b1_ref[...]                       # (8, 1024) f32
        # conv2 as ONE lane-concatenated matmul: (8,1024) @ (1024, 3*128).
        r = jnp.dot(v1.astype(w2_ref.dtype), w2_ref[...],
                    preferred_element_type=jnp.float32)      # (8, 384) f32
        v2 = b2_ref[...]                                     # (1, 128) f32
        for c in range(C1_OUT):                              # 128-lane slices: cheap
            v2 = v2 + r[c:c + 1, c * N2_LANES:(c + 1) * N2_LANES]
        # Elementwise tail (f32, VPU/EUP).
        v3 = v2 * 0.5
        v6 = (v2 * v2 * v2) * 0.044715
        v8 = (v2 + v6) * 0.7978845608028654
        o_ref[...] = v3 * (jnp.tanh(v8) + 1.0)


def _fused_model_call(patches_t, w1p, b1p, w2p, b2p):
    return pl.pallas_call(
        _fused_model_kernel,
        out_shape=jax.ShapeDtypeStruct((1, N2_LANES), jnp.float32),
        grid_spec=pltpu.PrefetchScalarGridSpec(
            num_scalar_prefetch=0,
            grid=(K1 // K1_CHUNK,),
            in_specs=[
                pl.BlockSpec((K1_CHUNK, M1), lambda k: (k, 0)),           # patchesT
                pl.BlockSpec((CPAD, K1_CHUNK), lambda k: (0, k)),         # conv1 W
                pl.BlockSpec((CPAD, 1), lambda k: (0, 0)),                # conv1 b
                pl.BlockSpec((M1, C1_OUT * N2_LANES), lambda k: (0, 0)),  # conv2 W
                pl.BlockSpec((1, N2_LANES), lambda k: (0, 0)),            # conv2 b
            ],
            out_specs=pl.BlockSpec((1, N2_LANES), lambda k: (0, 0)),
            scratch_shapes=[pltpu.VMEM((CPAD, M1), jnp.float32)],         # conv1 acc
        ),
        compiler_params=pltpu.CompilerParams(
            dimension_semantics=("arbitrary",)),   # K is a reduction axis
    )(patches_t, w1p, b1p, w2p, b2p)


# --------------------------- one-time param packing --------------------------

def pack_params(params, compute_dtype=jnp.bfloat16):
    """Pack constant tensors into kernel-friendly layouts ONCE (not per call)."""
    w1 = np.asarray(params["w1"], np.float32)     # (3, 1, 32, 32)
    b1 = np.asarray(params["b1"], np.float32)     # (3,)
    w2 = np.asarray(params["w2"], np.float32)     # (3, 3, 32, 32)
    b2 = np.asarray(params["b2"], np.float32)     # (3,)

    # conv1 weights in the phase-major contraction order used by the wrapper's
    # patch builder:  k = ((p*4 + q)*8 + a)*8 + b  with kh = 4a+p, kw = 4b+q.
    w1r = w1.reshape(C1_OUT, A_PH, S1, A_PH, S1)   # [c, a, p, b, q]
    w1r = w1r.transpose(0, 2, 4, 1, 3)             # [c, p, q, a, b]
    w1p = np.zeros((CPAD, K1), np.float32)
    w1p[:C1_OUT] = w1r.reshape(C1_OUT, K1)
    b1p = np.zeros((CPAD, 1), np.float32)
    b1p[:C1_OUT, 0] = b1

    # conv2 weights scattered onto conv1's flattened spatial grid, then the
    # three per-input-channel blocks concatenated along lanes so conv2 is ONE
    # (8,1024)@(1024,384) matmul in the kernel:
    #   w2s[c, r*32 + s, o*4 + (oh2*2 + ow2)] = w2[o, c, kh, kw]
    # with r = 2*oh2 + kh - 1, s = 2*ow2 + kw - 1; taps falling in conv2's
    # zero padding of v1 are simply dropped.
    w2s = np.zeros((C1_OUT, M1, N2_LANES), np.float32)
    kh = np.arange(KH2)
    kw = np.arange(KW2)
    for oh2 in range(OH2):
        for ow2 in range(OW2):
            m2 = oh2 * OW2 + ow2
            kh_v = kh[(S2 * oh2 + kh - P2 >= 0) & (S2 * oh2 + kh - P2 < OH1)]
            kw_v = kw[(S2 * ow2 + kw - P2 >= 0) & (S2 * ow2 + kw - P2 < OW1)]
            p = ((S2 * oh2 + kh_v - P2)[:, None] * OW1
                 + (S2 * ow2 + kw_v - P2)[None, :]).ravel()
            for o in range(C2_OUT):
                for c in range(C1_OUT):
                    w2s[c, p, o * (OH2 * OW2) + m2] = (
                        w2[o, c][np.ix_(kh_v, kw_v)].ravel())
    w2p = np.transpose(w2s, (1, 0, 2)).reshape(M1, C1_OUT * N2_LANES)

    b2p = np.zeros((1, N2_LANES), np.float32)
    for o in range(C2_OUT):
        b2p[0, o * (OH2 * OW2):(o + 1) * (OH2 * OW2)] = b2[o]

    return {
        "w1p": jnp.asarray(w1p, compute_dtype),   # MXU lhs (bf16 default)
        "b1p": jnp.asarray(b1p),                  # f32
        "w2p": jnp.asarray(w2p, compute_dtype),   # conv2 MXU rhs (bf16 default)
        "b2p": jnp.asarray(b2p),                  # f32
    }


# ------------------------------- JAX wrapper ---------------------------------

def _conv1_patches_t(x, compute_dtype):
    """Transposed im2col for conv1: (K, M) with K on sublanes, positions on lanes.

    Built from pad / reshape / 64 static (32,32)-block slices / stack only —
    every data move is a contiguous block copy, so XLA lowers it as plain
    copies instead of the scalar gather the previous version emitted.
    """
    xp = jnp.pad(x[0, 0],
                 ((P1, XPAD - H_IN - P1), (P1, XPAD - W_IN - P1))
                 ).astype(compute_dtype)                        # (160, 160)
    # Phase split (stride 4 divides kernel 32): X[p, q, r, c] = xp[4r+p, 4c+q].
    X = xp.reshape(R_PH, S1, R_PH, S1).transpose(1, 3, 0, 2)    # (4, 4, 40, 40)
    blocks = [X[:, :, a:a + OH1, b:b + OW1]
              for a in range(A_PH) for b in range(A_PH)]        # 64 x (4,4,32,32)
    pt = jnp.stack(blocks, axis=2)                              # (4, 4, 64, 32, 32)
    # Row order = ((p*4+q)*8+a)*8+b, matching pack_params(); cols = oh*32+ow.
    return pt.reshape(K1, M1)
    # TODO(synk): the im2col matrix still round-trips HBM (~2 MiB bf16); a fully
    # in-kernel extraction needs lane-strided swizzles that do not map onto
    # (8,128) tiles cleanly, so it stays in the thin JAX wrapper for now.


@jax.jit
def model_forward(x, packed):
    """x: (1, 1, 148, 148) f32 NCHW -> (1, 3, 2, 2) f32 NCHW."""
    assert x.shape == (1, C1_IN, H_IN, W_IN), x.shape
    patches_t = _conv1_patches_t(x, packed["w1p"].dtype)
    out_flat = _fused_model_call(patches_t, packed["w1p"], packed["b1p"],
                                 packed["w2p"], packed["b2p"])
    return out_flat[0, :N2].reshape(C2_OUT, OH2, OW2)[None]


def reference_forward(x, params):
    dn = ("NCHW", "OIHW", "NCHW")
    v1 = jax.lax.conv_general_dilated(
        x, params["w1"], (S1, S1), [(P1, P1), (P1, P1)], dimension_numbers=dn,
        precision=jax.lax.Precision.HIGHEST) + params["b1"][None, :, None, None]
    v2 = jax.lax.conv_general_dilated(
        v1, params["w2"], (S2, S2), [(P2, P2), (P2, P2)], dimension_numbers=dn,
        precision=jax.lax.Precision.HIGHEST) + params["b2"][None, :, None, None]
    v3 = v2 * 0.5
    v6 = (v2 * v2 * v2) * 0.044715
    v8 = (v2 + v6) * 0.7978845608028654
    return v3 * (jnp.tanh(v8) + 1.0)


if __name__ == "__main__":
    key = jax.random.PRNGKey(0)
    kx, k1, k2, k3, k4 = jax.random.split(key, 5)

    x = jax.random.normal(kx, (1, C1_IN, H_IN, W_IN), jnp.float32)
    params = {
        "w1": jax.random.normal(k1, (C1_OUT, C1_IN, KH1, KW1), jnp.float32)
              * (1.0 / 32.0),
        "b1": jax.random.normal(k2, (C1_OUT,), jnp.float32) * 0.1,
        "w2": jax.random.normal(k3, (C2_OUT, C1_OUT, KH2, KW2), jnp.float32)
              * (1.0 / (32.0 * 3.0 ** 0.5)),
        "b2": jax.random.normal(k4, (C2_OUT,), jnp.float32) * 0.1,
    }

    ref = reference_forward(x, params)

    # All-f32 path: tight correctness check of the fused kernel.
    packed_f32 = pack_params(params, compute_dtype=jnp.float32)
    out_f32 = model_forward(x, packed_f32)
    jax.block_until_ready(out_f32)
    assert out_f32.shape == (1, C2_OUT, OH2, OW2), out_f32.shape
    err_f32 = float(jnp.max(jnp.abs(out_f32 - ref)))
    assert jnp.allclose(out_f32, ref, atol=1e-3, rtol=1e-3), f"f32 max err {err_f32}"

    # bf16-MXU-input path (default / perf configuration on v5e / v6e / v7x).
    packed_bf16 = pack_params(params, compute_dtype=jnp.bfloat16)
    out_bf16 = model_forward(x, packed_bf16)
    jax.block_until_ready(out_bf16)
    assert out_bf16.shape == (1, C2_OUT, OH2, OW2), out_bf16.shape
    err_bf16 = float(jnp.max(jnp.abs(out_bf16 - ref)))
    assert jnp.allclose(out_bf16, ref, atol=5e-2, rtol=5e-2), f"bf16 max err {err_bf16}"

    print("KERNEL_OK")
</pallas_src>

<mosaic_0001>
module attributes {stable_mosaic.version = 11 : i64} {
  func.func @_fused_model_kernel(%arg0: i32, %arg1: memref<512x1024xf32, #tpu.memory_space<vmem>>, %arg2: memref<8x512xf32, #tpu.memory_space<vmem>>, %arg3: memref<8x1xf32, #tpu.memory_space<vmem>>, %arg4: memref<1024x384xf32, #tpu.memory_space<vmem>>, %arg5: memref<1x128xf32, #tpu.memory_space<vmem>>, %arg6: memref<1x128xf32, #tpu.memory_space<vmem>>, %arg7: memref<8x1024xf32, #tpu.memory_space<vmem>>) attributes {dimension_semantics = [#tpu.dimension_semantics<arbitrary>], iteration_bounds = array<i64: 2>, scalar_prefetch = 0 : i64, scratch_operands = 1 : i64, tpu.core_type = #tpu.core_type<tc>, window_params = [{transform_indices = @transform_0, window_bounds = array<i64: 512, 1024>}, {transform_indices = @transform_1, window_bounds = array<i64: 8, 512>}, {pipeline_mode = #tpu.pipeline_mode<synchronous>, transform_indices = @transform_2, window_bounds = array<i64: 8, 1>}, {pipeline_mode = #tpu.pipeline_mode<synchronous>, transform_indices = @transform_3, window_bounds = array<i64: 1024, 384>}, {pipeline_mode = #tpu.pipeline_mode<synchronous>, transform_indices = @transform_4, window_bounds = array<i64: 1, 128>}, {pipeline_mode = #tpu.pipeline_mode<synchronous>, transform_indices = @transform_5, window_bounds = array<i64: 1, 128>}]} {
    %c0_i32 = arith.constant 0 : i32
    %0 = arith.cmpi eq, %arg0, %c0_i32 : i32
    %1 = arith.extui %0 : i1 to i32
    %c0_i32_0 = arith.constant 0 : i32
    %2 = arith.cmpi ne, %1, %c0_i32_0 : i32
    scf.if %2 {
      %cst_9 = arith.constant 0.000000e+00 : f32
      %12 = vector.broadcast %cst_9 : f32 to vector<8x1024xf32>
      %c0_10 = arith.constant 0 : index
      %c0_11 = arith.constant 0 : index
      %13 = vector.load %arg7[%c0_10, %c0_11] : memref<8x1024xf32, #tpu.memory_space<vmem>>, vector<8x1024xf32>
      tpu.vector_store %arg7[%c0_10, %c0_11], %12 {strides = array<i32>} : memref<8x1024xf32, #tpu.memory_space<vmem>>, vector<8x1024xf32>,
    } else {
    }
    %c0 = arith.constant 0 : index
    %c0_1 = arith.constant 0 : index
    %3 = vector.load %arg7[%c0, %c0_1] : memref<8x1024xf32, #tpu.memory_space<vmem>>, vector<8x1024xf32>
    %c0_2 = arith.constant 0 : index
    %c0_3 = arith.constant 0 : index
    %4 = vector.load %arg2[%c0_2, %c0_3] : memref<8x512xf32, #tpu.memory_space<vmem>>, vector<8x512xf32>
    %c0_4 = arith.constant 0 : index
    %c0_5 = arith.constant 0 : index
    %5 = vector.load %arg1[%c0_4, %c0_5] : memref<512x1024xf32, #tpu.memory_space<vmem>>, vector<512x1024xf32>
    %cst = arith.constant dense<0.000000e+00> : vector<8x1024xf32>
    %6 = tpu.matmul %4, %5, %cst {dimension_numbers = #tpu.dot_dimension_numbers<[1], [0], [0], [1], [0, 0, 1, 1], [], []>} : vector<8x512xf32>, vector<512x1024xf32>, vector<8x1024xf32> -> vector<8x1024xf32>
    %7 = arith.addf %3, %6 : vector<8x1024xf32>
    %c0_6 = arith.constant 0 : index
    %c0_7 = arith.constant 0 : index
    %8 = vector.load %arg7[%c0_6, %c0_7] : memref<8x1024xf32, #tpu.memory_space<vmem>>, vector<8x1024xf32>
    tpu.vector_store %arg7[%c0_6, %c0_7], %7 {strides = array<i32>} : memref<8x1024xf32, #tpu.memory_space<vmem>>, vector<8x1024xf32>,
    %c1_i32 = arith.constant 1 : i32
    %9 = arith.cmpi eq, %arg0, %c1_i32 : i32
    %10 = arith.extui %9 : i1 to i32
    %c0_i32_8 = arith.constant 0 : i32
    %11 = arith.cmpi ne, %10, %c0_i32_8 : i32
    scf.if %11 {
      %c0_9 = arith.constant 0 : index
      %c0_10 = arith.constant 0 : index
      %12 = vector.load %arg7[%c0_9, %c0_10] : memref<8x1024xf32, #tpu.memory_space<vmem>>, vector<8x1024xf32>
      %c0_11 = arith.constant 0 : index
      %c0_12 = arith.constant 0 : index
      %13 = vector.load %arg3[%c0_11, %c0_12] : memref<8x1xf32, #tpu.memory_space<vmem>>, vector<8x1xf32>
      %14 = vector.broadcast %13 : vector<8x1xf32> to vector<8x1024xf32>
      %15 = arith.addf %12, %14 : vector<8x1024xf32>
      %c0_13 = arith.constant 0 : index
      %c0_14 = arith.constant 0 : index
      %16 = vector.load %arg4[%c0_13, %c0_14] : memref<1024x384xf32, #tpu.memory_space<vmem>>, vector<1024x384xf32>
      %cst_15 = arith.constant dense<0.000000e+00> : vector<8x384xf32>
      %17 = tpu.matmul %15, %16, %cst_15 {dimension_numbers = #tpu.dot_dimension_numbers<[1], [0], [0], [1], [0, 0, 1, 1], [], []>} : vector<8x1024xf32>, vector<1024x384xf32>, vector<8x384xf32> -> vector<8x384xf32>
      %c0_16 = arith.constant 0 : index
      %c0_17 = arith.constant 0 : index
      %18 = vector.load %arg5[%c0_16, %c0_17] : memref<1x128xf32, #tpu.memory_space<vmem>>, vector<1x128xf32>
      %19 = vector.extract_strided_slice %17 {offsets = [0, 0], sizes = [1, 128], strides = [1, 1]} : vector<8x384xf32> to vector<1x128xf32>
      %20 = arith.addf %18, %19 : vector<1x128xf32>
      %21 = vector.extract_strided_slice %17 {offsets = [1, 128], sizes = [1, 128], strides = [1, 1]} : vector<8x384xf32> to vector<1x128xf32>
      %22 = arith.addf %20, %21 : vector<1x128xf32>
      %23 = vector.extract_strided_slice %17 {offsets = [2, 256], sizes = [1, 128], strides = [1, 1]} : vector<8x384xf32> to vector<1x128xf32>
      %24 = arith.addf %22, %23 : vector<1x128xf32>
      %cst_18 = arith.constant 5.000000e-01 : f32
      %25 = vector.broadcast %cst_18 : f32 to vector<1x128xf32>
      %26 = arith.mulf %24, %25 : vector<1x128xf32>
      %27 = arith.mulf %24, %24 : vector<1x128xf32>
      %28 = arith.mulf %27, %24 : vector<1x128xf32>
      %cst_19 = arith.constant 4.471500e-02 : f32
      %29 = vector.broadcast %cst_19 : f32 to vector<1x128xf32>
      %30 = arith.mulf %28, %29 : vector<1x128xf32>
      %31 = arith.addf %24, %30 : vector<1x128xf32>
      %cst_20 = arith.constant 0.797884583 : f32
      %32 = vector.broadcast %cst_20 : f32 to vector<1x128xf32>
      %33 = arith.mulf %31, %32 : vector<1x128xf32>
      %34 = math.tanh %33 : vector<1x128xf32>
      %cst_21 = arith.constant 1.000000e+00 : f32
      %35 = vector.broadcast %cst_21 : f32 to vector<1x128xf32>
      %36 = arith.addf %34, %35 : vector<1x128xf32>
      %37 = arith.mulf %26, %36 : vector<1x128xf32>
      %c0_22 = arith.constant 0 : index
      %c0_23 = arith.constant 0 : index
      %38 = vector.load %arg6[%c0_22, %c0_23] : memref<1x128xf32, #tpu.memory_space<vmem>>, vector<1x128xf32>
      tpu.vector_store %arg6[%c0_22, %c0_23], %37 {strides = array<i32>} : memref<1x128xf32, #tpu.memory_space<vmem>>, vector<1x128xf32>,
    } else {
    }
    return
  }
  func.func @transform_0(%arg0: i32) -> (i32, i32) {
    %c0_i32 = arith.constant 0 : i32
    %c0_i32_0 = arith.constant 0 : i32
    return %arg0, %c0_i32 : i32, i32
  }
  func.func @transform_1(%arg0: i32) -> (i32, i32) {
    %c0_i32 = arith.constant 0 : i32
    %c0_i32_0 = arith.constant 0 : i32
    return %c0_i32, %arg0 : i32, i32
  }
  func.func @transform_2(%arg0: i32) -> (i32, i32) {
    %c0_i32 = arith.constant 0 : i32
    %c0_i32_0 = arith.constant 0 : i32
    %c0_i32_1 = arith.constant 0 : i32
    return %c0_i32, %c0_i32_0 : i32, i32
  }
  func.func @transform_3(%arg0: i32) -> (i32, i32) {
    %c0_i32 = arith.constant 0 : i32
    %c0_i32_0 = arith.constant 0 : i32
    %c0_i32_1 = arith.constant 0 : i32
    return %c0_i32, %c0_i32_0 : i32, i32
  }
  func.func @transform_4(%arg0: i32) -> (i32, i32) {
    %c0_i32 = arith.constant 0 : i32
    %c0_i32_0 = arith.constant 0 : i32
    %c0_i32_1 = arith.constant 0 : i32
    return %c0_i32, %c0_i32_0 : i32, i32
  }
  func.func @transform_5(%arg0: i32) -> (i32, i32) {
    %c0_i32 = arith.constant 0 : i32
    %c0_i32_0 = arith.constant 0 : i32
    %c0_i32_1 = arith.constant 0 : i32
    return %c0_i32, %c0_i32_0 : i32, i32
  }
}

</mosaic_0001>

<bundles_post_ra>
// kernel: model_forward.1
= control target key start
LH: loop header
LB: loop body
LE: loop exit
PB: predicated region body
PF: predicated region fallthrough
CT: control target
= control target key end

     0   :  { %s2454_s18 = smov 0   ;;  %s4250_s0 = inlined_call_operand.vmem [shape: f32[1024,1024], index: 0, kind: input, shape index: {}]   ;;  %s4251_s1 = inlined_call_operand.vmem [shape: f32[8,1024], index: 1, kind: input, shape index: {}]   ;;  %s4252_s2 = inlined_call_operand.vmem [shape: f32[8,1], index: 2, kind: input, shape index: {}]   ;;  %s4253_s3 = inlined_call_operand.vmem [shape: f32[1024,384], index: 3, kind: input, shape index: {}]   ;;  %s4254_s4 = inlined_call_operand.vmem [shape: f32[1,128], index: 4, kind: input, shape index: {}]   ;;  %s4255_s5 = inlined_call_operand.vmem [shape: f32[1,128], index: 5, kind: output, shape index: {}]  }
   0x1 LB: > { %s2460_s19 = sadd.s32 4294967295, %s2420_s18   ;;  %p2386_p0 = scmp.ge.s32.totalorder %s2420_s18, 1  ;;  %s2420_s18 = sphi %s2454_s18, %s15_s18  }
   0x2   : > { %p195_p1 = scmp.lt.s32.totalorder %s2420_s18, 3 }
   0x4   : > { %p196_p2 = pnand %p2386_p0, %p195_p1 }
   0x5   : > { %s2387_s20 = sshll.u32 (!%p196_p2), %s2460_s19, 6  ;;  %s2390_s21 = sshll.u32 (!%p196_p2), %s2460_s19, 2 }
   0x6   : > { %199 = sbr.rel (%p196_p2) target bundleno = 892 (0x37c), region = 40  ;;  %p225_p3 = scmp.lt.s32.totalorder (!%p196_p2), %s2387_s20, 127 }
   0x7   : > { %p232_p4 = scmp.lt.s32.totalorder (!%p196_p2), %s2390_s21, 7  ;;  %p2392_p5 = scmp.ne.s32.totalorder (!%p196_p2), %s2460_s19, 0 }
   0xb   : > { %s4257_s20 = smov (!%p225_p3, %s2387_s20), 127  ;;  %s4259_s21 = smov (!%p232_p4, %s2390_s21), 7 }
   0xc   : > { %s2396_s22 = sshll.u32 %s4257_s20, 6  ;;  %s2391_s26 = sshll.u32 %s4259_s21, 3 }
   0xd   : > { %s2469_s25 = scalar_lea.vmem %s4250_s0, %s2396_s22  ;;  %s2474_s29 = scalar_lea.vmem %s4251_s1, %s2391_s26 }
   0xe   : > { %240 = sbr.rel (%p2392_p5) target bundleno = 28 (0x1c), region = 44 }
  0x13   : > { %v2422_v0 = vmov 0.0  }
  0x14   : > { %241 = vst [vmem:[#allocation2 + $0x30] sm:$0xff] %v2422_v0 }
  0x15   : > { %242 = vst [vmem:[#allocation2] sm:$0xff] %v2422_v0 }
  0x16   : > { %243 = vst [vmem:[#allocation2 + $0x18] sm:$0xff] %v2422_v0 }
  0x17   : > { %244 = vst [vmem:[#allocation2 + $0x10] sm:$0xff] %v2422_v0 }
  0x18   : > { %245 = vst [vmem:[#allocation2 + $0x8] sm:$0xff] %v2422_v0 }
  0x19   : > { %246 = vst [vmem:[#allocation2 + $0x20] sm:$0xff] %v2422_v0 }
  0x1a   : > { %247 = vst [vmem:[#allocation2 + $0x28] sm:$0xff] %v2422_v0 }
  0x1b   : > { %248 = vst [vmem:[#allocation2 + $0x38] sm:$0xff] %v2422_v0 }
  0x1c PF: > { %v637_v1 = vld [vmem:[%s2469_s25 + $0xbc0] sm:$0xff]  ;;  %v638_v63 = vld [vmem:[%s2469_s25 + $0xbc8] sm:$0xff]  ;;  %p2393_p6 = scmp.ne.s32.totalorder %s2460_s19, 1 }
  0x1d   : > { %v629_v2 = vld [vmem:[%s2469_s25 + $0xb80] sm:$0xff]  ;;  %813 = vmatpush.msra.mxu2 %v637_v1  ;;  %v766_v0 = vld [vmem:[%s2469_s25 + $0xfc8] sm:$0xff] }
  0x1e   : > { %v765_v3 = vld [vmem:[%s2469_s25 + $0xfc0] sm:$0xff] }
  0x1f   : > { %833 = vmatpush.msra.mxu3 %v765_v3  ;;  %v381_v4 = vld [vmem:[%s2469_s25 + $0x3c0] sm:$0xff]  ;;  %814 = vmatpush.msra.mxu2 %v629_v2  ;;  %v630_v3 = vld [vmem:[%s2469_s25 + $0xb88] sm:$0xff] }
  0x20   : > { %v509_v5 = vld [vmem:[%s2469_s25 + $0x7c0] sm:$0xff]  ;;  %773 = vmatpush.msra.mxu0 %v381_v4  ;;  %v382_v4 = vld [vmem:[%s2469_s25 + $0x3c8] sm:$0xff] }
  0x21   : > { %v621_v6 = vld [vmem:[%s2469_s25 + $0xb40] sm:$0xff]  ;;  %793 = vmatpush.msra.mxu1 %v509_v5  ;;  %v510_v5 = vld [vmem:[%s2469_s25 + $0x7c8] sm:$0xff] }
  0x22   : > { %v757_v7 = vld [vmem:[%s2469_s25 + $0xf80] sm:$0xff]  ;;  %815 = vmatpush.msra.mxu2 %v621_v6  ;;  %v758_v6 = vld [vmem:[%s2469_s25 + $0xf88] sm:$0xff] }
  0x23   : > { %v373_v8 = vld [vmem:[%s2469_s25 + $0x380] sm:$0xff]  ;;  %834 = vmatpush.msra.mxu3 %v757_v7  ;;  %v622_v7 = vld [vmem:[%s2469_s25 + $0xb48] sm:$0xff] }
  0x24   : > { %v501_v9 = vld [vmem:[%s2469_s25 + $0x780] sm:$0xff]  ;;  %774 = vmatpush.msra.mxu0 %v373_v8  ;;  %v374_v8 = vld [vmem:[%s2469_s25 + $0x388] sm:$0xff] }
  0x25   : > { %v749_v10 = vld [vmem:[%s2469_s25 + $0xf40] sm:$0xff]  ;;  %794 = vmatpush.msra.mxu1 %v501_v9  ;;  %v502_v9 = vld [vmem:[%s2469_s25 + $0x788] sm:$0xff] }
  0x26   : > { %v365_v11 = vld [vmem:[%s2469_s25 + $0x340] sm:$0xff]  ;;  %835 = vmatpush.msra.mxu3 %v749_v10  ;;  %v750_v10 = vld [vmem:[%s2469_s25 + $0xf48] sm:$0xff] }
  0x27   : > { %v613_v12 = vld [vmem:[%s2469_s25 + $0xb00] sm:$0xff]  ;;  %775 = vmatpush.msra.mxu0 %v365_v11  ;;  %v614_v11 = vld [vmem:[%s2469_s25 + $0xb08] sm:$0xff] }
  0x28   : > { %v493_v13 = vld [vmem:[%s2469_s25 + $0x740] sm:$0xff]  ;;  %816 = vmatpush.msra.mxu2 %v613_v12  ;;  %v366_v12 = vld [vmem:[%s2469_s25 + $0x348] sm:$0xff] }
  0x29   : > { %v741_v14 = vld [vmem:[%s2469_s25 + $0xf00] sm:$0xff]  ;;  %795 = vmatpush.msra.mxu1 %v493_v13  ;;  %v494_v13 = vld [vmem:[%s2469_s25 + $0x748] sm:$0xff] }
  0x2a   : > { %v357_v15 = vld [vmem:[%s2469_s25 + $0x300] sm:$0xff]  ;;  %836 = vmatpush.msra.mxu3 %v741_v14  ;;  %v742_v14 = vld [vmem:[%s2469_s25 + $0xf08] sm:$0xff] }
  0x2b   : > { %v485_v16 = vld [vmem:[%s2469_s25 + $0x700] sm:$0xff]  ;;  %776 = vmatpush.msra.mxu0 %v357_v15  ;;  %v606_v15 = vld [vmem:[%s2469_s25 + $0xac8] sm:$0xff] }
  0x2c   : > { %v605_v17 = vld [vmem:[%s2469_s25 + $0xac0] sm:$0xff]  ;;  %796 = vmatpush.msra.mxu1 %v485_v16  ;;  %v358_v16 = vld [vmem:[%s2469_s25 + $0x308] sm:$0xff] }
  0x2d   : > { %v733_v18 = vld [vmem:[%s2469_s25 + $0xec0] sm:$0xff]  ;;  %817 = vmatpush.msra.mxu2 %v605_v17  ;;  %v486_v17 = vld [vmem:[%s2469_s25 + $0x708] sm:$0xff] }
  0x2e   : > { %v349_v19 = vld [vmem:[%s2469_s25 + $0x2c0] sm:$0xff]  ;;  %837 = vmatpush.msra.mxu3 %v733_v18  ;;  %v734_v18 = vld [vmem:[%s2469_s25 + $0xec8] sm:$0xff] }
  0x2f   : > { %v477_v20 = vld [vmem:[%s2469_s25 + $0x6c0] sm:$0xff]  ;;  %777 = vmatpush.msra.mxu0 %v349_v19  ;;  %v598_v19 = vld [vmem:[%s2469_s25 + $0xa88] sm:$0xff] }
  0x30   : > { %v597_v21 = vld [vmem:[%s2469_s25 + $0xa80] sm:$0xff]  ;;  %797 = vmatpush.msra.mxu1 %v477_v20  ;;  %v350_v20 = vld [vmem:[%s2469_s25 + $0x2c8] sm:$0xff] }
  0x31   : > { %v725_v22 = vld [vmem:[%s2469_s25 + $0xe80] sm:$0xff]  ;;  %818 = vmatpush.msra.mxu2 %v597_v21  ;;  %v478_v21 = vld [vmem:[%s2469_s25 + $0x6c8] sm:$0xff] }
  0x32   : > { %v341_v23 = vld [vmem:[%s2469_s25 + $0x280] sm:$0xff]  ;;  %838 = vmatpush.msra.mxu3 %v725_v22  ;;  %v726_v22 = vld [vmem:[%s2469_s25 + $0xe88] sm:$0xff] }
  0x33   : > { %v469_v24 = vld [vmem:[%s2469_s25 + $0x680] sm:$0xff]  ;;  %778 = vmatpush.msra.mxu0 %v341_v23  ;;  %v590_v23 = vld [vmem:[%s2469_s25 + $0xa48] sm:$0xff] }
  0x34   : > { %v589_v25 = vld [vmem:[%s2469_s25 + $0xa40] sm:$0xff]  ;;  %798 = vmatpush.msra.mxu1 %v469_v24  ;;  %v342_v24 = vld [vmem:[%s2469_s25 + $0x288] sm:$0xff] }
  0x35   : > { %v717_v26 = vld [vmem:[%s2469_s25 + $0xe40] sm:$0xff]  ;;  %819 = vmatpush.msra.mxu2 %v589_v25  ;;  %v470_v25 = vld [vmem:[%s2469_s25 + $0x688] sm:$0xff] }
  0x36   : > { %v333_v27 = vld [vmem:[%s2469_s25 + $0x240] sm:$0xff]  ;;  %839 = vmatpush.msra.mxu3 %v717_v26  ;;  %v718_v26 = vld [vmem:[%s2469_s25 + $0xe48] sm:$0xff] }
  0x37   : > { %v461_v28 = vld [vmem:[%s2469_s25 + $0x640] sm:$0xff]  ;;  %779 = vmatpush.msra.mxu0 %v333_v27  ;;  %v582_v27 = vld [vmem:[%s2469_s25 + $0xa08] sm:$0xff] }
  0x38   : > { %v581_v29 = vld [vmem:[%s2469_s25 + $0xa00] sm:$0xff]  ;;  %799 = vmatpush.msra.mxu1 %v461_v28  ;;  %v334_v28 = vld [vmem:[%s2469_s25 + $0x248] sm:$0xff] }
  0x39   : > { %v709_v30 = vld [vmem:[%s2469_s25 + $0xe00] sm:$0xff]  ;;  %820 = vmatpush.msra.mxu2 %v581_v29  ;;  %v462_v29 = vld [vmem:[%s2469_s25 + $0x648] sm:$0xff] }
  0x3a   : > { %v325_v31 = vld [vmem:[%s2469_s25 + $0x200] sm:$0xff]  ;;  %840 = vmatpush.msra.mxu3 %v709_v30  ;;  %v710_v30 = vld [vmem:[%s2469_s25 + $0xe08] sm:$0xff] }
  0x3b   : > { %v453_v32 = vld [vmem:[%s2469_s25 + $0x600] sm:$0xff]  ;;  %780 = vmatpush.msra.mxu0 %v325_v31  ;;  %v574_v31 = vld [vmem:[%s2469_s25 + $0x9c8] sm:$0xff] }
  0x3c   : > { %v573_v33 = vld [vmem:[%s2469_s25 + $0x9c0] sm:$0xff]  ;;  %800 = vmatpush.msra.mxu1 %v453_v32  ;;  %v326_v32 = vld [vmem:[%s2469_s25 + $0x208] sm:$0xff] }
  0x3d   : > { %v701_v34 = vld [vmem:[%s2469_s25 + $0xdc0] sm:$0xff]  ;;  %821 = vmatpush.msra.mxu2 %v573_v33  ;;  %v454_v33 = vld [vmem:[%s2469_s25 + $0x608] sm:$0xff] }
  0x3e   : > { %v317_v35 = vld [vmem:[%s2469_s25 + $0x1c0] sm:$0xff]  ;;  %841 = vmatpush.msra.mxu3 %v701_v34  ;;  %v702_v34 = vld [vmem:[%s2469_s25 + $0xdc8] sm:$0xff] }
  0x3f   : > { %v445_v36 = vld [vmem:[%s2469_s25 + $0x5c0] sm:$0xff]  ;;  %781 = vmatpush.msra.mxu0 %v317_v35  ;;  %v566_v35 = vld [vmem:[%s2469_s25 + $0x988] sm:$0xff] }
  0x40   : > { %v565_v37 = vld [vmem:[%s2469_s25 + $0x980] sm:$0xff]  ;;  %801 = vmatpush.msra.mxu1 %v445_v36  ;;  %v318_v36 = vld [vmem:[%s2469_s25 + $0x1c8] sm:$0xff] }
  0x41   : > { %v693_v38 = vld [vmem:[%s2469_s25 + $0xd80] sm:$0xff]  ;;  %822 = vmatpush.msra.mxu2 %v565_v37  ;;  %v446_v37 = vld [vmem:[%s2469_s25 + $0x5c8] sm:$0xff] }
  0x42   : > { %v309_v39 = vld [vmem:[%s2469_s25 + $0x180] sm:$0xff]  ;;  %842 = vmatpush.msra.mxu3 %v693_v38  ;;  %v694_v38 = vld [vmem:[%s2469_s25 + $0xd88] sm:$0xff] }
  0x43   : > { %v437_v40 = vld [vmem:[%s2469_s25 + $0x580] sm:$0xff]  ;;  %782 = vmatpush.msra.mxu0 %v309_v39  ;;  %v558_v39 = vld [vmem:[%s2469_s25 + $0x948] sm:$0xff] }
  0x44   : > { %v557_v41 = vld [vmem:[%s2469_s25 + $0x940] sm:$0xff]  ;;  %802 = vmatpush.msra.mxu1 %v437_v40  ;;  %v310_v40 = vld [vmem:[%s2469_s25 + $0x188] sm:$0xff] }
  0x45   : > { %v685_v42 = vld [vmem:[%s2469_s25 + $0xd40] sm:$0xff]  ;;  %823 = vmatpush.msra.mxu2 %v557_v41  ;;  %v438_v41 = vld [vmem:[%s2469_s25 + $0x588] sm:$0xff] }
  0x46   : > { %v301_v43 = vld [vmem:[%s2469_s25 + $0x140] sm:$0xff]  ;;  %843 = vmatpush.msra.mxu3 %v685_v42  ;;  %v686_v42 = vld [vmem:[%s2469_s25 + $0xd48] sm:$0xff] }
  0x47   : > { %v429_v44 = vld [vmem:[%s2469_s25 + $0x540] sm:$0xff]  ;;  %783 = vmatpush.msra.mxu0 %v301_v43  ;;  %v550_v43 = vld [vmem:[%s2469_s25 + $0x908] sm:$0xff] }
  0x48   : > { %v549_v45 = vld [vmem:[%s2469_s25 + $0x900] sm:$0xff]  ;;  %803 = vmatpush.msra.mxu1 %v429_v44  ;;  %v302_v44 = vld [vmem:[%s2469_s25 + $0x148] sm:$0xff] }
  0x49   : > { %v677_v46 = vld [vmem:[%s2469_s25 + $0xd00] sm:$0xff]  ;;  %824 = vmatpush.msra.mxu2 %v549_v45  ;;  %v430_v45 = vld [vmem:[%s2469_s25 + $0x548] sm:$0xff] }
  0x4a   : > { %v293_v47 = vld [vmem:[%s2469_s25 + $0x100] sm:$0xff]  ;;  %844 = vmatpush.msra.mxu3 %v677_v46  ;;  %v678_v46 = vld [vmem:[%s2469_s25 + $0xd08] sm:$0xff] }
  0x4b   : > { %v421_v48 = vld [vmem:[%s2469_s25 + $0x500] sm:$0xff]  ;;  %784 = vmatpush.msra.mxu0 %v293_v47  ;;  %v542_v47 = vld [vmem:[%s2469_s25 + $0x8c8] sm:$0xff] }
  0x4c   : > { %v541_v49 = vld [vmem:[%s2469_s25 + $0x8c0] sm:$0xff]  ;;  %804 = vmatpush.msra.mxu1 %v421_v48  ;;  %v294_v48 = vld [vmem:[%s2469_s25 + $0x108] sm:$0xff] }
  0x4d   : > { %v669_v50 = vld [vmem:[%s2469_s25 + $0xcc0] sm:$0xff]  ;;  %825 = vmatpush.msra.mxu2 %v541_v49  ;;  %v422_v49 = vld [vmem:[%s2469_s25 + $0x508] sm:$0xff] }
  0x4e   : > { %v285_v51 = vld [vmem:[%s2469_s25 + $0xc0] sm:$0xff]  ;;  %845 = vmatpush.msra.mxu3 %v669_v50  ;;  %v670_v50 = vld [vmem:[%s2469_s25 + $0xcc8] sm:$0xff] }
  0x4f   : > { %v413_v52 = vld [vmem:[%s2469_s25 + $0x4c0] sm:$0xff]  ;;  %785 = vmatpush.msra.mxu0 %v285_v51  ;;  %v534_v51 = vld [vmem:[%s2469_s25 + $0x888] sm:$0xff] }
  0x50   : > { %v533_v53 = vld [vmem:[%s2469_s25 + $0x880] sm:$0xff]  ;;  %805 = vmatpush.msra.mxu1 %v413_v52  ;;  %v286_v52 = vld [vmem:[%s2469_s25 + $0xc8] sm:$0xff] }
  0x51   : > { %v661_v54 = vld [vmem:[%s2469_s25 + $0xc80] sm:$0xff]  ;;  %826 = vmatpush.msra.mxu2 %v533_v53  ;;  %v414_v53 = vld [vmem:[%s2469_s25 + $0x4c8] sm:$0xff] }
  0x52   : > { %v277_v55 = vld [vmem:[%s2469_s25 + $0x80] sm:$0xff]  ;;  %846 = vmatpush.msra.mxu3 %v661_v54  ;;  %v662_v54 = vld [vmem:[%s2469_s25 + $0xc88] sm:$0xff] }
  0x53   : > { %v405_v56 = vld [vmem:[%s2469_s25 + $0x480] sm:$0xff]  ;;  %786 = vmatpush.msra.mxu0 %v277_v55  ;;  %v526_v55 = vld [vmem:[%s2469_s25 + $0x848] sm:$0xff] }
  0x54   : > { %v525_v57 = vld [vmem:[%s2469_s25 + $0x840] sm:$0xff]  ;;  %806 = vmatpush.msra.mxu1 %v405_v56  ;;  %v278_v56 = vld [vmem:[%s2469_s25 + $0x88] sm:$0xff] }
  0x55   : > { %v653_v58 = vld [vmem:[%s2469_s25 + $0xc40] sm:$0xff]  ;;  %827 = vmatpush.msra.mxu2 %v525_v57  ;;  %v406_v57 = vld [vmem:[%s2469_s25 + $0x488] sm:$0xff] }
  0x56   : > { %v269_v59 = vld [vmem:[%s2469_s25 + $0x40] sm:$0xff]  ;;  %847 = vmatpush.msra.mxu3 %v653_v58  ;;  %v654_v58 = vld [vmem:[%s2469_s25 + $0xc48] sm:$0xff] }
  0x57   : > { %v397_v60 = vld [vmem:[%s2469_s25 + $0x440] sm:$0xff]  ;;  %787 = vmatpush.msra.mxu0 %v269_v59  ;;  %v518_v59 = vld [vmem:[%s2469_s25 + $0x808] sm:$0xff] }
  0x58   : > { %v517_v61 = vld [vmem:[%s2469_s25 + $0x800] sm:$0xff]  ;;  %807 = vmatpush.msra.mxu1 %v397_v60  ;;  %v270_v60 = vld [vmem:[%s2469_s25 + $0x48] sm:$0xff] }
  0x59   : > { %v645_v62 = vld [vmem:[%s2469_s25 + $0xc00] sm:$0xff]  ;;  %828 = vmatpush.msra.mxu2 %v517_v61  ;;  %v2602_v61 = vld [vmem:[%s2474_s29 + $0x10] sm:$0xff] }
  0x5a   : > { %v261_v1 = vld [vmem:[%s2469_s25] sm:$0xff]  ;;  %848 = vmatpush.msra.mxu3 %v645_v62  ;;  %v398_v62 = vld [vmem:[%s2469_s25 + $0x448] sm:$0xff]  ;;  %829 = vmatmul.f32.vlgmr.msra.gmra.mxu2 %v2602_v61 }
  0x5b   : > { %v389_v2 = vld [vmem:[%s2469_s25 + $0x400] sm:$0xff]  ;;  %893 = vmatpush.msrb.mxu2 %v638_v63  ;;  %788 = vmatpush.msra.mxu0 %v261_v1  ;;  %v639_v63 = vld [vmem:[%s2469_s25 + $0xbd0] sm:$0xff]  ;;  %v2608_v1 = vld [vmem:[%s2474_s29 + $0x18] sm:$0xff] }
  0x5c   : > { %913 = vmatpush.msrb.mxu3 %v766_v0  ;;  %808 = vmatpush.msra.mxu1 %v389_v2  ;;  %v646_v0 = vld [vmem:[%s2469_s25 + $0xc08] sm:$0xff] }
  0x5d   : > { %894 = vmatpush.msrb.mxu2 %v630_v3  ;;  %853 = vmatpush.msrb.mxu0 %v382_v4  ;;  %v262_v2 = vld [vmem:[%s2469_s25 + $0x8] sm:$0xff]  ;;  %v631_v3 = vld [vmem:[%s2469_s25 + $0xb90] sm:$0xff] }
  0x5e   : > { %873 = vmatpush.msrb.mxu1 %v510_v5  ;;  %914 = vmatpush.msrb.mxu3 %v758_v6  ;;  %v767_v4 = vld [vmem:[%s2469_s25 + $0xfd0] sm:$0xff]  ;;  %v390_v5 = vld [vmem:[%s2469_s25 + $0x408] sm:$0xff]  ;;  %v2616_v6 = vld [vmem:[%s2474_s29] sm:$0xff] }
  0x5f   : > { %895 = vmatpush.msrb.mxu2 %v622_v7  ;;  %854 = vmatpush.msrb.mxu0 %v374_v8  ;;  %v2620_v7 = vld [vmem:[%s2474_s29 + $0x8] sm:$0xff]  ;;  %v383_v8 = vld [vmem:[%s2469_s25 + $0x3d0] sm:$0xff] }
  0x60   : > { %874 = vmatpush.msrb.mxu1 %v502_v9  ;;  %915 = vmatpush.msrb.mxu3 %v750_v10  ;;  %v511_v9 = vld [vmem:[%s2469_s25 + $0x7d0] sm:$0xff] }
  0x61   : > { %896 = vmatpush.msrb.mxu2 %v614_v11  ;;  %855 = vmatpush.msrb.mxu0 %v366_v12  ;;  %v623_v10 = vld [vmem:[%s2469_s25 + $0xb50] sm:$0xff] }
  0x62   : > { %875 = vmatpush.msrb.mxu1 %v494_v13  ;;  %916 = vmatpush.msrb.mxu3 %v742_v14  ;;  %v759_v11 = vld [vmem:[%s2469_s25 + $0xf90] sm:$0xff] }
  0x63   : > { %897 = vmatpush.msrb.mxu2 %v606_v15  ;;  %856 = vmatpush.msrb.mxu0 %v358_v16  ;;  %v375_v12 = vld [vmem:[%s2469_s25 + $0x390] sm:$0xff] }
  0x64   : > { %876 = vmatpush.msrb.mxu1 %v486_v17  ;;  %917 = vmatpush.msrb.mxu3 %v734_v18  ;;  %v503_v13 = vld [vmem:[%s2469_s25 + $0x790] sm:$0xff] }
  0x65   : > { %898 = vmatpush.msrb.mxu2 %v598_v19  ;;  %857 = vmatpush.msrb.mxu0 %v350_v20  ;;  %v615_v14 = vld [vmem:[%s2469_s25 + $0xb10] sm:$0xff] }
  0x66   : > { %877 = vmatpush.msrb.mxu1 %v478_v21  ;;  %918 = vmatpush.msrb.mxu3 %v726_v22  ;;  %v751_v15 = vld [vmem:[%s2469_s25 + $0xf50] sm:$0xff] }
  0x67   : > { %899 = vmatpush.msrb.mxu2 %v590_v23  ;;  %858 = vmatpush.msrb.mxu0 %v342_v24  ;;  %v367_v16 = vld [vmem:[%s2469_s25 + $0x350] sm:$0xff] }
  0x68   : > { %878 = vmatpush.msrb.mxu1 %v470_v25  ;;  %919 = vmatpush.msrb.mxu3 %v718_v26  ;;  %v495_v17 = vld [vmem:[%s2469_s25 + $0x750] sm:$0xff] }
  0x69   : > { %900 = vmatpush.msrb.mxu2 %v582_v27  ;;  %859 = vmatpush.msrb.mxu0 %v334_v28  ;;  %v607_v18 = vld [vmem:[%s2469_s25 + $0xad0] sm:$0xff] }
  0x6a   : > { %879 = vmatpush.msrb.mxu1 %v462_v29  ;;  %920 = vmatpush.msrb.mxu3 %v710_v30  ;;  %v743_v19 = vld [vmem:[%s2469_s25 + $0xf10] sm:$0xff] }
  0x6b   : > { %901 = vmatpush.msrb.mxu2 %v574_v31  ;;  %860 = vmatpush.msrb.mxu0 %v326_v32  ;;  %v359_v20 = vld [vmem:[%s2469_s25 + $0x310] sm:$0xff] }
  0x6c   : > { %880 = vmatpush.msrb.mxu1 %v454_v33  ;;  %921 = vmatpush.msrb.mxu3 %v702_v34  ;;  %v487_v21 = vld [vmem:[%s2469_s25 + $0x710] sm:$0xff] }
  0x6d   : > { %902 = vmatpush.msrb.mxu2 %v566_v35  ;;  %861 = vmatpush.msrb.mxu0 %v318_v36  ;;  %v599_v22 = vld [vmem:[%s2469_s25 + $0xa90] sm:$0xff] }
  0x6e   : > { %881 = vmatpush.msrb.mxu1 %v446_v37  ;;  %922 = vmatpush.msrb.mxu3 %v694_v38  ;;  %v735_v23 = vld [vmem:[%s2469_s25 + $0xed0] sm:$0xff] }
  0x6f   : > { %903 = vmatpush.msrb.mxu2 %v558_v39  ;;  %862 = vmatpush.msrb.mxu0 %v310_v40  ;;  %v351_v24 = vld [vmem:[%s2469_s25 + $0x2d0] sm:$0xff] }
  0x70   : > { %882 = vmatpush.msrb.mxu1 %v438_v41  ;;  %923 = vmatpush.msrb.mxu3 %v686_v42  ;;  %v479_v25 = vld [vmem:[%s2469_s25 + $0x6d0] sm:$0xff] }
  0x71   : > { %904 = vmatpush.msrb.mxu2 %v550_v43  ;;  %863 = vmatpush.msrb.mxu0 %v302_v44  ;;  %v591_v26 = vld [vmem:[%s2469_s25 + $0xa50] sm:$0xff] }
  0x72   : > { %883 = vmatpush.msrb.mxu1 %v430_v45  ;;  %924 = vmatpush.msrb.mxu3 %v678_v46  ;;  %v727_v27 = vld [vmem:[%s2469_s25 + $0xe90] sm:$0xff] }
  0x73   : > { %905 = vmatpush.msrb.mxu2 %v542_v47  ;;  %864 = vmatpush.msrb.mxu0 %v294_v48  ;;  %v343_v28 = vld [vmem:[%s2469_s25 + $0x290] sm:$0xff] }
  0x74   : > { %884 = vmatpush.msrb.mxu1 %v422_v49  ;;  %925 = vmatpush.msrb.mxu3 %v670_v50  ;;  %v471_v29 = vld [vmem:[%s2469_s25 + $0x690] sm:$0xff] }
  0x75   : > { %906 = vmatpush.msrb.mxu2 %v534_v51  ;;  %865 = vmatpush.msrb.mxu0 %v286_v52  ;;  %v583_v30 = vld [vmem:[%s2469_s25 + $0xa10] sm:$0xff] }
  0x76   : > { %885 = vmatpush.msrb.mxu1 %v414_v53  ;;  %926 = vmatpush.msrb.mxu3 %v662_v54  ;;  %v719_v31 = vld [vmem:[%s2469_s25 + $0xe50] sm:$0xff] }
  0x77   : > { %907 = vmatpush.msrb.mxu2 %v526_v55  ;;  %866 = vmatpush.msrb.mxu0 %v278_v56  ;;  %v335_v32 = vld [vmem:[%s2469_s25 + $0x250] sm:$0xff] }
  0x78   : > { %886 = vmatpush.msrb.mxu1 %v406_v57  ;;  %927 = vmatpush.msrb.mxu3 %v654_v58  ;;  %v463_v33 = vld [vmem:[%s2469_s25 + $0x650] sm:$0xff] }
  0x79   : > { %908 = vmatpush.msrb.mxu2 %v518_v59  ;;  %867 = vmatpush.msrb.mxu0 %v270_v60  ;;  %v575_v34 = vld [vmem:[%s2469_s25 + $0x9d0] sm:$0xff] }
  0x7a   : > { %887 = vmatpush.msrb.mxu1 %v398_v62  ;;  %928 = vmatpush.msrb.mxu3 %v646_v0  ;;  %v711_v35 = vld [vmem:[%s2469_s25 + $0xe10] sm:$0xff] }
  0x7b   : > { %973 = vmatpush.msra.mxu2 %v639_v63  ;;  %849 = vmatmul.f32.vlgmr.msra.gmra.mxu3 %v2608_v1  ;;  %v327_v36 = vld [vmem:[%s2469_s25 + $0x210] sm:$0xff] }
  0x7c   : > { %868 = vmatpush.msrb.mxu0 %v262_v2  ;;  %993 = vmatpush.msra.mxu3 %v767_v4  ;;  %v455_v37 = vld [vmem:[%s2469_s25 + $0x610] sm:$0xff]  ;;  %v640_v2 = vld [vmem:[%s2469_s25 + $0xbd8] sm:$0xff] }
  0x7d   : > { %974 = vmatpush.msra.mxu2 %v631_v3  ;;  %888 = vmatpush.msrb.mxu1 %v390_v5  ;;  %v567_v38 = vld [vmem:[%s2469_s25 + $0x990] sm:$0xff] }
  0x7e   : > { %789 = vmatmul.f32.vlgmr.msra.gmra.mxu0 %v2616_v6  ;;  %809 = vmatmul.f32.vlgmr.msra.gmra.mxu1 %v2620_v7  ;;  %v703_v39 = vld [vmem:[%s2469_s25 + $0xdd0] sm:$0xff] }
  0x7f   : > { %933 = vmatpush.msra.mxu0 %v383_v8  ;;  %953 = vmatpush.msra.mxu1 %v511_v9  ;;  %v319_v40 = vld [vmem:[%s2469_s25 + $0x1d0] sm:$0xff]  ;;  %v632_v8 = vld [vmem:[%s2469_s25 + $0xb98] sm:$0xff] }
  0x80   : > { %975 = vmatpush.msra.mxu2 %v623_v10  ;;  %994 = vmatpush.msra.mxu3 %v759_v11  ;;  %v447_v41 = vld [vmem:[%s2469_s25 + $0x5d0] sm:$0xff]  ;;  %v768_v9 = vld [vmem:[%s2469_s25 + $0xfd8] sm:$0xff] }
  0x81   : > { %934 = vmatpush.msra.mxu0 %v375_v12  ;;  %954 = vmatpush.msra.mxu1 %v503_v13  ;;  %v559_v42 = vld [vmem:[%s2469_s25 + $0x950] sm:$0xff]  ;;  %v384_v12 = vld [vmem:[%s2469_s25 + $0x3d8] sm:$0xff] }
  0x82   : > { %976 = vmatpush.msra.mxu2 %v615_v14  ;;  %995 = vmatpush.msra.mxu3 %v751_v15  ;;  %v695_v43 = vld [vmem:[%s2469_s25 + $0xd90] sm:$0xff]  ;;  %v512_v13 = vld [vmem:[%s2469_s25 + $0x7d8] sm:$0xff] }
  0x83   : > { %935 = vmatpush.msra.mxu0 %v367_v16  ;;  %955 = vmatpush.msra.mxu1 %v495_v17  ;;  %v311_v44 = vld [vmem:[%s2469_s25 + $0x190] sm:$0xff]  ;;  %v624_v14 = vld [vmem:[%s2469_s25 + $0xb58] sm:$0xff] }
  0x84   : > { %977 = vmatpush.msra.mxu2 %v607_v18  ;;  %996 = vmatpush.msra.mxu3 %v743_v19  ;;  %v439_v45 = vld [vmem:[%s2469_s25 + $0x590] sm:$0xff]  ;;  %v760_v15 = vld [vmem:[%s2469_s25 + $0xf98] sm:$0xff] }
  0x85   : > { %936 = vmatpush.msra.mxu0 %v359_v20  ;;  %956 = vmatpush.msra.mxu1 %v487_v21  ;;  %v551_v46 = vld [vmem:[%s2469_s25 + $0x910] sm:$0xff]  ;;  %v376_v16 = vld [vmem:[%s2469_s25 + $0x398] sm:$0xff] }
  0x86   : > { %978 = vmatpush.msra.mxu2 %v599_v22  ;;  %997 = vmatpush.msra.mxu3 %v735_v23  ;;  %v687_v47 = vld [vmem:[%s2469_s25 + $0xd50] sm:$0xff]  ;;  %v504_v17 = vld [vmem:[%s2469_s25 + $0x798] sm:$0xff] }
  0x87   : > { %937 = vmatpush.msra.mxu0 %v351_v24  ;;  %957 = vmatpush.msra.mxu1 %v479_v25  ;;  %v303_v48 = vld [vmem:[%s2469_s25 + $0x150] sm:$0xff]  ;;  %v616_v18 = vld [vmem:[%s2469_s25 + $0xb18] sm:$0xff] }
  0x88   : > { %979 = vmatpush.msra.mxu2 %v591_v26  ;;  %998 = vmatpush.msra.mxu3 %v727_v27  ;;  %v431_v49 = vld [vmem:[%s2469_s25 + $0x550] sm:$0xff]  ;;  %v752_v19 = vld [vmem:[%s2469_s25 + $0xf58] sm:$0xff] }
  0x89   : > { %938 = vmatpush.msra.mxu0 %v343_v28  ;;  %958 = vmatpush.msra.mxu1 %v471_v29  ;;  %v543_v50 = vld [vmem:[%s2469_s25 + $0x8d0] sm:$0xff]  ;;  %v368_v20 = vld [vmem:[%s2469_s25 + $0x358] sm:$0xff] }
  0x8a   : > { %980 = vmatpush.msra.mxu2 %v583_v30  ;;  %999 = vmatpush.msra.mxu3 %v719_v31  ;;  %v679_v51 = vld [vmem:[%s2469_s25 + $0xd10] sm:$0xff]  ;;  %v496_v21 = vld [vmem:[%s2469_s25 + $0x758] sm:$0xff] }
  0x8b   : > { %939 = vmatpush.msra.mxu0 %v335_v32  ;;  %959 = vmatpush.msra.mxu1 %v463_v33  ;;  %v295_v52 = vld [vmem:[%s2469_s25 + $0x110] sm:$0xff]  ;;  %v608_v22 = vld [vmem:[%s2469_s25 + $0xad8] sm:$0xff] }
  0x8c   : > { %981 = vmatpush.msra.mxu2 %v575_v34  ;;  %1000 = vmatpush.msra.mxu3 %v711_v35  ;;  %v423_v53 = vld [vmem:[%s2469_s25 + $0x510] sm:$0xff]  ;;  %v744_v23 = vld [vmem:[%s2469_s25 + $0xf18] sm:$0xff] }
  0x8d   : > { %940 = vmatpush.msra.mxu0 %v327_v36  ;;  %960 = vmatpush.msra.mxu1 %v455_v37  ;;  %v535_v54 = vld [vmem:[%s2469_s25 + $0x890] sm:$0xff]  ;;  %v360_v24 = vld [vmem:[%s2469_s25 + $0x318] sm:$0xff] }
  0x8e   : > { %982 = vmatpush.msra.mxu2 %v567_v38  ;;  %1001 = vmatpush.msra.mxu3 %v703_v39  ;;  %v671_v55 = vld [vmem:[%s2469_s25 + $0xcd0] sm:$0xff]  ;;  %v488_v25 = vld [vmem:[%s2469_s25 + $0x718] sm:$0xff] }
  0x8f   : > { %941 = vmatpush.msra.mxu0 %v319_v40  ;;  %961 = vmatpush.msra.mxu1 %v447_v41  ;;  %v287_v56 = vld [vmem:[%s2469_s25 + $0xd0] sm:$0xff]  ;;  %v600_v26 = vld [vmem:[%s2469_s25 + $0xa98] sm:$0xff] }
  0x90   : > { %983 = vmatpush.msra.mxu2 %v559_v42  ;;  %1002 = vmatpush.msra.mxu3 %v695_v43  ;;  %v415_v57 = vld [vmem:[%s2469_s25 + $0x4d0] sm:$0xff]  ;;  %v736_v27 = vld [vmem:[%s2469_s25 + $0xed8] sm:$0xff] }
  0x91   : > { %942 = vmatpush.msra.mxu0 %v311_v44  ;;  %962 = vmatpush.msra.mxu1 %v439_v45  ;;  %v527_v58 = vld [vmem:[%s2469_s25 + $0x850] sm:$0xff]  ;;  %v352_v28 = vld [vmem:[%s2469_s25 + $0x2d8] sm:$0xff] }
  0x92   : > { %984 = vmatpush.msra.mxu2 %v551_v46  ;;  %1003 = vmatpush.msra.mxu3 %v687_v47  ;;  %v663_v59 = vld [vmem:[%s2469_s25 + $0xc90] sm:$0xff]  ;;  %v480_v29 = vld [vmem:[%s2469_s25 + $0x6d8] sm:$0xff] }
  0x93   : > { %943 = vmatpush.msra.mxu0 %v303_v48  ;;  %963 = vmatpush.msra.mxu1 %v431_v49  ;;  %v279_v60 = vld [vmem:[%s2469_s25 + $0x90] sm:$0xff]  ;;  %v592_v30 = vld [vmem:[%s2469_s25 + $0xa58] sm:$0xff] }
  0x94   : > { %985 = vmatpush.msra.mxu2 %v543_v50  ;;  %1004 = vmatpush.msra.mxu3 %v679_v51  ;;  %v407_v62 = vld [vmem:[%s2469_s25 + $0x490] sm:$0xff]  ;;  %v728_v31 = vld [vmem:[%s2469_s25 + $0xe98] sm:$0xff] }
  0x95   : > { %944 = vmatpush.msra.mxu0 %v295_v52  ;;  %964 = vmatpush.msra.mxu1 %v423_v53  ;;  %v519_v63 = vld [vmem:[%s2469_s25 + $0x810] sm:$0xff]  ;;  %v344_v32 = vld [vmem:[%s2469_s25 + $0x298] sm:$0xff] }
  0x96   : > { %986 = vmatpush.msra.mxu2 %v535_v54  ;;  %1005 = vmatpush.msra.mxu3 %v671_v55  ;;  %v655_v0 = vld [vmem:[%s2469_s25 + $0xc50] sm:$0xff]  ;;  %v472_v33 = vld [vmem:[%s2469_s25 + $0x698] sm:$0xff] }
  0x97   : > { %945 = vmatpush.msra.mxu0 %v287_v56  ;;  %965 = vmatpush.msra.mxu1 %v415_v57  ;;  %v271_v3 = vld [vmem:[%s2469_s25 + $0x50] sm:$0xff]  ;;  %v584_v34 = vld [vmem:[%s2469_s25 + $0xa18] sm:$0xff] }
  0x98   : > { %987 = vmatpush.msra.mxu2 %v527_v58  ;;  %1006 = vmatpush.msra.mxu3 %v663_v59  ;;  %v399_v4 = vld [vmem:[%s2469_s25 + $0x450] sm:$0xff]  ;;  %v720_v35 = vld [vmem:[%s2469_s25 + $0xe58] sm:$0xff] }
  0x99   : > { %946 = vmatpush.msra.mxu0 %v279_v60  ;;  %966 = vmatpush.msra.mxu1 %v407_v62  ;;  %v647_v5 = vld [vmem:[%s2469_s25 + $0xc10] sm:$0xff]  ;;  %v336_v36 = vld [vmem:[%s2469_s25 + $0x258] sm:$0xff] }
  0x9a   : > { %988 = vmatpush.msra.mxu2 %v519_v63  ;;  %1007 = vmatpush.msra.mxu3 %v655_v0  ;;  %v263_v10 = vld [vmem:[%s2469_s25 + $0x10] sm:$0xff]  ;;  %v464_v37 = vld [vmem:[%s2469_s25 + $0x658] sm:$0xff] }
  0x9b   : > { %909 = vmatmul.f32.vlgmr.msrb.gmra.mxu2 %v2602_v61  ;;  %947 = vmatpush.msra.mxu0 %v271_v3  ;;  %v391_v11 = vld [vmem:[%s2469_s25 + $0x410] sm:$0xff]  ;;  %v576_v38 = vld [vmem:[%s2469_s25 + $0x9d8] sm:$0xff] }
  0x9c   : > { %1053 = vmatpush.msrb.mxu2 %v640_v2  ;;  %967 = vmatpush.msra.mxu1 %v399_v4  ;;  %v712_v39 = vld [vmem:[%s2469_s25 + $0xe18] sm:$0xff] }
  0x9d   : > { %1008 = vmatpush.msra.mxu3 %v647_v5  ;;  %948 = vmatpush.msra.mxu0 %v263_v10  ;;  %v328_v40 = vld [vmem:[%s2469_s25 + $0x218] sm:$0xff] }
  0x9e   : > { %929 = vmatmul.f32.vlgmr.msrb.gmra.mxu3 %v2608_v1  ;;  %1054 = vmatpush.msrb.mxu2 %v632_v8  ;;  %v456_v41 = vld [vmem:[%s2469_s25 + $0x618] sm:$0xff]  ;;  %v641_v8 = vld [vmem:[%s2469_s25 + $0xbe0] sm:$0xff] }
  0x9f   : > { %1073 = vmatpush.msrb.mxu3 %v768_v9  ;;  %968 = vmatpush.msra.mxu1 %v391_v11  ;;  %v568_v42 = vld [vmem:[%s2469_s25 + $0x998] sm:$0xff] }
  0xa0   : > { %869 = vmatmul.f32.vlgmr.msrb.gmra.mxu0 %v2616_v6  ;;  %889 = vmatmul.f32.vlgmr.msrb.gmra.mxu1 %v2620_v7  ;;  %v704_v43 = vld [vmem:[%s2469_s25 + $0xdd8] sm:$0xff] }
  0xa1   : > { %1013 = vmatpush.msrb.mxu0 %v384_v12  ;;  %1033 = vmatpush.msrb.mxu1 %v512_v13  ;;  %v320_v44 = vld [vmem:[%s2469_s25 + $0x1d8] sm:$0xff]  ;;  %v633_v12 = vld [vmem:[%s2469_s25 + $0xba0] sm:$0xff] }
  0xa2   : > { %1055 = vmatpush.msrb.mxu2 %v624_v14  ;;  %1074 = vmatpush.msrb.mxu3 %v760_v15  ;;  %v448_v45 = vld [vmem:[%s2469_s25 + $0x5d8] sm:$0xff]  ;;  %v769_v13 = vld [vmem:[%s2469_s25 + $0xfe0] sm:$0xff] }
  0xa3   : > { %1014 = vmatpush.msrb.mxu0 %v376_v16  ;;  %1034 = vmatpush.msrb.mxu1 %v504_v17  ;;  %v560_v46 = vld [vmem:[%s2469_s25 + $0x958] sm:$0xff]  ;;  %v385_v16 = vld [vmem:[%s2469_s25 + $0x3e0] sm:$0xff] }
  0xa4   : > { %1056 = vmatpush.msrb.mxu2 %v616_v18  ;;  %1075 = vmatpush.msrb.mxu3 %v752_v19  ;;  %v696_v47 = vld [vmem:[%s2469_s25 + $0xd98] sm:$0xff]  ;;  %v513_v17 = vld [vmem:[%s2469_s25 + $0x7e0] sm:$0xff] }
  0xa5   : > { %1015 = vmatpush.msrb.mxu0 %v368_v20  ;;  %1035 = vmatpush.msrb.mxu1 %v496_v21  ;;  %v312_v48 = vld [vmem:[%s2469_s25 + $0x198] sm:$0xff]  ;;  %v625_v18 = vld [vmem:[%s2469_s25 + $0xb60] sm:$0xff] }
  0xa6   : > { %1057 = vmatpush.msrb.mxu2 %v608_v22  ;;  %1076 = vmatpush.msrb.mxu3 %v744_v23  ;;  %v440_v49 = vld [vmem:[%s2469_s25 + $0x598] sm:$0xff]  ;;  %v761_v19 = vld [vmem:[%s2469_s25 + $0xfa0] sm:$0xff] }
  0xa7   : > { %1016 = vmatpush.msrb.mxu0 %v360_v24  ;;  %1036 = vmatpush.msrb.mxu1 %v488_v25  ;;  %v552_v50 = vld [vmem:[%s2469_s25 + $0x918] sm:$0xff]  ;;  %v377_v20 = vld [vmem:[%s2469_s25 + $0x3a0] sm:$0xff] }
  0xa8   : > { %1058 = vmatpush.msrb.mxu2 %v600_v26  ;;  %1077 = vmatpush.msrb.mxu3 %v736_v27  ;;  %v688_v51 = vld [vmem:[%s2469_s25 + $0xd58] sm:$0xff]  ;;  %v505_v21 = vld [vmem:[%s2469_s25 + $0x7a0] sm:$0xff] }
  0xa9   : > { %1017 = vmatpush.msrb.mxu0 %v352_v28  ;;  %1037 = vmatpush.msrb.mxu1 %v480_v29  ;;  %v304_v52 = vld [vmem:[%s2469_s25 + $0x158] sm:$0xff]  ;;  %v617_v22 = vld [vmem:[%s2469_s25 + $0xb20] sm:$0xff] }
  0xaa   : > { %1059 = vmatpush.msrb.mxu2 %v592_v30  ;;  %1078 = vmatpush.msrb.mxu3 %v728_v31  ;;  %v432_v53 = vld [vmem:[%s2469_s25 + $0x558] sm:$0xff]  ;;  %v753_v23 = vld [vmem:[%s2469_s25 + $0xf60] sm:$0xff] }
  0xab   : > { %1018 = vmatpush.msrb.mxu0 %v344_v32  ;;  %1038 = vmatpush.msrb.mxu1 %v472_v33  ;;  %v544_v54 = vld [vmem:[%s2469_s25 + $0x8d8] sm:$0xff]  ;;  %v369_v24 = vld [vmem:[%s2469_s25 + $0x360] sm:$0xff] }
  0xac   : > { %1060 = vmatpush.msrb.mxu2 %v584_v34  ;;  %1079 = vmatpush.msrb.mxu3 %v720_v35  ;;  %v680_v55 = vld [vmem:[%s2469_s25 + $0xd18] sm:$0xff]  ;;  %v497_v25 = vld [vmem:[%s2469_s25 + $0x760] sm:$0xff] }
  0xad   : > { %1019 = vmatpush.msrb.mxu0 %v336_v36  ;;  %1039 = vmatpush.msrb.mxu1 %v464_v37  ;;  %v296_v56 = vld [vmem:[%s2469_s25 + $0x118] sm:$0xff]  ;;  %v609_v26 = vld [vmem:[%s2469_s25 + $0xae0] sm:$0xff] }
  0xae   : > { %1061 = vmatpush.msrb.mxu2 %v576_v38  ;;  %1080 = vmatpush.msrb.mxu3 %v712_v39  ;;  %v424_v57 = vld [vmem:[%s2469_s25 + $0x518] sm:$0xff]  ;;  %v745_v27 = vld [vmem:[%s2469_s25 + $0xf20] sm:$0xff] }
  0xaf   : > { %1020 = vmatpush.msrb.mxu0 %v328_v40  ;;  %1040 = vmatpush.msrb.mxu1 %v456_v41  ;;  %v536_v58 = vld [vmem:[%s2469_s25 + $0x898] sm:$0xff]  ;;  %v361_v28 = vld [vmem:[%s2469_s25 + $0x320] sm:$0xff] }
  0xb0   : > { %1062 = vmatpush.msrb.mxu2 %v568_v42  ;;  %1081 = vmatpush.msrb.mxu3 %v704_v43  ;;  %v672_v59 = vld [vmem:[%s2469_s25 + $0xcd8] sm:$0xff]  ;;  %v489_v29 = vld [vmem:[%s2469_s25 + $0x720] sm:$0xff] }
  0xb1   : > { %1021 = vmatpush.msrb.mxu0 %v320_v44  ;;  %1041 = vmatpush.msrb.mxu1 %v448_v45  ;;  %v288_v60 = vld [vmem:[%s2469_s25 + $0xd8] sm:$0xff]  ;;  %v601_v30 = vld [vmem:[%s2469_s25 + $0xaa0] sm:$0xff] }
  0xb2   : > { %1063 = vmatpush.msrb.mxu2 %v560_v46  ;;  %1082 = vmatpush.msrb.mxu3 %v696_v47  ;;  %v416_v62 = vld [vmem:[%s2469_s25 + $0x4d8] sm:$0xff]  ;;  %v737_v31 = vld [vmem:[%s2469_s25 + $0xee0] sm:$0xff] }
  0xb3   : > { %1022 = vmatpush.msrb.mxu0 %v312_v48  ;;  %1042 = vmatpush.msrb.mxu1 %v440_v49  ;;  %v528_v63 = vld [vmem:[%s2469_s25 + $0x858] sm:$0xff]  ;;  %v353_v32 = vld [vmem:[%s2469_s25 + $0x2e0] sm:$0xff] }
  0xb4   : > { %1064 = vmatpush.msrb.mxu2 %v552_v50  ;;  %1083 = vmatpush.msrb.mxu3 %v688_v51  ;;  %v664_v0 = vld [vmem:[%s2469_s25 + $0xc98] sm:$0xff]  ;;  %v481_v33 = vld [vmem:[%s2469_s25 + $0x6e0] sm:$0xff] }
  0xb5   : > { %1023 = vmatpush.msrb.mxu0 %v304_v52  ;;  %1043 = vmatpush.msrb.mxu1 %v432_v53  ;;  %v280_v2 = vld [vmem:[%s2469_s25 + $0x98] sm:$0xff]  ;;  %v593_v34 = vld [vmem:[%s2469_s25 + $0xa60] sm:$0xff] }
  0xb6   : > { %1065 = vmatpush.msrb.mxu2 %v544_v54  ;;  %1084 = vmatpush.msrb.mxu3 %v680_v55  ;;  %v408_v3 = vld [vmem:[%s2469_s25 + $0x498] sm:$0xff]  ;;  %v729_v35 = vld [vmem:[%s2469_s25 + $0xea0] sm:$0xff] }
  0xb7   : > { %1024 = vmatpush.msrb.mxu0 %v296_v56  ;;  %1044 = vmatpush.msrb.mxu1 %v424_v57  ;;  %v520_v4 = vld [vmem:[%s2469_s25 + $0x818] sm:$0xff]  ;;  %v345_v36 = vld [vmem:[%s2469_s25 + $0x2a0] sm:$0xff] }
  0xb8   : > { %1066 = vmatpush.msrb.mxu2 %v536_v58  ;;  %1085 = vmatpush.msrb.mxu3 %v672_v59  ;;  %v656_v5 = vld [vmem:[%s2469_s25 + $0xc58] sm:$0xff]  ;;  %v473_v37 = vld [vmem:[%s2469_s25 + $0x6a0] sm:$0xff] }
  0xb9   : > { %1025 = vmatpush.msrb.mxu0 %v288_v60  ;;  %1045 = vmatpush.msrb.mxu1 %v416_v62  ;;  %v272_v9 = vld [vmem:[%s2469_s25 + $0x58] sm:$0xff]  ;;  %v585_v38 = vld [vmem:[%s2469_s25 + $0xa20] sm:$0xff] }
  0xba   : > { %1067 = vmatpush.msrb.mxu2 %v528_v63  ;;  %1086 = vmatpush.msrb.mxu3 %v664_v0  ;;  %v400_v10 = vld [vmem:[%s2469_s25 + $0x458] sm:$0xff]  ;;  %v721_v39 = vld [vmem:[%s2469_s25 + $0xe60] sm:$0xff] }
  0xbb   : > { %1026 = vmatpush.msrb.mxu0 %v280_v2  ;;  %1046 = vmatpush.msrb.mxu1 %v408_v3  ;;  %v648_v11 = vld [vmem:[%s2469_s25 + $0xc18] sm:$0xff]  ;;  %v337_v40 = vld [vmem:[%s2469_s25 + $0x260] sm:$0xff] }
  0xbc   : > { %1068 = vmatpush.msrb.mxu2 %v520_v4  ;;  %1087 = vmatpush.msrb.mxu3 %v656_v5  ;;  %v264_v14 = vld [vmem:[%s2469_s25 + $0x18] sm:$0xff]  ;;  %v465_v41 = vld [vmem:[%s2469_s25 + $0x660] sm:$0xff] }
  0xbd   : > { %989 = vmatmul.f32.vlgmr.msra.gmra.mxu2 %v2602_v61  ;;  %1027 = vmatpush.msrb.mxu0 %v272_v9  ;;  %v392_v15 = vld [vmem:[%s2469_s25 + $0x418] sm:$0xff]  ;;  %v577_v42 = vld [vmem:[%s2469_s25 + $0x9e0] sm:$0xff] }
  0xbe   : > { %1133 = vmatpush.msra.mxu2 %v641_v8  ;;  %1047 = vmatpush.msrb.mxu1 %v400_v10  ;;  %v713_v43 = vld [vmem:[%s2469_s25 + $0xe20] sm:$0xff] }
  0xbf   : > { %1088 = vmatpush.msrb.mxu3 %v648_v11  ;;  %1028 = vmatpush.msrb.mxu0 %v264_v14  ;;  %v329_v44 = vld [vmem:[%s2469_s25 + $0x220] sm:$0xff] }
  0xc0   : > { %1009 = vmatmul.f32.vlgmr.msra.gmra.mxu3 %v2608_v1  ;;  %1134 = vmatpush.msra.mxu2 %v633_v12  ;;  %v457_v45 = vld [vmem:[%s2469_s25 + $0x620] sm:$0xff]  ;;  %v642_v12 = vld [vmem:[%s2469_s25 + $0xbe8] sm:$0xff] }
  0xc1   : > { %1153 = vmatpush.msra.mxu3 %v769_v13  ;;  %1048 = vmatpush.msrb.mxu1 %v392_v15  ;;  %v569_v46 = vld [vmem:[%s2469_s25 + $0x9a0] sm:$0xff] }
  0xc2   : > { %949 = vmatmul.f32.vlgmr.msra.gmra.mxu0 %v2616_v6  ;;  %969 = vmatmul.f32.vlgmr.msra.gmra.mxu1 %v2620_v7  ;;  %v705_v47 = vld [vmem:[%s2469_s25 + $0xde0] sm:$0xff] }
  0xc3   : > { %1093 = vmatpush.msra.mxu0 %v385_v16  ;;  %1113 = vmatpush.msra.mxu1 %v513_v17  ;;  %v321_v48 = vld [vmem:[%s2469_s25 + $0x1e0] sm:$0xff]  ;;  %v634_v16 = vld [vmem:[%s2469_s25 + $0xba8] sm:$0xff] }
  0xc4   : > { %1135 = vmatpush.msra.mxu2 %v625_v18  ;;  %1154 = vmatpush.msra.mxu3 %v761_v19  ;;  %v449_v49 = vld [vmem:[%s2469_s25 + $0x5e0] sm:$0xff]  ;;  %v770_v17 = vld [vmem:[%s2469_s25 + $0xfe8] sm:$0xff] }
  0xc5   : > { %1094 = vmatpush.msra.mxu0 %v377_v20  ;;  %1114 = vmatpush.msra.mxu1 %v505_v21  ;;  %v561_v50 = vld [vmem:[%s2469_s25 + $0x960] sm:$0xff]  ;;  %v386_v20 = vld [vmem:[%s2469_s25 + $0x3e8] sm:$0xff] }
  0xc6   : > { %1136 = vmatpush.msra.mxu2 %v617_v22  ;;  %1155 = vmatpush.msra.mxu3 %v753_v23  ;;  %v697_v51 = vld [vmem:[%s2469_s25 + $0xda0] sm:$0xff]  ;;  %v626_v21 = vld [vmem:[%s2469_s25 + $0xb68] sm:$0xff] }
  0xc7   : > { %1095 = vmatpush.msra.mxu0 %v369_v24  ;;  %1115 = vmatpush.msra.mxu1 %v497_v25  ;;  %v313_v52 = vld [vmem:[%s2469_s25 + $0x1a0] sm:$0xff]  ;;  %v762_v22 = vld [vmem:[%s2469_s25 + $0xfa8] sm:$0xff] }
  0xc8   : > { %1137 = vmatpush.msra.mxu2 %v609_v26  ;;  %1156 = vmatpush.msra.mxu3 %v745_v27  ;;  %v441_v53 = vld [vmem:[%s2469_s25 + $0x5a0] sm:$0xff]  ;;  %v378_v23 = vld [vmem:[%s2469_s25 + $0x3a8] sm:$0xff] }
  0xc9   : > { %1096 = vmatpush.msra.mxu0 %v361_v28  ;;  %1116 = vmatpush.msra.mxu1 %v489_v29  ;;  %v553_v54 = vld [vmem:[%s2469_s25 + $0x920] sm:$0xff]  ;;  %v618_v24 = vld [vmem:[%s2469_s25 + $0xb28] sm:$0xff] }
  0xca   : > { %1138 = vmatpush.msra.mxu2 %v601_v30  ;;  %1157 = vmatpush.msra.mxu3 %v737_v31  ;;  %v689_v55 = vld [vmem:[%s2469_s25 + $0xd60] sm:$0xff]  ;;  %v754_v25 = vld [vmem:[%s2469_s25 + $0xf68] sm:$0xff] }
  0xcb   : > { %1097 = vmatpush.msra.mxu0 %v353_v32  ;;  %1117 = vmatpush.msra.mxu1 %v481_v33  ;;  %v305_v56 = vld [vmem:[%s2469_s25 + $0x160] sm:$0xff]  ;;  %v370_v26 = vld [vmem:[%s2469_s25 + $0x368] sm:$0xff] }
  0xcc   : > { %1139 = vmatpush.msra.mxu2 %v593_v34  ;;  %1158 = vmatpush.msra.mxu3 %v729_v35  ;;  %v433_v57 = vld [vmem:[%s2469_s25 + $0x560] sm:$0xff]  ;;  %v610_v27 = vld [vmem:[%s2469_s25 + $0xae8] sm:$0xff] }
  0xcd   : > { %1098 = vmatpush.msra.mxu0 %v345_v36  ;;  %1118 = vmatpush.msra.mxu1 %v473_v37  ;;  %v545_v58 = vld [vmem:[%s2469_s25 + $0x8e0] sm:$0xff]  ;;  %v362_v28 = vld [vmem:[%s2469_s25 + $0x328] sm:$0xff] }
  0xce   : > { %1140 = vmatpush.msra.mxu2 %v585_v38  ;;  %1159 = vmatpush.msra.mxu3 %v721_v39  ;;  %v681_v59 = vld [vmem:[%s2469_s25 + $0xd20] sm:$0xff]  ;;  %v490_v29 = vld [vmem:[%s2469_s25 + $0x728] sm:$0xff] }
  0xcf   : > { %1099 = vmatpush.msra.mxu0 %v337_v40  ;;  %1119 = vmatpush.msra.mxu1 %v465_v41  ;;  %v297_v60 = vld [vmem:[%s2469_s25 + $0x120] sm:$0xff]  ;;  %v602_v30 = vld [vmem:[%s2469_s25 + $0xaa8] sm:$0xff] }
  0xd0   : > { %1141 = vmatpush.msra.mxu2 %v577_v42  ;;  %1160 = vmatpush.msra.mxu3 %v713_v43  ;;  %v425_v62 = vld [vmem:[%s2469_s25 + $0x520] sm:$0xff]  ;;  %v738_v31 = vld [vmem:[%s2469_s25 + $0xee8] sm:$0xff] }
  0xd1   : > { %1100 = vmatpush.msra.mxu0 %v329_v44  ;;  %1120 = vmatpush.msra.mxu1 %v457_v45  ;;  %v537_v63 = vld [vmem:[%s2469_s25 + $0x8a0] sm:$0xff]  ;;  %v354_v32 = vld [vmem:[%s2469_s25 + $0x2e8] sm:$0xff] }
  0xd2   : > { %1142 = vmatpush.msra.mxu2 %v569_v46  ;;  %1161 = vmatpush.msra.mxu3 %v705_v47  ;;  %v673_v0 = vld [vmem:[%s2469_s25 + $0xce0] sm:$0xff]  ;;  %v482_v33 = vld [vmem:[%s2469_s25 + $0x6e8] sm:$0xff] }
  0xd3   : > { %1101 = vmatpush.msra.mxu0 %v321_v48  ;;  %1121 = vmatpush.msra.mxu1 %v449_v49  ;;  %v289_v2 = vld [vmem:[%s2469_s25 + $0xe0] sm:$0xff]  ;;  %v594_v34 = vld [vmem:[%s2469_s25 + $0xa68] sm:$0xff] }
  0xd4   : > { %1143 = vmatpush.msra.mxu2 %v561_v50  ;;  %1162 = vmatpush.msra.mxu3 %v697_v51  ;;  %v417_v3 = vld [vmem:[%s2469_s25 + $0x4e0] sm:$0xff]  ;;  %v730_v35 = vld [vmem:[%s2469_s25 + $0xea8] sm:$0xff] }
  0xd5   : > { %1102 = vmatpush.msra.mxu0 %v313_v52  ;;  %1122 = vmatpush.msra.mxu1 %v441_v53  ;;  %v529_v4 = vld [vmem:[%s2469_s25 + $0x860] sm:$0xff]  ;;  %v346_v36 = vld [vmem:[%s2469_s25 + $0x2a8] sm:$0xff] }
  0xd6   : > { %1144 = vmatpush.msra.mxu2 %v553_v54  ;;  %1163 = vmatpush.msra.mxu3 %v689_v55  ;;  %v665_v5 = vld [vmem:[%s2469_s25 + $0xca0] sm:$0xff]  ;;  %v474_v37 = vld [vmem:[%s2469_s25 + $0x6a8] sm:$0xff] }
  0xd7   : > { %1103 = vmatpush.msra.mxu0 %v305_v56  ;;  %1123 = vmatpush.msra.mxu1 %v433_v57  ;;  %v281_v8 = vld [vmem:[%s2469_s25 + $0xa0] sm:$0xff]  ;;  %v586_v38 = vld [vmem:[%s2469_s25 + $0xa28] sm:$0xff] }
  0xd8   : > { %1145 = vmatpush.msra.mxu2 %v545_v58  ;;  %1164 = vmatpush.msra.mxu3 %v681_v59  ;;  %v409_v9 = vld [vmem:[%s2469_s25 + $0x4a0] sm:$0xff]  ;;  %v722_v39 = vld [vmem:[%s2469_s25 + $0xe68] sm:$0xff] }
  0xd9   : > { %1104 = vmatpush.msra.mxu0 %v297_v60  ;;  %1124 = vmatpush.msra.mxu1 %v425_v62  ;;  %v521_v10 = vld [vmem:[%s2469_s25 + $0x820] sm:$0xff]  ;;  %v338_v40 = vld [vmem:[%s2469_s25 + $0x268] sm:$0xff] }
  0xda   : > { %1146 = vmatpush.msra.mxu2 %v537_v63  ;;  %1165 = vmatpush.msra.mxu3 %v673_v0  ;;  %v657_v11 = vld [vmem:[%s2469_s25 + $0xc60] sm:$0xff]  ;;  %v466_v41 = vld [vmem:[%s2469_s25 + $0x668] sm:$0xff] }
  0xdb   : > { %1105 = vmatpush.msra.mxu0 %v289_v2  ;;  %1125 = vmatpush.msra.mxu1 %v417_v3  ;;  %v273_v13 = vld [vmem:[%s2469_s25 + $0x60] sm:$0xff]  ;;  %v578_v42 = vld [vmem:[%s2469_s25 + $0x9e8] sm:$0xff] }
  0xdc   : > { %1147 = vmatpush.msra.mxu2 %v529_v4  ;;  %1166 = vmatpush.msra.mxu3 %v665_v5  ;;  %v401_v14 = vld [vmem:[%s2469_s25 + $0x460] sm:$0xff]  ;;  %v714_v43 = vld [vmem:[%s2469_s25 + $0xe28] sm:$0xff] }
  0xdd   : > { %1106 = vmatpush.msra.mxu0 %v281_v8  ;;  %1126 = vmatpush.msra.mxu1 %v409_v9  ;;  %v649_v15 = vld [vmem:[%s2469_s25 + $0xc20] sm:$0xff]  ;;  %v330_v44 = vld [vmem:[%s2469_s25 + $0x228] sm:$0xff] }
  0xde   : > { %1148 = vmatpush.msra.mxu2 %v521_v10  ;;  %1167 = vmatpush.msra.mxu3 %v657_v11  ;;  %v265_v18 = vld [vmem:[%s2469_s25 + $0x20] sm:$0xff]  ;;  %v458_v45 = vld [vmem:[%s2469_s25 + $0x628] sm:$0xff] }
  0xdf   : > { %1069 = vmatmul.f32.vlgmr.msrb.gmra.mxu2 %v2602_v61  ;;  %1107 = vmatpush.msra.mxu0 %v273_v13  ;;  %v393_v19 = vld [vmem:[%s2469_s25 + $0x420] sm:$0xff]  ;;  %v514_v61 = vld [vmem:[%s2469_s25 + $0x7e8] sm:$0xff] }
  0xe0   : > { %1213 = vmatpush.msrb.mxu2 %v642_v12  ;;  %1127 = vmatpush.msra.mxu1 %v401_v14  ;;  %v570_v46 = vld [vmem:[%s2469_s25 + $0x9a8] sm:$0xff]  ;;  %v830_v14 = vpop.f32.mrf.mxu2 }
  0xe1   : > { %1168 = vmatpush.msra.mxu3 %v649_v15  ;;  %1108 = vmatpush.msra.mxu0 %v265_v18  ;;  %v706_v47 = vld [vmem:[%s2469_s25 + $0xde8] sm:$0xff] }
  0xe2   : > { %1089 = vmatmul.f32.vlgmr.msrb.gmra.mxu3 %v2608_v1  ;;  %1214 = vmatpush.msrb.mxu2 %v634_v16  ;;  %v506_v1 = vld [vmem:[%s2469_s25 + $0x7a8] sm:$0xff]  ;;  %v643_v16 = vld [vmem:[%s2469_s25 + $0xbf0] sm:$0xff] }
  0xe3   : > { %1233 = vmatpush.msrb.mxu3 %v770_v17  ;;  %1128 = vmatpush.msra.mxu1 %v393_v19  ;;  %v322_v48 = vld [vmem:[%s2469_s25 + $0x1e8] sm:$0xff] }
  0xe4   : > { %1029 = vmatmul.f32.vlgmr.msrb.gmra.mxu0 %v2616_v6  ;;  %1049 = vmatmul.f32.vlgmr.msrb.gmra.mxu1 %v2620_v7  ;;  %v498_v6 = vld [vmem:[%s2469_s25 + $0x768] sm:$0xff] }
  0xe5   : > { %1173 = vmatpush.msrb.mxu0 %v386_v20  ;;  %1193 = vmatpush.msrb.mxu1 %v514_v61  ;;  %v746_v7 = vld [vmem:[%s2469_s25 + $0xf28] sm:$0xff] }
  0xe6   : > { %1215 = vmatpush.msrb.mxu2 %v626_v21  ;;  %1234 = vmatpush.msrb.mxu3 %v762_v22  ;;  %v450_v49 = vld [vmem:[%s2469_s25 + $0x5e8] sm:$0xff]  ;;  %v249_v21 = vld [vmem:[#allocation2 + $0x30] sm:$0xff]  ;;  %v2889_v22 = vld [vmem:[%s2474_s29 + $0x10] sm:$0xff] }
  0xe7   : > { %1174 = vmatpush.msrb.mxu0 %v378_v23  ;;  %1194 = vmatpush.msrb.mxu1 %v506_v1  ;;  %v562_v50 = vld [vmem:[%s2469_s25 + $0x968] sm:$0xff]  ;;  %v635_v23 = vld [vmem:[%s2469_s25 + $0xbb0] sm:$0xff] }
  0xe8   : > { %1216 = vmatpush.msrb.mxu2 %v618_v24  ;;  %1235 = vmatpush.msrb.mxu3 %v754_v25  ;;  %v698_v51 = vld [vmem:[%s2469_s25 + $0xda8] sm:$0xff]  ;;  %v771_v24 = vld [vmem:[%s2469_s25 + $0xff0] sm:$0xff] }
  0xe9   : > { %1175 = vmatpush.msrb.mxu0 %v370_v26  ;;  %1195 = vmatpush.msrb.mxu1 %v498_v6  ;;  %v314_v52 = vld [vmem:[%s2469_s25 + $0x1a8] sm:$0xff] }
  0xea   : > { %1217 = vmatpush.msrb.mxu2 %v610_v27  ;;  %1236 = vmatpush.msrb.mxu3 %v746_v7  ;;  %v442_v53 = vld [vmem:[%s2469_s25 + $0x5a8] sm:$0xff]  ;;  %v2897_v27 = vld [vmem:[%s2474_s29 + $0x18] sm:$0xff]  ;;  %v387_v7 = vld [vmem:[%s2469_s25 + $0x3f0] sm:$0xff] }
  0xeb   : > { %1176 = vmatpush.msrb.mxu0 %v362_v28  ;;  %1196 = vmatpush.msrb.mxu1 %v490_v29  ;;  %v554_v54 = vld [vmem:[%s2469_s25 + $0x928] sm:$0xff]  ;;  %v515_v28 = vld [vmem:[%s2469_s25 + $0x7f0] sm:$0xff] }
  0xec   : > { %1218 = vmatpush.msrb.mxu2 %v602_v30  ;;  %1237 = vmatpush.msrb.mxu3 %v738_v31  ;;  %v690_v55 = vld [vmem:[%s2469_s25 + $0xd68] sm:$0xff]  ;;  %v627_v29 = vld [vmem:[%s2469_s25 + $0xb70] sm:$0xff]  ;;  %v2904_v30 = vld [vmem:[%s2474_s29] sm:$0xff] }
  0xed   : > { %1177 = vmatpush.msrb.mxu0 %v354_v32  ;;  %1197 = vmatpush.msrb.mxu1 %v482_v33  ;;  %v306_v56 = vld [vmem:[%s2469_s25 + $0x168] sm:$0xff]  ;;  %v763_v31 = vld [vmem:[%s2469_s25 + $0xfb0] sm:$0xff] }
  0xee   : > { %1219 = vmatpush.msrb.mxu2 %v594_v34  ;;  %1238 = vmatpush.msrb.mxu3 %v730_v35  ;;  %v434_v57 = vld [vmem:[%s2469_s25 + $0x568] sm:$0xff]  ;;  %v379_v32 = vld [vmem:[%s2469_s25 + $0x3b0] sm:$0xff] }
  0xef   : > { %1178 = vmatpush.msrb.mxu0 %v346_v36  ;;  %1198 = vmatpush.msrb.mxu1 %v474_v37  ;;  %v546_v58 = vld [vmem:[%s2469_s25 + $0x8e8] sm:$0xff]  ;;  %v507_v34 = vld [vmem:[%s2469_s25 + $0x7b0] sm:$0xff] }
  0xf0   : > { %1220 = vmatpush.msrb.mxu2 %v586_v38  ;;  %1239 = vmatpush.msrb.mxu3 %v722_v39  ;;  %v682_v59 = vld [vmem:[%s2469_s25 + $0xd28] sm:$0xff]  ;;  %v619_v35 = vld [vmem:[%s2469_s25 + $0xb30] sm:$0xff] }
  0xf1   : > { %1179 = vmatpush.msrb.mxu0 %v338_v40  ;;  %1199 = vmatpush.msrb.mxu1 %v466_v41  ;;  %v298_v60 = vld [vmem:[%s2469_s25 + $0x128] sm:$0xff]  ;;  %v755_v36 = vld [vmem:[%s2469_s25 + $0xf70] sm:$0xff] }
  0xf2   : > { %1221 = vmatpush.msrb.mxu2 %v578_v42  ;;  %1240 = vmatpush.msrb.mxu3 %v714_v43  ;;  %v426_v62 = vld [vmem:[%s2469_s25 + $0x528] sm:$0xff]  ;;  %v371_v37 = vld [vmem:[%s2469_s25 + $0x370] sm:$0xff] }
  0xf3   : > { %1180 = vmatpush.msrb.mxu0 %v330_v44  ;;  %1200 = vmatpush.msrb.mxu1 %v458_v45  ;;  %v538_v63 = vld [vmem:[%s2469_s25 + $0x8a8] sm:$0xff]  ;;  %v499_v38 = vld [vmem:[%s2469_s25 + $0x770] sm:$0xff] }
  0xf4   : > { %1222 = vmatpush.msrb.mxu2 %v570_v46  ;;  %1241 = vmatpush.msrb.mxu3 %v706_v47  ;;  %v674_v0 = vld [vmem:[%s2469_s25 + $0xce8] sm:$0xff]  ;;  %v611_v39 = vld [vmem:[%s2469_s25 + $0xaf0] sm:$0xff] }
  0xf5   : > { %1181 = vmatpush.msrb.mxu0 %v322_v48  ;;  %1201 = vmatpush.msrb.mxu1 %v450_v49  ;;  %v290_v2 = vld [vmem:[%s2469_s25 + $0xe8] sm:$0xff]  ;;  %v747_v40 = vld [vmem:[%s2469_s25 + $0xf30] sm:$0xff] }
  0xf6   : > { %1223 = vmatpush.msrb.mxu2 %v562_v50  ;;  %1242 = vmatpush.msrb.mxu3 %v698_v51  ;;  %v418_v3 = vld [vmem:[%s2469_s25 + $0x4e8] sm:$0xff]  ;;  %v363_v41 = vld [vmem:[%s2469_s25 + $0x330] sm:$0xff] }
  0xf7   : > { %1182 = vmatpush.msrb.mxu0 %v314_v52  ;;  %1202 = vmatpush.msrb.mxu1 %v442_v53  ;;  %v530_v4 = vld [vmem:[%s2469_s25 + $0x868] sm:$0xff]  ;;  %v491_v42 = vld [vmem:[%s2469_s25 + $0x730] sm:$0xff] }
  0xf8   : > { %1224 = vmatpush.msrb.mxu2 %v554_v54  ;;  %1243 = vmatpush.msrb.mxu3 %v690_v55  ;;  %v666_v8 = vld [vmem:[%s2469_s25 + $0xca8] sm:$0xff]  ;;  %v603_v43 = vld [vmem:[%s2469_s25 + $0xab0] sm:$0xff] }
  0xf9   : > { %1183 = vmatpush.msrb.mxu0 %v306_v56  ;;  %1203 = vmatpush.msrb.mxu1 %v434_v57  ;;  %v282_v9 = vld [vmem:[%s2469_s25 + $0xa8] sm:$0xff]  ;;  %v739_v44 = vld [vmem:[%s2469_s25 + $0xef0] sm:$0xff] }
  0xfa   : > { %1225 = vmatpush.msrb.mxu2 %v546_v58  ;;  %1244 = vmatpush.msrb.mxu3 %v682_v59  ;;  %v410_v11 = vld [vmem:[%s2469_s25 + $0x4a8] sm:$0xff]  ;;  %v355_v45 = vld [vmem:[%s2469_s25 + $0x2f0] sm:$0xff] }
  0xfb   : > { %1184 = vmatpush.msrb.mxu0 %v298_v60  ;;  %v790_v5 = vpop.f32.mrf.mxu0  ;;  %1204 = vmatpush.msrb.mxu1 %v426_v62  ;;  %v810_v10 = vpop.f32.mrf.mxu1  ;;  %v522_v12 = vld [vmem:[%s2469_s25 + $0x828] sm:$0xff]  ;;  %v483_v46 = vld [vmem:[%s2469_s25 + $0x6f0] sm:$0xff] }
  0xfc   : > { %1226 = vmatpush.msrb.mxu2 %v538_v63  ;;  %1245 = vmatpush.msrb.mxu3 %v674_v0  ;;  %v811_v13 = vadd.f32 %v810_v10, %v790_v5  ;;  %v658_v15 = vld [vmem:[%s2469_s25 + $0xc68] sm:$0xff]  ;;  %v595_v47 = vld [vmem:[%s2469_s25 + $0xa70] sm:$0xff] }
  0xfd   : > { %1185 = vmatpush.msrb.mxu0 %v290_v2  ;;  %1205 = vmatpush.msrb.mxu1 %v418_v3  ;;  %v274_v17 = vld [vmem:[%s2469_s25 + $0x68] sm:$0xff]  ;;  %v731_v48 = vld [vmem:[%s2469_s25 + $0xeb0] sm:$0xff] }
  0xfe   : > { %1227 = vmatpush.msrb.mxu2 %v530_v4  ;;  %1246 = vmatpush.msrb.mxu3 %v666_v8  ;;  %v831_v18 = vadd.f32 %v830_v14, %v811_v13  ;;  %v850_v19 = vpop.f32.mrf.mxu3  ;;  %v402_v20 = vld [vmem:[%s2469_s25 + $0x468] sm:$0xff]  ;;  %v347_v49 = vld [vmem:[%s2469_s25 + $0x2b0] sm:$0xff] }
  0xff   : > { %1186 = vmatpush.msrb.mxu0 %v282_v9  ;;  %1206 = vmatpush.msrb.mxu1 %v410_v11  ;;  %v650_v61 = vld [vmem:[%s2469_s25 + $0xc28] sm:$0xff]  ;;  %v475_v50 = vld [vmem:[%s2469_s25 + $0x6b0] sm:$0xff] }
 0x100   : > { %1228 = vmatpush.msrb.mxu2 %v522_v12  ;;  %1247 = vmatpush.msrb.mxu3 %v658_v15  ;;  %v851_v1 = vadd.f32 %v850_v19, %v831_v18  ;;  %v266_v25 = vld [vmem:[%s2469_s25 + $0x28] sm:$0xff]  ;;  %v587_v51 = vld [vmem:[%s2469_s25 + $0xa30] sm:$0xff] }
 0x101   : > { %1149 = vmatmul.f32.vlgmr.msra.gmra.mxu2 %v2889_v22  ;;  %1187 = vmatpush.msrb.mxu0 %v274_v17  ;;  %v394_v26 = vld [vmem:[%s2469_s25 + $0x428] sm:$0xff]  ;;  %v723_v52 = vld [vmem:[%s2469_s25 + $0xe70] sm:$0xff] }
 0x102   : > { %1293 = vmatpush.msra.mxu2 %v643_v16  ;;  %1207 = vmatpush.msrb.mxu1 %v402_v20  ;;  %v1413_v6 = vadd.f32 %v851_v1, %v249_v21  ;;  %v2910_v33 = vld [vmem:[%s2474_s29 + $0x8] sm:$0xff]  ;;  %v339_v53 = vld [vmem:[%s2469_s25 + $0x270] sm:$0xff] }
 0x103   : > { %1248 = vmatpush.msrb.mxu3 %v650_v61  ;;  %1188 = vmatpush.msrb.mxu0 %v266_v25  ;;  %v467_v54 = vld [vmem:[%s2469_s25 + $0x670] sm:$0xff] }
 0x104   : > { %1169 = vmatmul.f32.vlgmr.msra.gmra.mxu3 %v2897_v27  ;;  %1294 = vmatpush.msra.mxu2 %v635_v23  ;;  %1421 = vst [vmem:[#allocation2 + $0x30] sm:$0xff] %v1413_v6  ;;  %v579_v55 = vld [vmem:[%s2469_s25 + $0x9f0] sm:$0xff] }
 0x105   : > { %1313 = vmatpush.msra.mxu3 %v771_v24  ;;  %1208 = vmatpush.msrb.mxu1 %v394_v26  ;;  %v715_v56 = vld [vmem:[%s2469_s25 + $0xe30] sm:$0xff] }
 0x106   : > { %1109 = vmatmul.f32.vlgmr.msra.gmra.mxu0 %v2904_v30  ;;  %1129 = vmatmul.f32.vlgmr.msra.gmra.mxu1 %v2910_v33  ;;  %v331_v57 = vld [vmem:[%s2469_s25 + $0x230] sm:$0xff] }
 0x107   : > { %1253 = vmatpush.msra.mxu0 %v387_v7  ;;  %1273 = vmatpush.msra.mxu1 %v515_v28  ;;  %v459_v58 = vld [vmem:[%s2469_s25 + $0x630] sm:$0xff]  ;;  %v644_v7 = vld [vmem:[%s2469_s25 + $0xbf8] sm:$0xff] }
 0x108   : > { %1295 = vmatpush.msra.mxu2 %v627_v29  ;;  %1314 = vmatpush.msra.mxu3 %v763_v31  ;;  %v571_v59 = vld [vmem:[%s2469_s25 + $0x9b0] sm:$0xff] }
 0x109   : > { %1254 = vmatpush.msra.mxu0 %v379_v32  ;;  %1274 = vmatpush.msra.mxu1 %v507_v34  ;;  %v707_v60 = vld [vmem:[%s2469_s25 + $0xdf0] sm:$0xff] }
 0x10a   : > { %1296 = vmatpush.msra.mxu2 %v619_v35  ;;  %1315 = vmatpush.msra.mxu3 %v755_v36  ;;  %v323_v62 = vld [vmem:[%s2469_s25 + $0x1f0] sm:$0xff]  ;;  %v250_v35 = vld [vmem:[#allocation2] sm:$0xff]  ;;  %v636_v36 = vld [vmem:[%s2469_s25 + $0xbb8] sm:$0xff] }
 0x10b   : > { %1255 = vmatpush.msra.mxu0 %v371_v37  ;;  %1275 = vmatpush.msra.mxu1 %v499_v38  ;;  %v451_v63 = vld [vmem:[%s2469_s25 + $0x5f0] sm:$0xff]  ;;  %v772_v38 = vld [vmem:[%s2469_s25 + $0xff8] sm:$0xff] }
 0x10c   : > { %1297 = vmatpush.msra.mxu2 %v611_v39  ;;  %1316 = vmatpush.msra.mxu3 %v747_v40  ;;  %v563_v0 = vld [vmem:[%s2469_s25 + $0x970] sm:$0xff] }
 0x10d   : > { %1256 = vmatpush.msra.mxu0 %v363_v41  ;;  %1276 = vmatpush.msra.mxu1 %v491_v42  ;;  %v699_v2 = vld [vmem:[%s2469_s25 + $0xdb0] sm:$0xff]  ;;  %v388_v42 = vld [vmem:[%s2469_s25 + $0x3f8] sm:$0xff] }
 0x10e   : > { %1298 = vmatpush.msra.mxu2 %v603_v43  ;;  %1317 = vmatpush.msra.mxu3 %v739_v44  ;;  %v315_v3 = vld [vmem:[%s2469_s25 + $0x1b0] sm:$0xff]  ;;  %v516_v43 = vld [vmem:[%s2469_s25 + $0x7f8] sm:$0xff] }
 0x10f   : > { %1257 = vmatpush.msra.mxu0 %v355_v45  ;;  %1277 = vmatpush.msra.mxu1 %v483_v46  ;;  %v443_v4 = vld [vmem:[%s2469_s25 + $0x5b0] sm:$0xff]  ;;  %v628_v44 = vld [vmem:[%s2469_s25 + $0xb78] sm:$0xff] }
 0x110   : > { %1299 = vmatpush.msra.mxu2 %v595_v47  ;;  %1318 = vmatpush.msra.mxu3 %v731_v48  ;;  %v555_v5 = vld [vmem:[%s2469_s25 + $0x930] sm:$0xff]  ;;  %v764_v45 = vld [vmem:[%s2469_s25 + $0xfb8] sm:$0xff] }
 0x111   : > { %1258 = vmatpush.msra.mxu0 %v347_v49  ;;  %1278 = vmatpush.msra.mxu1 %v475_v50  ;;  %v691_v8 = vld [vmem:[%s2469_s25 + $0xd70] sm:$0xff]  ;;  %v380_v46 = vld [vmem:[%s2469_s25 + $0x3b8] sm:$0xff] }
 0x112   : > { %1300 = vmatpush.msra.mxu2 %v587_v51  ;;  %1319 = vmatpush.msra.mxu3 %v723_v52  ;;  %v307_v9 = vld [vmem:[%s2469_s25 + $0x170] sm:$0xff]  ;;  %v508_v47 = vld [vmem:[%s2469_s25 + $0x7b8] sm:$0xff] }
 0x113   : > { %1259 = vmatpush.msra.mxu0 %v339_v53  ;;  %1279 = vmatpush.msra.mxu1 %v467_v54  ;;  %v435_v10 = vld [vmem:[%s2469_s25 + $0x570] sm:$0xff]  ;;  %v620_v48 = vld [vmem:[%s2469_s25 + $0xb38] sm:$0xff] }
 0x114   : > { %1301 = vmatpush.msra.mxu2 %v579_v55  ;;  %1320 = vmatpush.msra.mxu3 %v715_v56  ;;  %v547_v11 = vld [vmem:[%s2469_s25 + $0x8f0] sm:$0xff]  ;;  %v756_v49 = vld [vmem:[%s2469_s25 + $0xf78] sm:$0xff] }
 0x115   : > { %1260 = vmatpush.msra.mxu0 %v331_v57  ;;  %1280 = vmatpush.msra.mxu1 %v459_v58  ;;  %v683_v12 = vld [vmem:[%s2469_s25 + $0xd30] sm:$0xff]  ;;  %v372_v50 = vld [vmem:[%s2469_s25 + $0x378] sm:$0xff] }
 0x116   : > { %1302 = vmatpush.msra.mxu2 %v571_v59  ;;  %1321 = vmatpush.msra.mxu3 %v707_v60  ;;  %v299_v13 = vld [vmem:[%s2469_s25 + $0x130] sm:$0xff]  ;;  %v500_v51 = vld [vmem:[%s2469_s25 + $0x778] sm:$0xff] }
 0x117   : > { %1261 = vmatpush.msra.mxu0 %v323_v62  ;;  %1281 = vmatpush.msra.mxu1 %v451_v63  ;;  %v427_v14 = vld [vmem:[%s2469_s25 + $0x530] sm:$0xff]  ;;  %v612_v52 = vld [vmem:[%s2469_s25 + $0xaf8] sm:$0xff] }
 0x118   : > { %1303 = vmatpush.msra.mxu2 %v563_v0  ;;  %1322 = vmatpush.msra.mxu3 %v699_v2  ;;  %v539_v15 = vld [vmem:[%s2469_s25 + $0x8b0] sm:$0xff]  ;;  %v748_v53 = vld [vmem:[%s2469_s25 + $0xf38] sm:$0xff] }
 0x119   : > { %1262 = vmatpush.msra.mxu0 %v315_v3  ;;  %1282 = vmatpush.msra.mxu1 %v443_v4  ;;  %v675_v16 = vld [vmem:[%s2469_s25 + $0xcf0] sm:$0xff]  ;;  %v364_v54 = vld [vmem:[%s2469_s25 + $0x338] sm:$0xff] }
 0x11a   : > { %1304 = vmatpush.msra.mxu2 %v555_v5  ;;  %1323 = vmatpush.msra.mxu3 %v691_v8  ;;  %v291_v17 = vld [vmem:[%s2469_s25 + $0xf0] sm:$0xff]  ;;  %v492_v55 = vld [vmem:[%s2469_s25 + $0x738] sm:$0xff] }
 0x11b   : > { %1263 = vmatpush.msra.mxu0 %v307_v9  ;;  %1283 = vmatpush.msra.mxu1 %v435_v10  ;;  %v419_v18 = vld [vmem:[%s2469_s25 + $0x4f0] sm:$0xff]  ;;  %v604_v56 = vld [vmem:[%s2469_s25 + $0xab8] sm:$0xff] }
 0x11c   : > { %1305 = vmatpush.msra.mxu2 %v547_v11  ;;  %1324 = vmatpush.msra.mxu3 %v683_v12  ;;  %v531_v19 = vld [vmem:[%s2469_s25 + $0x870] sm:$0xff]  ;;  %v740_v57 = vld [vmem:[%s2469_s25 + $0xef8] sm:$0xff] }
 0x11d   : > { %1264 = vmatpush.msra.mxu0 %v299_v13  ;;  %v870_v20 = vpop.f32.mrf.mxu0  ;;  %1284 = vmatpush.msra.mxu1 %v427_v14  ;;  %v667_v61 = vld [vmem:[%s2469_s25 + $0xcb0] sm:$0xff]  ;;  %v890_v23 = vpop.f32.mrf.mxu1  ;;  %v356_v58 = vld [vmem:[%s2469_s25 + $0x2f8] sm:$0xff] }
 0x11e   : > { %1306 = vmatpush.msra.mxu2 %v539_v15  ;;  %v283_v21 = vld [vmem:[%s2469_s25 + $0xb0] sm:$0xff]  ;;  %v910_v1 = vpop.f32.mrf.mxu2  ;;  %1325 = vmatpush.msra.mxu3 %v675_v16  ;;  %v891_v26 = vadd.f32 %v890_v23, %v870_v20  ;;  %v484_v59 = vld [vmem:[%s2469_s25 + $0x6f8] sm:$0xff] }
 0x11f   : > { %1265 = vmatpush.msra.mxu0 %v291_v17  ;;  %v411_v24 = vld [vmem:[%s2469_s25 + $0x4b0] sm:$0xff]  ;;  %1285 = vmatpush.msra.mxu1 %v419_v18  ;;  %v596_v60 = vld [vmem:[%s2469_s25 + $0xa78] sm:$0xff] }
 0x120   : > { %v523_v25 = vld [vmem:[%s2469_s25 + $0x830] sm:$0xff]  ;;  %1307 = vmatpush.msra.mxu2 %v531_v19  ;;  %1326 = vmatpush.msra.mxu3 %v667_v61  ;;  %v911_v29 = vadd.f32 %v910_v1, %v891_v26  ;;  %v732_v62 = vld [vmem:[%s2469_s25 + $0xeb8] sm:$0xff] }
 0x121   : > { %v659_v6 = vld [vmem:[%s2469_s25 + $0xc70] sm:$0xff]  ;;  %1266 = vmatpush.msra.mxu0 %v283_v21  ;;  %v930_v31 = vpop.f32.mrf.mxu3  ;;  %1286 = vmatpush.msra.mxu1 %v411_v24  ;;  %v348_v63 = vld [vmem:[%s2469_s25 + $0x2b8] sm:$0xff] }
 0x122   : > { %v275_v28 = vld [vmem:[%s2469_s25 + $0x70] sm:$0xff]  ;;  %1308 = vmatpush.msra.mxu2 %v523_v25  ;;  %1327 = vmatpush.msra.mxu3 %v659_v6  ;;  %v931_v37 = vadd.f32 %v930_v31, %v911_v29  ;;  %v476_v0 = vld [vmem:[%s2469_s25 + $0x6b8] sm:$0xff] }
 0x123   : > { %v403_v32 = vld [vmem:[%s2469_s25 + $0x470] sm:$0xff]  ;;  %1229 = vmatmul.f32.vlgmr.msrb.gmra.mxu2 %v2889_v22  ;;  %1267 = vmatpush.msra.mxu0 %v275_v28  ;;  %v588_v2 = vld [vmem:[%s2469_s25 + $0xa38] sm:$0xff] }
 0x124   : > { %v651_v34 = vld [vmem:[%s2469_s25 + $0xc30] sm:$0xff]  ;;  %1373 = vmatpush.msrb.mxu2 %v644_v7  ;;  %1287 = vmatpush.msra.mxu1 %v403_v32  ;;  %v1414_v41 = vadd.f32 %v931_v37, %v250_v35  ;;  %v724_v3 = vld [vmem:[%s2469_s25 + $0xe78] sm:$0xff] }
 0x125   : > { %v267_v39 = vld [vmem:[%s2469_s25 + $0x30] sm:$0xff]  ;;  %1328 = vmatpush.msra.mxu3 %v651_v34  ;;  %1189 = vmatmul.f32.vlgmr.msrb.gmra.mxu0 %v2904_v30  ;;  %v340_v4 = vld [vmem:[%s2469_s25 + $0x278] sm:$0xff] }
 0x126   : > { %v395_v40 = vld [vmem:[%s2469_s25 + $0x430] sm:$0xff]  ;;  %1249 = vmatmul.f32.vlgmr.msrb.gmra.mxu3 %v2897_v27  ;;  %1374 = vmatpush.msrb.mxu2 %v636_v36  ;;  %1422 = vst [vmem:[#allocation2] sm:$0xff] %v1414_v41  ;;  %v468_v5 = vld [vmem:[%s2469_s25 + $0x678] sm:$0xff] }
 0x127   : > { %1393 = vmatpush.msrb.mxu3 %v772_v38  ;;  %1268 = vmatpush.msra.mxu0 %v267_v39  ;;  %v580_v8 = vld [vmem:[%s2469_s25 + $0x9f8] sm:$0xff] }
 0x128   : > { %1288 = vmatpush.msra.mxu1 %v395_v40  ;;  %1375 = vmatpush.msrb.mxu2 %v628_v44  ;;  %v716_v9 = vld [vmem:[%s2469_s25 + $0xe38] sm:$0xff]  ;;  %v251_v44 = vld [vmem:[#allocation2 + $0x18] sm:$0xff] }
 0x129   : > { %1209 = vmatmul.f32.vlgmr.msrb.gmra.mxu1 %v2910_v33  ;;  %1333 = vmatpush.msrb.mxu0 %v388_v42  ;;  %v332_v10 = vld [vmem:[%s2469_s25 + $0x238] sm:$0xff] }
 0x12a   : > { %1353 = vmatpush.msrb.mxu1 %v516_v43  ;;  %1394 = vmatpush.msrb.mxu3 %v764_v45  ;;  %v460_v11 = vld [vmem:[%s2469_s25 + $0x638] sm:$0xff] }
 0x12b   : > { %1334 = vmatpush.msrb.mxu0 %v380_v46  ;;  %1376 = vmatpush.msrb.mxu2 %v620_v48  ;;  %v572_v12 = vld [vmem:[%s2469_s25 + $0x9b8] sm:$0xff] }
 0x12c   : > { %1354 = vmatpush.msrb.mxu1 %v508_v47  ;;  %1395 = vmatpush.msrb.mxu3 %v756_v49  ;;  %v708_v13 = vld [vmem:[%s2469_s25 + $0xdf8] sm:$0xff] }
 0x12d   : > { %1335 = vmatpush.msrb.mxu0 %v372_v50  ;;  %1377 = vmatpush.msrb.mxu2 %v612_v52  ;;  %v324_v14 = vld [vmem:[%s2469_s25 + $0x1f8] sm:$0xff] }
 0x12e   : > { %1355 = vmatpush.msrb.mxu1 %v500_v51  ;;  %1396 = vmatpush.msrb.mxu3 %v748_v53  ;;  %v452_v15 = vld [vmem:[%s2469_s25 + $0x5f8] sm:$0xff] }
 0x12f   : > { %1336 = vmatpush.msrb.mxu0 %v364_v54  ;;  %1378 = vmatpush.msrb.mxu2 %v604_v56  ;;  %v564_v16 = vld [vmem:[%s2469_s25 + $0x978] sm:$0xff] }
 0x130   : > { %1356 = vmatpush.msrb.mxu1 %v492_v55  ;;  %1397 = vmatpush.msrb.mxu3 %v740_v57  ;;  %v700_v17 = vld [vmem:[%s2469_s25 + $0xdb8] sm:$0xff] }
 0x131   : > { %1337 = vmatpush.msrb.mxu0 %v356_v58  ;;  %1379 = vmatpush.msrb.mxu2 %v596_v60  ;;  %v316_v18 = vld [vmem:[%s2469_s25 + $0x1b8] sm:$0xff] }
 0x132   : > { %1357 = vmatpush.msrb.mxu1 %v484_v59  ;;  %1398 = vmatpush.msrb.mxu3 %v732_v62  ;;  %v444_v19 = vld [vmem:[%s2469_s25 + $0x5b8] sm:$0xff] }
 0x133   : > { %1338 = vmatpush.msrb.mxu0 %v348_v63  ;;  %1380 = vmatpush.msrb.mxu2 %v588_v2  ;;  %v556_v20 = vld [vmem:[%s2469_s25 + $0x938] sm:$0xff] }
 0x134   : > { %1358 = vmatpush.msrb.mxu1 %v476_v0  ;;  %1399 = vmatpush.msrb.mxu3 %v724_v3  ;;  %v692_v61 = vld [vmem:[%s2469_s25 + $0xd78] sm:$0xff]  ;;  %v253_v3 = vld [vmem:[#allocation2 + $0x8] sm:$0xff] }
 0x135   : > { %1339 = vmatpush.msrb.mxu0 %v340_v4  ;;  %1381 = vmatpush.msrb.mxu2 %v580_v8  ;;  %v308_v21 = vld [vmem:[%s2469_s25 + $0x178] sm:$0xff] }
 0x136   : > { %1359 = vmatpush.msrb.mxu1 %v468_v5  ;;  %1400 = vmatpush.msrb.mxu3 %v716_v9  ;;  %v436_v23 = vld [vmem:[%s2469_s25 + $0x578] sm:$0xff] }
 0x137   : > { %1340 = vmatpush.msrb.mxu0 %v332_v10  ;;  %1382 = vmatpush.msrb.mxu2 %v572_v12  ;;  %v548_v1 = vld [vmem:[%s2469_s25 + $0x8f8] sm:$0xff]  ;;  %v254_v12 = vld [vmem:[#allocation2 + $0x20] sm:$0xff] }
 0x138   : > { %1360 = vmatpush.msrb.mxu1 %v460_v11  ;;  %1401 = vmatpush.msrb.mxu3 %v708_v13  ;;  %v684_v24 = vld [vmem:[%s2469_s25 + $0xd38] sm:$0xff] }
 0x139   : > { %1341 = vmatpush.msrb.mxu0 %v324_v14  ;;  %1383 = vmatpush.msrb.mxu2 %v564_v16  ;;  %v300_v25 = vld [vmem:[%s2469_s25 + $0x138] sm:$0xff] }
 0x13a   : > { %1361 = vmatpush.msrb.mxu1 %v452_v15  ;;  %1402 = vmatpush.msrb.mxu3 %v700_v17  ;;  %v428_v26 = vld [vmem:[%s2469_s25 + $0x538] sm:$0xff] }
 0x13b   : > { %1342 = vmatpush.msrb.mxu0 %v316_v18  ;;  %1384 = vmatpush.msrb.mxu2 %v556_v20  ;;  %v540_v6 = vld [vmem:[%s2469_s25 + $0x8b8] sm:$0xff] }
 0x13c   : > { %1362 = vmatpush.msrb.mxu1 %v444_v19  ;;  %1403 = vmatpush.msrb.mxu3 %v692_v61  ;;  %v676_v7 = vld [vmem:[%s2469_s25 + $0xcf8] sm:$0xff]  ;;  %v255_v61 = vld [vmem:[#allocation2 + $0x28] sm:$0xff] }
 0x13d   : > { %1309 = vmatmul.f32.vlgmr.msra.gmra.mxu2 %v2889_v22  ;;  %1343 = vmatpush.msrb.mxu0 %v308_v21  ;;  %v292_v29 = vld [vmem:[%s2469_s25 + $0xf8] sm:$0xff] }
 0x13e   : > { %1363 = vmatpush.msrb.mxu1 %v436_v23  ;;  %1385 = vmatpush.msrb.mxu2 %v548_v1  ;;  %v420_v34 = vld [vmem:[%s2469_s25 + $0x4f8] sm:$0xff] }
 0x13f   : > { %1404 = vmatpush.msrb.mxu3 %v684_v24  ;;  %v950_v28 = vpop.f32.mrf.mxu0  ;;  %1344 = vmatpush.msrb.mxu0 %v300_v25  ;;  %v970_v31 = vpop.f32.mrf.mxu1  ;;  %v532_v35 = vld [vmem:[%s2469_s25 + $0x878] sm:$0xff] }
 0x140   : > { %1329 = vmatmul.f32.vlgmr.msra.gmra.mxu3 %v2897_v27  ;;  %v990_v32 = vpop.f32.mrf.mxu2  ;;  %1364 = vmatpush.msrb.mxu1 %v428_v26  ;;  %v971_v36 = vadd.f32 %v970_v31, %v950_v28  ;;  %v668_v37 = vld [vmem:[%s2469_s25 + $0xcb8] sm:$0xff] }
 0x141   : > { %1386 = vmatpush.msrb.mxu2 %v540_v6  ;;  %1405 = vmatpush.msrb.mxu3 %v676_v7  ;;  %v284_v38 = vld [vmem:[%s2469_s25 + $0xb8] sm:$0xff]  ;;  %v256_v7 = vld [vmem:[#allocation2 + $0x38] sm:$0xff] }
 0x142   : > { %1269 = vmatmul.f32.vlgmr.msra.gmra.mxu0 %v2904_v30  ;;  %1289 = vmatmul.f32.vlgmr.msra.gmra.mxu1 %v2910_v33  ;;  %v412_v39 = vld [vmem:[%s2469_s25 + $0x4b8] sm:$0xff]  ;;  %v991_v41 = vadd.f32 %v990_v32, %v971_v36 }
 0x143   : > { %1345 = vmatpush.msrb.mxu0 %v292_v29  ;;  %v524_v40 = vld [vmem:[%s2469_s25 + $0x838] sm:$0xff]  ;;  %v1010_v42 = vpop.f32.mrf.mxu3  ;;  %1365 = vmatpush.msrb.mxu1 %v420_v34 }
 0x144   : > { %1387 = vmatpush.msrb.mxu2 %v532_v35  ;;  %v660_v43 = vld [vmem:[%s2469_s25 + $0xc78] sm:$0xff]  ;;  %1406 = vmatpush.msrb.mxu3 %v668_v37  ;;  %v1011_v47 = vadd.f32 %v1010_v42, %v991_v41 }
 0x145   : > { %1346 = vmatpush.msrb.mxu0 %v284_v38  ;;  %v276_v45 = vld [vmem:[%s2469_s25 + $0x78] sm:$0xff]  ;;  %1366 = vmatpush.msrb.mxu1 %v412_v39 }
 0x146   : > { %v404_v46 = vld [vmem:[%s2469_s25 + $0x478] sm:$0xff]  ;;  %1388 = vmatpush.msrb.mxu2 %v524_v40  ;;  %1407 = vmatpush.msrb.mxu3 %v660_v43  ;;  %v1415_v50 = vadd.f32 %v1011_v47, %v251_v44 }
 0x147   : > { %v652_v48 = vld [vmem:[%s2469_s25 + $0xc38] sm:$0xff]  ;;  %1389 = vmatmul.f32.vlgmr.msrb.gmra.mxu2 %v2889_v22  ;;  %1347 = vmatpush.msrb.mxu0 %v276_v45 }
 0x148   : > { %v268_v49 = vld [vmem:[%s2469_s25 + $0x38] sm:$0xff]  ;;  %1367 = vmatpush.msrb.mxu1 %v404_v46  ;;  %1408 = vmatpush.msrb.mxu3 %v652_v48  ;;  %1423 = vst [vmem:[#allocation2 + $0x18] sm:$0xff] %v1415_v50 }
 0x149   : > { %v396_v51 = vld [vmem:[%s2469_s25 + $0x438] sm:$0xff]  ;;  %1409 = vmatmul.f32.vlgmr.msrb.gmra.mxu3 %v2897_v27  ;;  %1348 = vmatpush.msrb.mxu0 %v268_v49 }
 0x14a   : > { %1368 = vmatpush.msrb.mxu1 %v396_v51  ;;  %1349 = vmatmul.f32.vlgmr.msrb.gmra.mxu0 %v2904_v30  ;;  %v252_v57 = vld [vmem:[#allocation2 + $0x10] sm:$0xff] }
 0x14b   : > { %1369 = vmatmul.f32.vlgmr.msrb.gmra.mxu1 %v2910_v33 }
 0x161   : > { %v1030_v52 = vpop.f32.mrf.mxu0  ;;  %v1050_v53 = vpop.f32.mrf.mxu1 }
 0x162   : > { %v1070_v54 = vpop.f32.mrf.mxu2  ;;  %v1051_v55 = vadd.f32 %v1050_v53, %v1030_v52 }
 0x164   : > { %v1071_v22 = vadd.f32 %v1070_v54, %v1051_v55 }
 0x165   : > { %v1090_v56 = vpop.f32.mrf.mxu3 }
 0x166   : > { %v1091_v58 = vadd.f32 %v1090_v56, %v1071_v22 }
 0x168   : > { %v1416_v59 = vadd.f32 %v1091_v58, %v252_v57 }
 0x16a   : > { %1424 = vst [vmem:[#allocation2 + $0x10] sm:$0xff] %v1416_v59 }
 0x183   : > { %v1110_v60 = vpop.f32.mrf.mxu0  ;;  %v1130_v62 = vpop.f32.mrf.mxu1 }
 0x184   : > { %v1150_v63 = vpop.f32.mrf.mxu2  ;;  %v1131_v27 = vadd.f32 %v1130_v62, %v1110_v60 }
 0x186   : > { %v1151_v0 = vadd.f32 %v1150_v63, %v1131_v27 }
 0x187   : > { %v1170_v2 = vpop.f32.mrf.mxu3 }
 0x188   : > { %v1171_v30 = vadd.f32 %v1170_v2, %v1151_v0 }
 0x18a   : > { %v1417_v4 = vadd.f32 %v1171_v30, %v253_v3 }
 0x18c   : > { %1425 = vst [vmem:[#allocation2 + $0x8] sm:$0xff] %v1417_v4 }
 0x1a2   : > { %v1190_v33 = vpop.f32.mrf.mxu0 }
 0x1a6   : > { %v1210_v5 = vpop.f32.mrf.mxu1  ;;  %v1230_v8 = vpop.f32.mrf.mxu2 }
 0x1a7   : > { %v1211_v9 = vadd.f32 %v1210_v5, %v1190_v33 }
 0x1a9   : > { %v1231_v10 = vadd.f32 %v1230_v8, %v1211_v9  ;;  %v1250_v11 = vpop.f32.mrf.mxu3 }
 0x1ab   : > { %v1251_v13 = vadd.f32 %v1250_v11, %v1231_v10 }
 0x1ad   : > { %v1418_v14 = vadd.f32 %v1251_v13, %v254_v12 }
 0x1af   : > { %1426 = vst [vmem:[#allocation2 + $0x20] sm:$0xff] %v1418_v14 }
 0x1bf   : > { %v1270_v15 = vpop.f32.mrf.mxu0  ;;  %v1290_v16 = vpop.f32.mrf.mxu1 }
 0x1c0   : > { %v1310_v17 = vpop.f32.mrf.mxu2  ;;  %v1291_v18 = vadd.f32 %v1290_v16, %v1270_v15 }
 0x1c2   : > { %v1311_v19 = vadd.f32 %v1310_v17, %v1291_v18 }
 0x1c3   : > { %v1330_v20 = vpop.f32.mrf.mxu3 }
 0x1c4   : > { %v1331_v21 = vadd.f32 %v1330_v20, %v1311_v19 }
 0x1c6   : > { %v1419_v23 = vadd.f32 %v1331_v21, %v255_v61 }
 0x1c7   : > { %v1350_v1 = vpop.f32.mrf.mxu0 }
 0x1c8   : > { %1427 = vst [vmem:[#allocation2 + $0x28] sm:$0xff] %v1419_v23  ;;  %v1370_v24 = vpop.f32.mrf.mxu1 }
 0x1c9   : > { %v1371_v25 = vadd.f32 %v1370_v24, %v1350_v1 }
 0x1ca   : > { %v1390_v26 = vpop.f32.mrf.mxu2 }
 0x1cb   : > { %v1391_v6 = vadd.f32 %v1390_v26, %v1371_v25 }
 0x1cc   : > { %v1410_v28 = vpop.f32.mrf.mxu3 }
 0x1cd   : > { %v1411_v29 = vadd.f32 %v1410_v28, %v1391_v6  ;;  %1432 = sbr.rel (%p2393_p6) target bundleno = 892 (0x37c), region = 48 }
 0x1cf   : > { %v1420_v31 = vadd.f32 %v1411_v29, %v256_v7 }
 0x1d1   : > { %1428 = vst [vmem:[#allocation2 + $0x38] sm:$0xff] %v1420_v31 }
 0x1d2   : > { %v1441_v32 = vld [vmem:[%s4252_s2] sm:$0xff]  ;;  %v1500_v34 = vld [vmem:[%s4253_s3 + $0x168] sm:$0xff]  ;;  %v2423_v36 = vmov 0   ;;  %v1497_v39 = vld [vmem:[%s4253_s3 + $0x150] sm:$0xff] }
 0x1d3   : > { %v1548_v35 = vld [vmem:[%s4253_s3 + $0x2e8] sm:$0xff]  ;;  %2411 = vset.pattern.permute.xlu0 %v2423_v36  ;;  %1839 = vmatpush.msra.mxu0 %v1500_v34  ;;  %v1545_v40 = vld [vmem:[%s4253_s3 + $0x2d0] sm:$0xff]  ;;  %v1494_v43 = vld [vmem:[%s4253_s3 + $0x138] sm:$0xff] }
 0x1d4   : > { %v1596_v37 = vld [vmem:[%s4253_s3 + $0x468] sm:$0xff]  ;;  %1444 = vperm.xlu0 %2411, %v1441_v32   ;;  %1859 = vmatpush.msra.mxu1 %v1548_v35  ;;  %v1593_v41 = vld [vmem:[%s4253_s3 + $0x450] sm:$0xff]  ;;  %v1542_v44 = vld [vmem:[%s4253_s3 + $0x2b8] sm:$0xff] }
 0x1d5   : > { %v1644_v38 = vld [vmem:[%s4253_s3 + $0x5e8] sm:$0xff]  ;;  %v1641_v42 = vld [vmem:[%s4253_s3 + $0x5d0] sm:$0xff]  ;;  %1879 = vmatpush.msra.mxu2 %v1596_v37  ;;  %1840 = vmatpush.msra.mxu0 %v1497_v39  ;;  %v1590_v45 = vld [vmem:[%s4253_s3 + $0x438] sm:$0xff] }
 0x1d6   : > { %1899 = vmatpush.msra.mxu3 %v1644_v38  ;;  %1860 = vmatpush.msra.mxu1 %v1545_v40  ;;  %v1638_v46 = vld [vmem:[%s4253_s3 + $0x5b8] sm:$0xff]  ;;  %v1491_v47 = vld [vmem:[%s4253_s3 + $0x120] sm:$0xff]  ;;  %v1488_v51 = vld [vmem:[%s4253_s3 + $0x108] sm:$0xff] }
 0x1d7   : > { %1880 = vmatpush.msra.mxu2 %v1593_v41  ;;  %v1539_v48 = vld [vmem:[%s4253_s3 + $0x2a0] sm:$0xff]  ;;  %1841 = vmatpush.msra.mxu0 %v1494_v43  ;;  %v1536_v52 = vld [vmem:[%s4253_s3 + $0x288] sm:$0xff]  ;;  %v1485_v55 = vld [vmem:[%s4253_s3 + $0xf0] sm:$0xff] }
 0x1d8   : > { %1900 = vmatpush.msra.mxu3 %v1641_v42  ;;  %1861 = vmatpush.msra.mxu1 %v1542_v44  ;;  %v1587_v49 = vld [vmem:[%s4253_s3 + $0x420] sm:$0xff]  ;;  %v1584_v53 = vld [vmem:[%s4253_s3 + $0x408] sm:$0xff]  ;;  %v1533_v22 = vld [vmem:[%s4253_s3 + $0x270] sm:$0xff] }
 0x1d9   : > { %v1635_v50 = vld [vmem:[%s4253_s3 + $0x5a0] sm:$0xff]  ;;  %1881 = vmatpush.msra.mxu2 %v1590_v45  ;;  %1842 = vmatpush.msra.mxu0 %v1491_v47  ;;  %v1632_v54 = vld [vmem:[%s4253_s3 + $0x588] sm:$0xff]  ;;  %v1581_v56 = vld [vmem:[%s4253_s3 + $0x3f0] sm:$0xff] }
 0x1da   : > { %1901 = vmatpush.msra.mxu3 %v1638_v46  ;;  %1862 = vmatpush.msra.mxu1 %v1539_v48  ;;  %v1629_v57 = vld [vmem:[%s4253_s3 + $0x570] sm:$0xff]  ;;  %v1482_v58 = vld [vmem:[%s4253_s3 + $0xd8] sm:$0xff]  ;;  %v1479_v63 = vld [vmem:[%s4253_s3 + $0xc0] sm:$0xff] }
 0x1db   : > { %1882 = vmatpush.msra.mxu2 %v1587_v49  ;;  %1843 = vmatpush.msra.mxu0 %v1488_v51  ;;  %v1530_v59 = vld [vmem:[%s4253_s3 + $0x258] sm:$0xff]  ;;  %v1527_v27 = vld [vmem:[%s4253_s3 + $0x240] sm:$0xff]  ;;  %v1476_v3 = vld [vmem:[%s4253_s3 + $0xa8] sm:$0xff] }
 0x1dc   : > { %1902 = vmatpush.msra.mxu3 %v1635_v50  ;;  %1863 = vmatpush.msra.mxu1 %v1536_v52  ;;  %v1578_v60 = vld [vmem:[%s4253_s3 + $0x3d8] sm:$0xff]  ;;  %v1575_v0 = vld [vmem:[%s4253_s3 + $0x3c0] sm:$0xff]  ;;  %v1524_v30 = vld [vmem:[%s4253_s3 + $0x228] sm:$0xff] }
 0x1dd   : > { %1883 = vmatpush.msra.mxu2 %v1584_v53  ;;  %1844 = vmatpush.msra.mxu0 %v1485_v55  ;;  %v1626_v62 = vld [vmem:[%s4253_s3 + $0x558] sm:$0xff]  ;;  %v1623_v2 = vld [vmem:[%s4253_s3 + $0x540] sm:$0xff]  ;;  %v1572_v4 = vld [vmem:[%s4253_s3 + $0x3a8] sm:$0xff] }
 0x1de   : > { %1903 = vmatpush.msra.mxu3 %v1632_v54  ;;  %1864 = vmatpush.msra.mxu1 %v1533_v22  ;;  %v1620_v33 = vld [vmem:[%s4253_s3 + $0x528] sm:$0xff]  ;;  %v1473_v5 = vld [vmem:[%s4253_s3 + $0x90] sm:$0xff]  ;;  %v1470_v11 = vld [vmem:[%s4253_s3 + $0x78] sm:$0xff] }
 0x1df   : > { %1884 = vmatpush.msra.mxu2 %v1581_v56  ;;  %1845 = vmatpush.msra.mxu0 %v1482_v58  ;;  %v1521_v8 = vld [vmem:[%s4253_s3 + $0x210] sm:$0xff]  ;;  %v1518_v12 = vld [vmem:[%s4253_s3 + $0x1f8] sm:$0xff]  ;;  %v1467_v15 = vld [vmem:[%s4253_s3 + $0x60] sm:$0xff] }
 0x1e0   : > { %1904 = vmatpush.msra.mxu3 %v1629_v57  ;;  %1865 = vmatpush.msra.mxu1 %v1530_v59  ;;  %v1569_v9 = vld [vmem:[%s4253_s3 + $0x390] sm:$0xff]  ;;  %v1566_v13 = vld [vmem:[%s4253_s3 + $0x378] sm:$0xff]  ;;  %v1515_v16 = vld [vmem:[%s4253_s3 + $0x1e0] sm:$0xff] }
 0x1e1   : > { %1885 = vmatpush.msra.mxu2 %v1578_v60  ;;  %1846 = vmatpush.msra.mxu0 %v1479_v63  ;;  %v1617_v10 = vld [vmem:[%s4253_s3 + $0x510] sm:$0xff]  ;;  %v1614_v14 = vld [vmem:[%s4253_s3 + $0x4f8] sm:$0xff]  ;;  %v1563_v17 = vld [vmem:[%s4253_s3 + $0x360] sm:$0xff] }
 0x1e2   : > { %1905 = vmatpush.msra.mxu3 %v1626_v62  ;;  %1866 = vmatpush.msra.mxu1 %v1527_v27  ;;  %v1611_v18 = vld [vmem:[%s4253_s3 + $0x4e0] sm:$0xff]  ;;  %v1464_v19 = vld [vmem:[%s4253_s3 + $0x48] sm:$0xff]  ;;  %v1461_v23 = vld [vmem:[%s4253_s3 + $0x30] sm:$0xff] }
 0x1e3   : > { %1886 = vmatpush.msra.mxu2 %v1575_v0  ;;  %1847 = vmatpush.msra.mxu0 %v1476_v3  ;;  %v1512_v20 = vld [vmem:[%s4253_s3 + $0x1c8] sm:$0xff]  ;;  %v1509_v1 = vld [vmem:[%s4253_s3 + $0x1b0] sm:$0xff]  ;;  %v1458_v26 = vld [vmem:[%s4253_s3 + $0x18] sm:$0xff] }
 0x1e4   : > { %1906 = vmatpush.msra.mxu3 %v1623_v2  ;;  %1867 = vmatpush.msra.mxu1 %v1524_v30  ;;  %v1560_v61 = vld [vmem:[%s4253_s3 + $0x348] sm:$0xff]  ;;  %v1557_v24 = vld [vmem:[%s4253_s3 + $0x330] sm:$0xff]  ;;  %v1506_v6 = vld [vmem:[%s4253_s3 + $0x198] sm:$0xff] }
 0x1e5   : > { %1887 = vmatpush.msra.mxu2 %v1572_v4  ;;  %1848 = vmatpush.msra.mxu0 %v1473_v5  ;;  %v1608_v21 = vld [vmem:[%s4253_s3 + $0x4c8] sm:$0xff]  ;;  %v1605_v25 = vld [vmem:[%s4253_s3 + $0x4b0] sm:$0xff]  ;;  %v1554_v7 = vld [vmem:[%s4253_s3 + $0x318] sm:$0xff] }
 0x1e6   : > { %1907 = vmatpush.msra.mxu3 %v1620_v33  ;;  %1868 = vmatpush.msra.mxu1 %v1521_v8  ;;  %v1602_v28 = vld [vmem:[%s4253_s3 + $0x498] sm:$0xff]  ;;  %v1455_v29 = vld [vmem:[%s4253_s3] sm:$0xff]  ;;  %v1692_v35 = vld [vmem:[%s4253_s3 + $0x768] sm:$0xff] }
 0x1e7   : > { %1888 = vmatpush.msra.mxu2 %v1569_v9  ;;  %1849 = vmatpush.msra.mxu0 %v1470_v11  ;;  %v1503_v31 = vld [vmem:[%s4253_s3 + $0x180] sm:$0xff]  ;;  %v1740_v36 = vld [vmem:[%s4253_s3 + $0x8e8] sm:$0xff]  ;;  %v1689_v39 = vld [vmem:[%s4253_s3 + $0x750] sm:$0xff] }
 0x1e8   : > { %1908 = vmatpush.msra.mxu3 %v1617_v10  ;;  %1869 = vmatpush.msra.mxu1 %v1518_v12  ;;  %v1551_v32 = vld [vmem:[%s4253_s3 + $0x300] sm:$0xff]  ;;  %v1788_v37 = vld [vmem:[%s4253_s3 + $0xa68] sm:$0xff]  ;;  %v1737_v40 = vld [vmem:[%s4253_s3 + $0x8d0] sm:$0xff] }
 0x1e9   : > { %1889 = vmatpush.msra.mxu2 %v1566_v13  ;;  %1850 = vmatpush.msra.mxu0 %v1467_v15  ;;  %v1599_v34 = vld [vmem:[%s4253_s3 + $0x480] sm:$0xff]  ;;  %v1836_v38 = vld [vmem:[%s4253_s3 + $0xbe8] sm:$0xff]  ;;  %v1785_v41 = vld [vmem:[%s4253_s3 + $0xa50] sm:$0xff] }
 0x1ea   : > { %1909 = vmatpush.msra.mxu3 %v1614_v14  ;;  %1870 = vmatpush.msra.mxu1 %v1515_v16  ;;  %v1833_v42 = vld [vmem:[%s4253_s3 + $0xbd0] sm:$0xff]  ;;  %v1686_v43 = vld [vmem:[%s4253_s3 + $0x738] sm:$0xff]  ;;  %v1683_v47 = vld [vmem:[%s4253_s3 + $0x720] sm:$0xff] }
 0x1eb   : > { %1890 = vmatpush.msra.mxu2 %v1563_v17  ;;  %1851 = vmatpush.msra.mxu0 %v1464_v19  ;;  %v1734_v44 = vld [vmem:[%s4253_s3 + $0x8b8] sm:$0xff]  ;;  %v1731_v48 = vld [vmem:[%s4253_s3 + $0x8a0] sm:$0xff]  ;;  %v1680_v51 = vld [vmem:[%s4253_s3 + $0x708] sm:$0xff] }
 0x1ec   : > { %1910 = vmatpush.msra.mxu3 %v1611_v18  ;;  %1871 = vmatpush.msra.mxu1 %v1512_v20  ;;  %v1782_v45 = vld [vmem:[%s4253_s3 + $0xa38] sm:$0xff]  ;;  %v1779_v49 = vld [vmem:[%s4253_s3 + $0xa20] sm:$0xff]  ;;  %v1728_v52 = vld [vmem:[%s4253_s3 + $0x888] sm:$0xff] }
 0x1ed   : > { %1891 = vmatpush.msra.mxu2 %v1560_v61  ;;  %1852 = vmatpush.msra.mxu0 %v1461_v23  ;;  %v1830_v46 = vld [vmem:[%s4253_s3 + $0xbb8] sm:$0xff]  ;;  %v1827_v50 = vld [vmem:[%s4253_s3 + $0xba0] sm:$0xff]  ;;  %v1776_v53 = vld [vmem:[%s4253_s3 + $0xa08] sm:$0xff] }
 0x1ee   : > { %1911 = vmatpush.msra.mxu3 %v1608_v21  ;;  %1872 = vmatpush.msra.mxu1 %v1509_v1  ;;  %v1824_v54 = vld [vmem:[%s4253_s3 + $0xb88] sm:$0xff]  ;;  %v1677_v55 = vld [vmem:[%s4253_s3 + $0x6f0] sm:$0xff]  ;;  %v1674_v58 = vld [vmem:[%s4253_s3 + $0x6d8] sm:$0xff] }
 0x1ef   : > { %1892 = vmatpush.msra.mxu2 %v1557_v24  ;;  %1853 = vmatpush.msra.mxu0 %v1458_v26  ;;  %v1725_v22 = vld [vmem:[%s4253_s3 + $0x870] sm:$0xff]  ;;  %v1722_v59 = vld [vmem:[%s4253_s3 + $0x858] sm:$0xff]  ;;  %v1671_v63 = vld [vmem:[%s4253_s3 + $0x6c0] sm:$0xff] }
 0x1f0   : > { %1912 = vmatpush.msra.mxu3 %v1605_v25  ;;  %1873 = vmatpush.msra.mxu1 %v1506_v6  ;;  %v1773_v56 = vld [vmem:[%s4253_s3 + $0x9f0] sm:$0xff]  ;;  %v1770_v60 = vld [vmem:[%s4253_s3 + $0x9d8] sm:$0xff]  ;;  %v1719_v27 = vld [vmem:[%s4253_s3 + $0x840] sm:$0xff] }
 0x1f1   : > { %1893 = vmatpush.msra.mxu2 %v1554_v7  ;;  %1854 = vmatpush.msra.mxu0 %v1455_v29  ;;  %v1821_v57 = vld [vmem:[%s4253_s3 + $0xb70] sm:$0xff]  ;;  %v1818_v62 = vld [vmem:[%s4253_s3 + $0xb58] sm:$0xff]  ;;  %v1767_v0 = vld [vmem:[%s4253_s3 + $0x9c0] sm:$0xff] }
 0x1f2   : > { %1913 = vmatpush.msra.mxu3 %v1602_v28  ;;  %1874 = vmatpush.msra.mxu1 %v1503_v31  ;;  %v1815_v2 = vld [vmem:[%s4253_s3 + $0xb40] sm:$0xff]  ;;  %v1668_v3 = vld [vmem:[%s4253_s3 + $0x6a8] sm:$0xff]  ;;  %v1665_v5 = vld [vmem:[%s4253_s3 + $0x690] sm:$0xff] }
 0x1f3   : > { %1894 = vmatpush.msra.mxu2 %v1551_v32  ;;  %1919 = vmatpush.msrb.mxu0 %v1692_v35  ;;  %v1716_v30 = vld [vmem:[%s4253_s3 + $0x828] sm:$0xff]  ;;  %v1713_v8 = vld [vmem:[%s4253_s3 + $0x810] sm:$0xff]  ;;  %v1662_v11 = vld [vmem:[%s4253_s3 + $0x678] sm:$0xff] }
 0x1f4   : > { %1914 = vmatpush.msra.mxu3 %v1599_v34  ;;  %1939 = vmatpush.msrb.mxu1 %v1740_v36  ;;  %v1764_v4 = vld [vmem:[%s4253_s3 + $0x9a8] sm:$0xff]  ;;  %v1761_v9 = vld [vmem:[%s4253_s3 + $0x990] sm:$0xff]  ;;  %v1710_v12 = vld [vmem:[%s4253_s3 + $0x7f8] sm:$0xff] }
 0x1f5   : > { %1959 = vmatpush.msrb.mxu2 %v1788_v37  ;;  %1920 = vmatpush.msrb.mxu0 %v1689_v39  ;;  %v1812_v33 = vld [vmem:[%s4253_s3 + $0xb28] sm:$0xff]  ;;  %v1809_v10 = vld [vmem:[%s4253_s3 + $0xb10] sm:$0xff]  ;;  %v1758_v13 = vld [vmem:[%s4253_s3 + $0x978] sm:$0xff] }
 0x1f6   : > { %1979 = vmatpush.msrb.mxu3 %v1836_v38  ;;  %1940 = vmatpush.msrb.mxu1 %v1737_v40  ;;  %v1806_v14 = vld [vmem:[%s4253_s3 + $0xaf8] sm:$0xff]  ;;  %v1659_v15 = vld [vmem:[%s4253_s3 + $0x660] sm:$0xff]  ;;  %v1656_v19 = vld [vmem:[%s4253_s3 + $0x648] sm:$0xff] }
 0x1f7   : > { %1960 = vmatpush.msrb.mxu2 %v1785_v41  ;;  %1921 = vmatpush.msrb.mxu0 %v1686_v43  ;;  %v1707_v16 = vld [vmem:[%s4253_s3 + $0x7e0] sm:$0xff]  ;;  %v1704_v20 = vld [vmem:[%s4253_s3 + $0x7c8] sm:$0xff]  ;;  %v1653_v23 = vld [vmem:[%s4253_s3 + $0x630] sm:$0xff] }
 0x1f8   : > { %1980 = vmatpush.msrb.mxu3 %v1833_v42  ;;  %1941 = vmatpush.msrb.mxu1 %v1734_v44  ;;  %v1755_v17 = vld [vmem:[%s4253_s3 + $0x960] sm:$0xff]  ;;  %v1752_v61 = vld [vmem:[%s4253_s3 + $0x948] sm:$0xff]  ;;  %v1701_v1 = vld [vmem:[%s4253_s3 + $0x7b0] sm:$0xff] }
 0x1f9   : > { %1961 = vmatpush.msrb.mxu2 %v1782_v45  ;;  %1922 = vmatpush.msrb.mxu0 %v1683_v47  ;;  %v1803_v18 = vld [vmem:[%s4253_s3 + $0xae0] sm:$0xff]  ;;  %v1800_v21 = vld [vmem:[%s4253_s3 + $0xac8] sm:$0xff]  ;;  %v1749_v24 = vld [vmem:[%s4253_s3 + $0x930] sm:$0xff] }
 0x1fa   : > { %1981 = vmatpush.msrb.mxu3 %v1830_v46  ;;  %1942 = vmatpush.msrb.mxu1 %v1731_v48  ;;  %v1797_v25 = vld [vmem:[%s4253_s3 + $0xab0] sm:$0xff]  ;;  %v1650_v26 = vld [vmem:[%s4253_s3 + $0x618] sm:$0xff]  ;;  %v1647_v29 = vld [vmem:[%s4253_s3 + $0x600] sm:$0xff] }
 0x1fb   : > { %1962 = vmatpush.msrb.mxu2 %v1779_v49  ;;  %1923 = vmatpush.msrb.mxu0 %v1680_v51  ;;  %v1698_v6 = vld [vmem:[%s4253_s3 + $0x798] sm:$0xff]  ;;  %v1695_v31 = vld [vmem:[%s4253_s3 + $0x780] sm:$0xff]  ;;  %v1434_v36 = vld [vmem:[#allocation2] sm:$0xff] }
 0x1fc   : > { %1982 = vmatpush.msrb.mxu3 %v1827_v50  ;;  %1943 = vmatpush.msrb.mxu1 %v1728_v52  ;;  %v1746_v7 = vld [vmem:[%s4253_s3 + $0x918] sm:$0xff]  ;;  %v1743_v32 = vld [vmem:[%s4253_s3 + $0x900] sm:$0xff]  ;;  %v1501_v44 = vld [vmem:[%s4253_s3 + $0x170] sm:$0xff] }
 0x1fd   : > { %1963 = vmatpush.msrb.mxu2 %v1776_v53  ;;  %1924 = vmatpush.msrb.mxu0 %v1677_v55  ;;  %v1794_v28 = vld [vmem:[%s4253_s3 + $0xa98] sm:$0xff]  ;;  %v1791_v34 = vld [vmem:[%s4253_s3 + $0xa80] sm:$0xff]  ;;  %v1549_v45 = vld [vmem:[%s4253_s3 + $0x2f0] sm:$0xff] }
 0x1fe   : > { %1983 = vmatpush.msrb.mxu3 %v1824_v54  ;;  %1944 = vmatpush.msrb.mxu1 %v1725_v22  ;;  %v1433_v35 = vld [vmem:[#allocation2 + $0x30] sm:$0xff]  ;;  %v1435_v37 = vld [vmem:[#allocation2 + $0x18] sm:$0xff]  ;;  %v1597_v46 = vld [vmem:[%s4253_s3 + $0x470] sm:$0xff] }
 0x1ff   : > { %1964 = vmatpush.msrb.mxu2 %v1773_v56  ;;  %1925 = vmatpush.msrb.mxu0 %v1674_v58  ;;  %v1436_v38 = vld [vmem:[#allocation2 + $0x10] sm:$0xff]  ;;  %v1645_v47 = vld [vmem:[%s4253_s3 + $0x5f0] sm:$0xff]  ;;  %v1495_v52 = vld [vmem:[%s4253_s3 + $0x140] sm:$0xff] }
 0x200   : > { %1984 = vmatpush.msrb.mxu3 %v1821_v57  ;;  %1945 = vmatpush.msrb.mxu1 %v1722_v59  ;;  %v1498_v48 = vld [vmem:[%s4253_s3 + $0x158] sm:$0xff]  ;;  %v1543_v53 = vld [vmem:[%s4253_s3 + $0x2c0] sm:$0xff]  ;;  %v1437_v54 = vld [vmem:[#allocation2 + $0x8] sm:$0xff] }
 0x201   : > { %1965 = vmatpush.msrb.mxu2 %v1770_v60  ;;  %1926 = vmatpush.msrb.mxu0 %v1671_v63  ;;  %v1546_v49 = vld [vmem:[%s4253_s3 + $0x2d8] sm:$0xff]  ;;  %v1591_v55 = vld [vmem:[%s4253_s3 + $0x440] sm:$0xff]  ;;  %v1438_v56 = vld [vmem:[#allocation2 + $0x20] sm:$0xff] }
 0x202   : > { %1985 = vmatpush.msrb.mxu3 %v1818_v62  ;;  %1946 = vmatpush.msrb.mxu1 %v1719_v27  ;;  %v1594_v50 = vld [vmem:[%s4253_s3 + $0x458] sm:$0xff]  ;;  %v1639_v22 = vld [vmem:[%s4253_s3 + $0x5c0] sm:$0xff]  ;;  %v1492_v57 = vld [vmem:[%s4253_s3 + $0x128] sm:$0xff] }
 0x203   : > { %1966 = vmatpush.msrb.mxu2 %v1767_v0  ;;  %1927 = vmatpush.msrb.mxu0 %v1668_v3  ;;  %v1642_v51 = vld [vmem:[%s4253_s3 + $0x5d8] sm:$0xff]  ;;  %v1540_v58 = vld [vmem:[%s4253_s3 + $0x2a8] sm:$0xff]  ;;  %v1439_v59 = vld [vmem:[#allocation2 + $0x28] sm:$0xff] }
 0x204   : > { %1986 = vmatpush.msrb.mxu3 %v1815_v2  ;;  %1947 = vmatpush.msrb.mxu1 %v1716_v30  ;;  %v1588_v60 = vld [vmem:[%s4253_s3 + $0x428] sm:$0xff]  ;;  %v1440_v63 = vld [vmem:[#allocation2 + $0x38] sm:$0xff]  ;;  %v1489_v30 = vld [vmem:[%s4253_s3 + $0x110] sm:$0xff] }
 0x205   : > { %1967 = vmatpush.msrb.mxu2 %v1764_v4  ;;  %1928 = vmatpush.msrb.mxu0 %v1665_v5  ;;  %v1636_v62 = vld [vmem:[%s4253_s3 + $0x5a8] sm:$0xff]  ;;  %v1537_v4 = vld [vmem:[%s4253_s3 + $0x290] sm:$0xff] }
 0x206   : > { %1987 = vmatpush.msrb.mxu3 %v1812_v33  ;;  %1948 = vmatpush.msrb.mxu1 %v1713_v8  ;;  %v1585_v33 = vld [vmem:[%s4253_s3 + $0x410] sm:$0xff]  ;;  %v1486_v8 = vld [vmem:[%s4253_s3 + $0xf8] sm:$0xff] }
 0x207   : > { %1968 = vmatpush.msrb.mxu2 %v1761_v9  ;;  %1929 = vmatpush.msrb.mxu0 %v1662_v11  ;;  %v1633_v5 = vld [vmem:[%s4253_s3 + $0x590] sm:$0xff]  ;;  %v1534_v9 = vld [vmem:[%s4253_s3 + $0x278] sm:$0xff] }
 0x208   : > { %1988 = vmatpush.msrb.mxu3 %v1809_v10  ;;  %1949 = vmatpush.msrb.mxu1 %v1710_v12  ;;  %v1582_v10 = vld [vmem:[%s4253_s3 + $0x3f8] sm:$0xff]  ;;  %v1483_v12 = vld [vmem:[%s4253_s3 + $0xe0] sm:$0xff] }
 0x209   : > { %1969 = vmatpush.msrb.mxu2 %v1758_v13  ;;  %1930 = vmatpush.msrb.mxu0 %v1659_v15  ;;  %v1630_v11 = vld [vmem:[%s4253_s3 + $0x578] sm:$0xff]  ;;  %v1531_v13 = vld [vmem:[%s4253_s3 + $0x260] sm:$0xff] }
 0x20a   : > { %1989 = vmatpush.msrb.mxu3 %v1806_v14  ;;  %1950 = vmatpush.msrb.mxu1 %v1707_v16  ;;  %v1579_v14 = vld [vmem:[%s4253_s3 + $0x3e0] sm:$0xff]  ;;  %v1480_v16 = vld [vmem:[%s4253_s3 + $0xc8] sm:$0xff] }
 0x20b   : > { %1970 = vmatpush.msrb.mxu2 %v1755_v17  ;;  %1931 = vmatpush.msrb.mxu0 %v1656_v19  ;;  %v1627_v15 = vld [vmem:[%s4253_s3 + $0x560] sm:$0xff]  ;;  %v1528_v17 = vld [vmem:[%s4253_s3 + $0x248] sm:$0xff] }
 0x20c   : > { %1990 = vmatpush.msrb.mxu3 %v1803_v18  ;;  %1951 = vmatpush.msrb.mxu1 %v1704_v20  ;;  %v1576_v18 = vld [vmem:[%s4253_s3 + $0x3c8] sm:$0xff]  ;;  %v1477_v20 = vld [vmem:[%s4253_s3 + $0xb0] sm:$0xff] }
 0x20d   : > { %1971 = vmatpush.msrb.mxu2 %v1752_v61  ;;  %1932 = vmatpush.msrb.mxu0 %v1653_v23  ;;  %v1624_v19 = vld [vmem:[%s4253_s3 + $0x548] sm:$0xff]  ;;  %v1525_v61 = vld [vmem:[%s4253_s3 + $0x230] sm:$0xff] }
 0x20e   : > { %1991 = vmatpush.msrb.mxu3 %v1800_v21  ;;  %1952 = vmatpush.msrb.mxu1 %v1701_v1  ;;  %v1573_v21 = vld [vmem:[%s4253_s3 + $0x3b0] sm:$0xff]  ;;  %v1474_v1 = vld [vmem:[%s4253_s3 + $0x98] sm:$0xff] }
 0x20f   : > { %1972 = vmatpush.msrb.mxu2 %v1749_v24  ;;  %1933 = vmatpush.msrb.mxu0 %v1650_v26  ;;  %v1621_v23 = vld [vmem:[%s4253_s3 + $0x530] sm:$0xff]  ;;  %v1522_v24 = vld [vmem:[%s4253_s3 + $0x218] sm:$0xff] }
 0x210   : > { %1992 = vmatpush.msrb.mxu3 %v1797_v25  ;;  %1953 = vmatpush.msrb.mxu1 %v1698_v6  ;;  %v1570_v25 = vld [vmem:[%s4253_s3 + $0x398] sm:$0xff]  ;;  %v1471_v6 = vld [vmem:[%s4253_s3 + $0x80] sm:$0xff] }
 0x211   : > { %1973 = vmatpush.msrb.mxu2 %v1746_v7  ;;  %1934 = vmatpush.msrb.mxu0 %v1647_v29  ;;  %v1618_v26 = vld [vmem:[%s4253_s3 + $0x518] sm:$0xff]  ;;  %v1519_v7 = vld [vmem:[%s4253_s3 + $0x200] sm:$0xff] }
 0x212   : > { %1993 = vmatpush.msrb.mxu3 %v1794_v28  ;;  %1954 = vmatpush.msrb.mxu1 %v1695_v31  ;;  %v1567_v28 = vld [vmem:[%s4253_s3 + $0x380] sm:$0xff]  ;;  %v1468_v31 = vld [vmem:[%s4253_s3 + $0x68] sm:$0xff] }
 0x213   : > { %1974 = vmatpush.msrb.mxu2 %v1743_v32  ;;  %v1615_v29 = vld [vmem:[%s4253_s3 + $0x500] sm:$0xff]  ;;  %v1516_v32 = vld [vmem:[%s4253_s3 + $0x1e8] sm:$0xff] }
 0x214   : > { %1994 = vmatpush.msrb.mxu3 %v1791_v34  ;;  %v1564_v34 = vld [vmem:[%s4253_s3 + $0x368] sm:$0xff] }
 0x246   : > { %v1445_v39 = vpop.permute.xlu0 %1444 }
 0x247   : > { %v3433_v40 = vadd.f32 %v1445_v39, %v1433_v35  ;;  %v3435_v41 = vadd.f32 %v1445_v39, %v1434_v36  ;;  %v3437_v42 = vadd.f32 %v1445_v39, %v1435_v37  ;;  %v3439_v43 = vadd.f32 %v1445_v39, %v1436_v38  ;;  %v1612_v35 = vld [vmem:[%s4253_s3 + $0x4e8] sm:$0xff]  ;;  %v1465_v36 = vld [vmem:[%s4253_s3 + $0x50] sm:$0xff] }
 0x248   : > { %v3493_v27 = vadd.f32 %v1445_v39, %v1437_v54  ;;  %v3495_v0 = vadd.f32 %v1445_v39, %v1438_v56  ;;  %v3497_v2 = vadd.f32 %v1445_v39, %v1439_v59  ;;  %v3499_v3 = vadd.f32 %v1445_v39, %v1440_v63  ;;  %v1513_v37 = vld [vmem:[%s4253_s3 + $0x1d0] sm:$0xff]  ;;  %v1552_v54 = vld [vmem:[%s4253_s3 + $0x308] sm:$0xff]  ;;  %v1690_v59 = vld [vmem:[%s4253_s3 + $0x758] sm:$0xff] }
 0x249   : > { %1855 = vmatmul.f32.vlgmr.msra.gmra.mxu0 %v3433_v40  ;;  %1875 = vmatmul.f32.vlgmr.msra.gmra.mxu1 %v3435_v41  ;;  %v1561_v38 = vld [vmem:[%s4253_s3 + $0x350] sm:$0xff]  ;;  %v1834_v63 = vld [vmem:[%s4253_s3 + $0xbd8] sm:$0xff] }
 0x24a   : > { %1895 = vmatmul.f32.vlgmr.msra.gmra.mxu2 %v3437_v42  ;;  %1915 = vmatmul.f32.vlgmr.msra.gmra.mxu3 %v3439_v43  ;;  %v1609_v39 = vld [vmem:[%s4253_s3 + $0x4d0] sm:$0xff] }
 0x24b   : > { %1999 = vmatpush.msra.mxu0 %v1501_v44  ;;  %2019 = vmatpush.msra.mxu1 %v1549_v45  ;;  %v1462_v44 = vld [vmem:[%s4253_s3 + $0x38] sm:$0xff]  ;;  %v1741_v56 = vld [vmem:[%s4253_s3 + $0x8f0] sm:$0xff] }
 0x24c   : > { %2039 = vmatpush.msra.mxu2 %v1597_v46  ;;  %2059 = vmatpush.msra.mxu3 %v1645_v47  ;;  %v1510_v45 = vld [vmem:[%s4253_s3 + $0x1b8] sm:$0xff] }
 0x24d   : > { %2000 = vmatpush.msra.mxu0 %v1498_v48  ;;  %2020 = vmatpush.msra.mxu1 %v1546_v49  ;;  %v1558_v46 = vld [vmem:[%s4253_s3 + $0x338] sm:$0xff]  ;;  %v1459_v48 = vld [vmem:[%s4253_s3 + $0x20] sm:$0xff] }
 0x24e   : > { %2040 = vmatpush.msra.mxu2 %v1594_v50  ;;  %2060 = vmatpush.msra.mxu3 %v1642_v51  ;;  %v1606_v47 = vld [vmem:[%s4253_s3 + $0x4b8] sm:$0xff]  ;;  %v1507_v49 = vld [vmem:[%s4253_s3 + $0x1a0] sm:$0xff] }
 0x24f   : > { %2001 = vmatpush.msra.mxu0 %v1495_v52  ;;  %2021 = vmatpush.msra.mxu1 %v1543_v53  ;;  %v1555_v50 = vld [vmem:[%s4253_s3 + $0x320] sm:$0xff]  ;;  %v1456_v52 = vld [vmem:[%s4253_s3 + $0x8] sm:$0xff] }
 0x250   : > { %2041 = vmatpush.msra.mxu2 %v1591_v55  ;;  %2061 = vmatpush.msra.mxu3 %v1639_v22  ;;  %v1603_v51 = vld [vmem:[%s4253_s3 + $0x4a0] sm:$0xff]  ;;  %v1504_v53 = vld [vmem:[%s4253_s3 + $0x188] sm:$0xff]  ;;  %v1693_v22 = vld [vmem:[%s4253_s3 + $0x770] sm:$0xff] }
 0x251   : > { %2002 = vmatpush.msra.mxu0 %v1492_v57  ;;  %2022 = vmatpush.msra.mxu1 %v1540_v58  ;;  %v1600_v55 = vld [vmem:[%s4253_s3 + $0x488] sm:$0xff]  ;;  %v1789_v57 = vld [vmem:[%s4253_s3 + $0xa70] sm:$0xff] }
 0x252   : > { %2042 = vmatpush.msra.mxu2 %v1588_v60  ;;  %2062 = vmatpush.msra.mxu3 %v1636_v62  ;;  %v1837_v58 = vld [vmem:[%s4253_s3 + $0xbf0] sm:$0xff]  ;;  %v1738_v60 = vld [vmem:[%s4253_s3 + $0x8d8] sm:$0xff] }
 0x253   : > { %1935 = vmatmul.f32.vlgmr.msrb.gmra.mxu0 %v3493_v27  ;;  %1955 = vmatmul.f32.vlgmr.msrb.gmra.mxu1 %v3495_v0  ;;  %v1786_v62 = vld [vmem:[%s4253_s3 + $0xa58] sm:$0xff] }
 0x254   : > { %1975 = vmatmul.f32.vlgmr.msrb.gmra.mxu2 %v3497_v2  ;;  %1995 = vmatmul.f32.vlgmr.msrb.gmra.mxu3 %v3499_v3 }
 0x255   : > { %2003 = vmatpush.msra.mxu0 %v1489_v30  ;;  %2023 = vmatpush.msra.mxu1 %v1537_v4  ;;  %v1687_v30 = vld [vmem:[%s4253_s3 + $0x740] sm:$0xff] }
 0x256   : > { %2043 = vmatpush.msra.mxu2 %v1585_v33  ;;  %2063 = vmatpush.msra.mxu3 %v1633_v5  ;;  %v1735_v4 = vld [vmem:[%s4253_s3 + $0x8c0] sm:$0xff] }
 0x257   : > { %2004 = vmatpush.msra.mxu0 %v1486_v8  ;;  %2024 = vmatpush.msra.mxu1 %v1534_v9  ;;  %v1783_v33 = vld [vmem:[%s4253_s3 + $0xa40] sm:$0xff]  ;;  %v1684_v8 = vld [vmem:[%s4253_s3 + $0x728] sm:$0xff] }
 0x258   : > { %2044 = vmatpush.msra.mxu2 %v1582_v10  ;;  %2064 = vmatpush.msra.mxu3 %v1630_v11  ;;  %v1831_v5 = vld [vmem:[%s4253_s3 + $0xbc0] sm:$0xff]  ;;  %v1732_v9 = vld [vmem:[%s4253_s3 + $0x8a8] sm:$0xff] }
 0x259   : > { %2005 = vmatpush.msra.mxu0 %v1483_v12  ;;  %2025 = vmatpush.msra.mxu1 %v1531_v13  ;;  %v1780_v10 = vld [vmem:[%s4253_s3 + $0xa28] sm:$0xff]  ;;  %v1681_v12 = vld [vmem:[%s4253_s3 + $0x710] sm:$0xff] }
 0x25a   : > { %2045 = vmatpush.msra.mxu2 %v1579_v14  ;;  %2065 = vmatpush.msra.mxu3 %v1627_v15  ;;  %v1828_v11 = vld [vmem:[%s4253_s3 + $0xba8] sm:$0xff]  ;;  %v1729_v13 = vld [vmem:[%s4253_s3 + $0x890] sm:$0xff] }
 0x25b   : > { %2006 = vmatpush.msra.mxu0 %v1480_v16  ;;  %2026 = vmatpush.msra.mxu1 %v1528_v17  ;;  %v1777_v14 = vld [vmem:[%s4253_s3 + $0xa10] sm:$0xff]  ;;  %v1678_v16 = vld [vmem:[%s4253_s3 + $0x6f8] sm:$0xff] }
 0x25c   : > { %2046 = vmatpush.msra.mxu2 %v1576_v18  ;;  %2066 = vmatpush.msra.mxu3 %v1624_v19  ;;  %v1825_v15 = vld [vmem:[%s4253_s3 + $0xb90] sm:$0xff]  ;;  %v1726_v17 = vld [vmem:[%s4253_s3 + $0x878] sm:$0xff] }
 0x25d   : > { %2007 = vmatpush.msra.mxu0 %v1477_v20  ;;  %2027 = vmatpush.msra.mxu1 %v1525_v61  ;;  %v1774_v18 = vld [vmem:[%s4253_s3 + $0x9f8] sm:$0xff]  ;;  %v1675_v20 = vld [vmem:[%s4253_s3 + $0x6e0] sm:$0xff] }
 0x25e   : > { %2047 = vmatpush.msra.mxu2 %v1573_v21  ;;  %2067 = vmatpush.msra.mxu3 %v1621_v23  ;;  %v1822_v19 = vld [vmem:[%s4253_s3 + $0xb78] sm:$0xff]  ;;  %v1723_v61 = vld [vmem:[%s4253_s3 + $0x860] sm:$0xff] }
 0x25f   : > { %2008 = vmatpush.msra.mxu0 %v1474_v1  ;;  %2028 = vmatpush.msra.mxu1 %v1522_v24  ;;  %v1771_v21 = vld [vmem:[%s4253_s3 + $0x9e0] sm:$0xff]  ;;  %v1672_v1 = vld [vmem:[%s4253_s3 + $0x6c8] sm:$0xff] }
 0x260   : > { %2048 = vmatpush.msra.mxu2 %v1570_v25  ;;  %2068 = vmatpush.msra.mxu3 %v1618_v26  ;;  %v1819_v23 = vld [vmem:[%s4253_s3 + $0xb60] sm:$0xff]  ;;  %v1720_v24 = vld [vmem:[%s4253_s3 + $0x848] sm:$0xff] }
 0x261   : > { %2009 = vmatpush.msra.mxu0 %v1471_v6  ;;  %2029 = vmatpush.msra.mxu1 %v1519_v7  ;;  %v1768_v25 = vld [vmem:[%s4253_s3 + $0x9c8] sm:$0xff]  ;;  %v1669_v6 = vld [vmem:[%s4253_s3 + $0x6b0] sm:$0xff] }
 0x262   : > { %2049 = vmatpush.msra.mxu2 %v1567_v28  ;;  %2069 = vmatpush.msra.mxu3 %v1615_v29  ;;  %v1816_v26 = vld [vmem:[%s4253_s3 + $0xb48] sm:$0xff]  ;;  %v1717_v7 = vld [vmem:[%s4253_s3 + $0x830] sm:$0xff] }
 0x263   : > { %2010 = vmatpush.msra.mxu0 %v1468_v31  ;;  %2030 = vmatpush.msra.mxu1 %v1516_v32  ;;  %v1765_v28 = vld [vmem:[%s4253_s3 + $0x9b0] sm:$0xff]  ;;  %v1666_v31 = vld [vmem:[%s4253_s3 + $0x698] sm:$0xff] }
 0x264   : > { %2050 = vmatpush.msra.mxu2 %v1564_v34  ;;  %2070 = vmatpush.msra.mxu3 %v1612_v35  ;;  %v1813_v29 = vld [vmem:[%s4253_s3 + $0xb30] sm:$0xff]  ;;  %v1714_v32 = vld [vmem:[%s4253_s3 + $0x818] sm:$0xff] }
 0x265   : > { %2011 = vmatpush.msra.mxu0 %v1465_v36  ;;  %2031 = vmatpush.msra.mxu1 %v1513_v37  ;;  %v1762_v34 = vld [vmem:[%s4253_s3 + $0x998] sm:$0xff]  ;;  %v1663_v36 = vld [vmem:[%s4253_s3 + $0x680] sm:$0xff] }
 0x266   : > { %2051 = vmatpush.msra.mxu2 %v1561_v38  ;;  %2071 = vmatpush.msra.mxu3 %v1609_v39  ;;  %v1810_v35 = vld [vmem:[%s4253_s3 + $0xb18] sm:$0xff]  ;;  %v1711_v37 = vld [vmem:[%s4253_s3 + $0x800] sm:$0xff] }
 0x267   : > { %2012 = vmatpush.msra.mxu0 %v1462_v44  ;;  %2032 = vmatpush.msra.mxu1 %v1510_v45  ;;  %v1759_v38 = vld [vmem:[%s4253_s3 + $0x980] sm:$0xff]  ;;  %v1660_v44 = vld [vmem:[%s4253_s3 + $0x668] sm:$0xff] }
 0x268   : > { %2052 = vmatpush.msra.mxu2 %v1558_v46  ;;  %2072 = vmatpush.msra.mxu3 %v1606_v47  ;;  %v1807_v39 = vld [vmem:[%s4253_s3 + $0xb00] sm:$0xff]  ;;  %v1708_v45 = vld [vmem:[%s4253_s3 + $0x7e8] sm:$0xff] }
 0x269   : > { %2013 = vmatpush.msra.mxu0 %v1459_v48  ;;  %2033 = vmatpush.msra.mxu1 %v1507_v49  ;;  %v1756_v46 = vld [vmem:[%s4253_s3 + $0x968] sm:$0xff]  ;;  %v1657_v48 = vld [vmem:[%s4253_s3 + $0x650] sm:$0xff] }
 0x26a   : > { %2053 = vmatpush.msra.mxu2 %v1555_v50  ;;  %2073 = vmatpush.msra.mxu3 %v1603_v51  ;;  %v1804_v47 = vld [vmem:[%s4253_s3 + $0xae8] sm:$0xff]  ;;  %v1705_v49 = vld [vmem:[%s4253_s3 + $0x7d0] sm:$0xff] }
 0x26b   : > { %2014 = vmatpush.msra.mxu0 %v1456_v52  ;;  %2034 = vmatpush.msra.mxu1 %v1504_v53  ;;  %v1753_v50 = vld [vmem:[%s4253_s3 + $0x950] sm:$0xff]  ;;  %v1654_v52 = vld [vmem:[%s4253_s3 + $0x638] sm:$0xff] }
 0x26c   : > { %2054 = vmatpush.msra.mxu2 %v1552_v54  ;;  %2074 = vmatpush.msra.mxu3 %v1600_v55  ;;  %v1801_v51 = vld [vmem:[%s4253_s3 + $0xad0] sm:$0xff]  ;;  %v1702_v53 = vld [vmem:[%s4253_s3 + $0x7b8] sm:$0xff] }
 0x26d   : > { %2015 = vmatmul.f32.vlgmr.msra.gmra.mxu0 %v3433_v40  ;;  %2035 = vmatmul.f32.vlgmr.msra.gmra.mxu1 %v3435_v41  ;;  %v1750_v54 = vld [vmem:[%s4253_s3 + $0x938] sm:$0xff] }
 0x26e   : > { %2055 = vmatmul.f32.vlgmr.msra.gmra.mxu2 %v3437_v42  ;;  %2075 = vmatmul.f32.vlgmr.msra.gmra.mxu3 %v3439_v43  ;;  %v1798_v55 = vld [vmem:[%s4253_s3 + $0xab8] sm:$0xff] }
 0x26f   : > { %2079 = vmatpush.msrb.mxu0 %v1693_v22  ;;  %2099 = vmatpush.msrb.mxu1 %v1741_v56  ;;  %v1651_v22 = vld [vmem:[%s4253_s3 + $0x620] sm:$0xff] }
 0x270   : > { %2119 = vmatpush.msrb.mxu2 %v1789_v57  ;;  %2139 = vmatpush.msrb.mxu3 %v1837_v58  ;;  %v1699_v56 = vld [vmem:[%s4253_s3 + $0x7a0] sm:$0xff] }
 0x271   : > { %2080 = vmatpush.msrb.mxu0 %v1690_v59  ;;  %2100 = vmatpush.msrb.mxu1 %v1738_v60  ;;  %v1747_v57 = vld [vmem:[%s4253_s3 + $0x920] sm:$0xff]  ;;  %v1648_v59 = vld [vmem:[%s4253_s3 + $0x608] sm:$0xff] }
 0x272   : > { %2120 = vmatpush.msrb.mxu2 %v1786_v62  ;;  %2140 = vmatpush.msrb.mxu3 %v1834_v63  ;;  %v1795_v58 = vld [vmem:[%s4253_s3 + $0xaa0] sm:$0xff]  ;;  %v1696_v60 = vld [vmem:[%s4253_s3 + $0x788] sm:$0xff] }
 0x273   : > { %2081 = vmatpush.msrb.mxu0 %v1687_v30  ;;  %2101 = vmatpush.msrb.mxu1 %v1735_v4  ;;  %v1744_v62 = vld [vmem:[%s4253_s3 + $0x908] sm:$0xff]  ;;  %v1502_v30 = vld [vmem:[%s4253_s3 + $0x178] sm:$0xff] }
 0x274   : > { %2121 = vmatpush.msrb.mxu2 %v1783_v33  ;;  %2141 = vmatpush.msrb.mxu3 %v1831_v5  ;;  %v1792_v63 = vld [vmem:[%s4253_s3 + $0xa88] sm:$0xff]  ;;  %v1550_v4 = vld [vmem:[%s4253_s3 + $0x2f8] sm:$0xff] }
 0x275   : > { %2082 = vmatpush.msrb.mxu0 %v1684_v8  ;;  %2102 = vmatpush.msrb.mxu1 %v1732_v9  ;;  %v1598_v33 = vld [vmem:[%s4253_s3 + $0x478] sm:$0xff]  ;;  %v1499_v8 = vld [vmem:[%s4253_s3 + $0x160] sm:$0xff] }
 0x276   : > { %2122 = vmatpush.msrb.mxu2 %v1780_v10  ;;  %2142 = vmatpush.msrb.mxu3 %v1828_v11  ;;  %v1646_v5 = vld [vmem:[%s4253_s3 + $0x5f8] sm:$0xff]  ;;  %v1547_v9 = vld [vmem:[%s4253_s3 + $0x2e0] sm:$0xff] }
 0x277   : > { %2083 = vmatpush.msrb.mxu0 %v1681_v12  ;;  %2103 = vmatpush.msrb.mxu1 %v1729_v13  ;;  %v1595_v10 = vld [vmem:[%s4253_s3 + $0x460] sm:$0xff]  ;;  %v1496_v12 = vld [vmem:[%s4253_s3 + $0x148] sm:$0xff] }
 0x278   : > { %2123 = vmatpush.msrb.mxu2 %v1777_v14  ;;  %2143 = vmatpush.msrb.mxu3 %v1825_v15  ;;  %v1643_v11 = vld [vmem:[%s4253_s3 + $0x5e0] sm:$0xff]  ;;  %v1544_v13 = vld [vmem:[%s4253_s3 + $0x2c8] sm:$0xff] }
 0x279   : > { %2084 = vmatpush.msrb.mxu0 %v1678_v16  ;;  %2104 = vmatpush.msrb.mxu1 %v1726_v17  ;;  %v1592_v14 = vld [vmem:[%s4253_s3 + $0x448] sm:$0xff]  ;;  %v1493_v16 = vld [vmem:[%s4253_s3 + $0x130] sm:$0xff] }
 0x27a   : > { %2124 = vmatpush.msrb.mxu2 %v1774_v18  ;;  %2144 = vmatpush.msrb.mxu3 %v1822_v19  ;;  %v1640_v15 = vld [vmem:[%s4253_s3 + $0x5c8] sm:$0xff]  ;;  %v1541_v17 = vld [vmem:[%s4253_s3 + $0x2b0] sm:$0xff] }
 0x27b   : > { %2085 = vmatpush.msrb.mxu0 %v1675_v20  ;;  %2105 = vmatpush.msrb.mxu1 %v1723_v61  ;;  %v1589_v18 = vld [vmem:[%s4253_s3 + $0x430] sm:$0xff]  ;;  %v1490_v20 = vld [vmem:[%s4253_s3 + $0x118] sm:$0xff] }
 0x27c   : > { %2125 = vmatpush.msrb.mxu2 %v1771_v21  ;;  %2145 = vmatpush.msrb.mxu3 %v1819_v23  ;;  %v1637_v19 = vld [vmem:[%s4253_s3 + $0x5b0] sm:$0xff]  ;;  %v1538_v61 = vld [vmem:[%s4253_s3 + $0x298] sm:$0xff] }
 0x27d   : > { %2086 = vmatpush.msrb.mxu0 %v1672_v1  ;;  %2106 = vmatpush.msrb.mxu1 %v1720_v24  ;;  %v1586_v21 = vld [vmem:[%s4253_s3 + $0x418] sm:$0xff]  ;;  %v1487_v1 = vld [vmem:[%s4253_s3 + $0x100] sm:$0xff] }
 0x27e   : > { %2126 = vmatpush.msrb.mxu2 %v1768_v25  ;;  %2146 = vmatpush.msrb.mxu3 %v1816_v26  ;;  %v1634_v23 = vld [vmem:[%s4253_s3 + $0x598] sm:$0xff]  ;;  %v1535_v24 = vld [vmem:[%s4253_s3 + $0x280] sm:$0xff] }
 0x27f   : > { %2087 = vmatpush.msrb.mxu0 %v1669_v6  ;;  %2107 = vmatpush.msrb.mxu1 %v1717_v7  ;;  %v1583_v25 = vld [vmem:[%s4253_s3 + $0x400] sm:$0xff]  ;;  %v1484_v6 = vld [vmem:[%s4253_s3 + $0xe8] sm:$0xff] }
 0x280   : > { %2127 = vmatpush.msrb.mxu2 %v1765_v28  ;;  %2147 = vmatpush.msrb.mxu3 %v1813_v29  ;;  %v1631_v26 = vld [vmem:[%s4253_s3 + $0x580] sm:$0xff]  ;;  %v1532_v7 = vld [vmem:[%s4253_s3 + $0x268] sm:$0xff] }
 0x281   : > { %2088 = vmatpush.msrb.mxu0 %v1666_v31  ;;  %2108 = vmatpush.msrb.mxu1 %v1714_v32  ;;  %v1580_v28 = vld [vmem:[%s4253_s3 + $0x3e8] sm:$0xff]  ;;  %v1481_v31 = vld [vmem:[%s4253_s3 + $0xd0] sm:$0xff] }
 0x282   : > { %2128 = vmatpush.msrb.mxu2 %v1762_v34  ;;  %2148 = vmatpush.msrb.mxu3 %v1810_v35  ;;  %v1628_v29 = vld [vmem:[%s4253_s3 + $0x568] sm:$0xff]  ;;  %v1529_v32 = vld [vmem:[%s4253_s3 + $0x250] sm:$0xff] }
 0x283   : > { %2089 = vmatpush.msrb.mxu0 %v1663_v36  ;;  %2109 = vmatpush.msrb.mxu1 %v1711_v37  ;;  %v1577_v34 = vld [vmem:[%s4253_s3 + $0x3d0] sm:$0xff]  ;;  %v1478_v36 = vld [vmem:[%s4253_s3 + $0xb8] sm:$0xff] }
 0x284   : > { %2129 = vmatpush.msrb.mxu2 %v1759_v38  ;;  %2149 = vmatpush.msrb.mxu3 %v1807_v39  ;;  %v1625_v35 = vld [vmem:[%s4253_s3 + $0x550] sm:$0xff]  ;;  %v1526_v37 = vld [vmem:[%s4253_s3 + $0x238] sm:$0xff] }
 0x285   : > { %2090 = vmatpush.msrb.mxu0 %v1660_v44  ;;  %2110 = vmatpush.msrb.mxu1 %v1708_v45  ;;  %v1574_v38 = vld [vmem:[%s4253_s3 + $0x3b8] sm:$0xff]  ;;  %v1475_v44 = vld [vmem:[%s4253_s3 + $0xa0] sm:$0xff] }
 0x286   : > { %2130 = vmatpush.msrb.mxu2 %v1756_v46  ;;  %2150 = vmatpush.msrb.mxu3 %v1804_v47  ;;  %v1622_v39 = vld [vmem:[%s4253_s3 + $0x538] sm:$0xff]  ;;  %v1523_v45 = vld [vmem:[%s4253_s3 + $0x220] sm:$0xff] }
 0x287   : > { %2091 = vmatpush.msrb.mxu0 %v1657_v48  ;;  %2111 = vmatpush.msrb.mxu1 %v1705_v49  ;;  %v1571_v46 = vld [vmem:[%s4253_s3 + $0x3a0] sm:$0xff]  ;;  %v1472_v48 = vld [vmem:[%s4253_s3 + $0x88] sm:$0xff] }
 0x288   : > { %2131 = vmatpush.msrb.mxu2 %v1753_v50  ;;  %2151 = vmatpush.msrb.mxu3 %v1801_v51  ;;  %v1619_v47 = vld [vmem:[%s4253_s3 + $0x520] sm:$0xff]  ;;  %v1520_v49 = vld [vmem:[%s4253_s3 + $0x208] sm:$0xff] }
 0x289   : > { %2092 = vmatpush.msrb.mxu0 %v1654_v52  ;;  %2112 = vmatpush.msrb.mxu1 %v1702_v53  ;;  %v1568_v50 = vld [vmem:[%s4253_s3 + $0x388] sm:$0xff]  ;;  %v1469_v52 = vld [vmem:[%s4253_s3 + $0x70] sm:$0xff] }
 0x28a   : > { %2132 = vmatpush.msrb.mxu2 %v1750_v54  ;;  %2152 = vmatpush.msrb.mxu3 %v1798_v55  ;;  %v1616_v51 = vld [vmem:[%s4253_s3 + $0x508] sm:$0xff]  ;;  %v1517_v53 = vld [vmem:[%s4253_s3 + $0x1f0] sm:$0xff] }
 0x28b   : > { %2093 = vmatpush.msrb.mxu0 %v1651_v22  ;;  %2113 = vmatpush.msrb.mxu1 %v1699_v56  ;;  %v1565_v54 = vld [vmem:[%s4253_s3 + $0x370] sm:$0xff]  ;;  %v1466_v22 = vld [vmem:[%s4253_s3 + $0x58] sm:$0xff] }
 0x28c   : > { %2133 = vmatpush.msrb.mxu2 %v1747_v57  ;;  %2153 = vmatpush.msrb.mxu3 %v1795_v58  ;;  %v1613_v55 = vld [vmem:[%s4253_s3 + $0x4f0] sm:$0xff]  ;;  %v1514_v56 = vld [vmem:[%s4253_s3 + $0x1d8] sm:$0xff] }
 0x28d   : > { %2094 = vmatpush.msrb.mxu0 %v1648_v59  ;;  %2114 = vmatpush.msrb.mxu1 %v1696_v60  ;;  %v1562_v57 = vld [vmem:[%s4253_s3 + $0x358] sm:$0xff]  ;;  %v1463_v59 = vld [vmem:[%s4253_s3 + $0x40] sm:$0xff] }
 0x28e   : > { %2134 = vmatpush.msrb.mxu2 %v1744_v62  ;;  %2154 = vmatpush.msrb.mxu3 %v1792_v63  ;;  %v1610_v58 = vld [vmem:[%s4253_s3 + $0x4d8] sm:$0xff]  ;;  %v1511_v60 = vld [vmem:[%s4253_s3 + $0x1c0] sm:$0xff] }
 0x28f   : > { %2095 = vmatmul.f32.vlgmr.msrb.gmra.mxu0 %v3493_v27  ;;  %2115 = vmatmul.f32.vlgmr.msrb.gmra.mxu1 %v3495_v0  ;;  %v1559_v62 = vld [vmem:[%s4253_s3 + $0x340] sm:$0xff] }
 0x290   : > { %2135 = vmatmul.f32.vlgmr.msrb.gmra.mxu2 %v3497_v2  ;;  %2155 = vmatmul.f32.vlgmr.msrb.gmra.mxu3 %v3499_v3  ;;  %v1607_v63 = vld [vmem:[%s4253_s3 + $0x4c0] sm:$0xff] }
 0x291   : > { %2159 = vmatpush.msra.mxu0 %v1502_v30  ;;  %2179 = vmatpush.msra.mxu1 %v1550_v4  ;;  %v1460_v30 = vld [vmem:[%s4253_s3 + $0x28] sm:$0xff] }
 0x292   : > { %2199 = vmatpush.msra.mxu2 %v1598_v33  ;;  %2219 = vmatpush.msra.mxu3 %v1646_v5  ;;  %v1508_v4 = vld [vmem:[%s4253_s3 + $0x1a8] sm:$0xff] }
 0x293   : > { %2160 = vmatpush.msra.mxu0 %v1499_v8  ;;  %2180 = vmatpush.msra.mxu1 %v1547_v9  ;;  %v1556_v33 = vld [vmem:[%s4253_s3 + $0x328] sm:$0xff]  ;;  %v1457_v8 = vld [vmem:[%s4253_s3 + $0x10] sm:$0xff] }
 0x294   : > { %2200 = vmatpush.msra.mxu2 %v1595_v10  ;;  %2220 = vmatpush.msra.mxu3 %v1643_v11  ;;  %v1604_v5 = vld [vmem:[%s4253_s3 + $0x4a8] sm:$0xff]  ;;  %v1505_v9 = vld [vmem:[%s4253_s3 + $0x190] sm:$0xff] }
 0x295   : > { %2161 = vmatpush.msra.mxu0 %v1496_v12  ;;  %2181 = vmatpush.msra.mxu1 %v1544_v13  ;;  %v1553_v10 = vld [vmem:[%s4253_s3 + $0x310] sm:$0xff]  ;;  %v1694_v12 = vld [vmem:[%s4253_s3 + $0x778] sm:$0xff] }
 0x296   : > { %2201 = vmatpush.msra.mxu2 %v1592_v14  ;;  %2221 = vmatpush.msra.mxu3 %v1640_v15  ;;  %v1601_v11 = vld [vmem:[%s4253_s3 + $0x490] sm:$0xff]  ;;  %v1742_v13 = vld [vmem:[%s4253_s3 + $0x8f8] sm:$0xff] }
 0x297   : > { %2162 = vmatpush.msra.mxu0 %v1493_v16  ;;  %2182 = vmatpush.msra.mxu1 %v1541_v17  ;;  %v1790_v14 = vld [vmem:[%s4253_s3 + $0xa78] sm:$0xff]  ;;  %v1691_v16 = vld [vmem:[%s4253_s3 + $0x760] sm:$0xff]  ;;  %v1736_v17 = vld [vmem:[%s4253_s3 + $0x8c8] sm:$0xff] }
 0x298   : > { %2202 = vmatpush.msra.mxu2 %v1589_v18  ;;  %2222 = vmatpush.msra.mxu3 %v1637_v19  ;;  %v1838_v15 = vld [vmem:[%s4253_s3 + $0xbf8] sm:$0xff]  ;;  %v1784_v18 = vld [vmem:[%s4253_s3 + $0xa48] sm:$0xff] }
 0x299   : > { %2163 = vmatpush.msra.mxu0 %v1490_v20  ;;  %2183 = vmatpush.msra.mxu1 %v1538_v61  ;;  %v1832_v19 = vld [vmem:[%s4253_s3 + $0xbc8] sm:$0xff]  ;;  %v1685_v20 = vld [vmem:[%s4253_s3 + $0x730] sm:$0xff] }
 0x29a   : > { %2203 = vmatpush.msra.mxu2 %v1586_v21  ;;  %2223 = vmatpush.msra.mxu3 %v1634_v23  ;;  %v1733_v61 = vld [vmem:[%s4253_s3 + $0x8b0] sm:$0xff] }
 0x29b   : > { %2164 = vmatpush.msra.mxu0 %v1487_v1  ;;  %2184 = vmatpush.msra.mxu1 %v1535_v24  ;;  %v1781_v21 = vld [vmem:[%s4253_s3 + $0xa30] sm:$0xff]  ;;  %v1682_v1 = vld [vmem:[%s4253_s3 + $0x718] sm:$0xff] }
 0x29c   : > { %2204 = vmatpush.msra.mxu2 %v1583_v25  ;;  %2224 = vmatpush.msra.mxu3 %v1631_v26  ;;  %v1829_v23 = vld [vmem:[%s4253_s3 + $0xbb0] sm:$0xff]  ;;  %v1730_v24 = vld [vmem:[%s4253_s3 + $0x898] sm:$0xff] }
 0x29d   : > { %2165 = vmatpush.msra.mxu0 %v1484_v6  ;;  %2185 = vmatpush.msra.mxu1 %v1532_v7  ;;  %v1778_v25 = vld [vmem:[%s4253_s3 + $0xa18] sm:$0xff]  ;;  %v1679_v6 = vld [vmem:[%s4253_s3 + $0x700] sm:$0xff] }
 0x29e   : > { %2205 = vmatpush.msra.mxu2 %v1580_v28  ;;  %2225 = vmatpush.msra.mxu3 %v1628_v29  ;;  %v1826_v26 = vld [vmem:[%s4253_s3 + $0xb98] sm:$0xff]  ;;  %v1727_v7 = vld [vmem:[%s4253_s3 + $0x880] sm:$0xff] }
 0x29f   : > { %2166 = vmatpush.msra.mxu0 %v1481_v31  ;;  %2186 = vmatpush.msra.mxu1 %v1529_v32  ;;  %v1775_v28 = vld [vmem:[%s4253_s3 + $0xa00] sm:$0xff]  ;;  %v1676_v31 = vld [vmem:[%s4253_s3 + $0x6e8] sm:$0xff] }
 0x2a0   : > { %2206 = vmatpush.msra.mxu2 %v1577_v34  ;;  %2226 = vmatpush.msra.mxu3 %v1625_v35  ;;  %v1823_v29 = vld [vmem:[%s4253_s3 + $0xb80] sm:$0xff]  ;;  %v1724_v32 = vld [vmem:[%s4253_s3 + $0x868] sm:$0xff] }
 0x2a1   : > { %2167 = vmatpush.msra.mxu0 %v1478_v36  ;;  %2187 = vmatpush.msra.mxu1 %v1526_v37  ;;  %v1772_v34 = vld [vmem:[%s4253_s3 + $0x9e8] sm:$0xff]  ;;  %v1673_v36 = vld [vmem:[%s4253_s3 + $0x6d0] sm:$0xff] }
 0x2a2   : > { %2207 = vmatpush.msra.mxu2 %v1574_v38  ;;  %2227 = vmatpush.msra.mxu3 %v1622_v39  ;;  %v1820_v35 = vld [vmem:[%s4253_s3 + $0xb68] sm:$0xff]  ;;  %v1721_v37 = vld [vmem:[%s4253_s3 + $0x850] sm:$0xff] }
 0x2a3   : > { %2168 = vmatpush.msra.mxu0 %v1475_v44  ;;  %2188 = vmatpush.msra.mxu1 %v1523_v45  ;;  %v1769_v38 = vld [vmem:[%s4253_s3 + $0x9d0] sm:$0xff]  ;;  %v1670_v44 = vld [vmem:[%s4253_s3 + $0x6b8] sm:$0xff] }
 0x2a4   : > { %2208 = vmatpush.msra.mxu2 %v1571_v46  ;;  %2228 = vmatpush.msra.mxu3 %v1619_v47  ;;  %v1817_v39 = vld [vmem:[%s4253_s3 + $0xb50] sm:$0xff]  ;;  %v1718_v45 = vld [vmem:[%s4253_s3 + $0x838] sm:$0xff] }
 0x2a5   : > { %2169 = vmatpush.msra.mxu0 %v1472_v48  ;;  %2189 = vmatpush.msra.mxu1 %v1520_v49  ;;  %v1766_v46 = vld [vmem:[%s4253_s3 + $0x9b8] sm:$0xff]  ;;  %v1667_v48 = vld [vmem:[%s4253_s3 + $0x6a0] sm:$0xff] }
 0x2a6   : > { %2209 = vmatpush.msra.mxu2 %v1568_v50  ;;  %2229 = vmatpush.msra.mxu3 %v1616_v51  ;;  %v1814_v47 = vld [vmem:[%s4253_s3 + $0xb38] sm:$0xff]  ;;  %v1715_v49 = vld [vmem:[%s4253_s3 + $0x820] sm:$0xff] }
 0x2a7   : > { %2170 = vmatpush.msra.mxu0 %v1469_v52  ;;  %2190 = vmatpush.msra.mxu1 %v1517_v53  ;;  %v1763_v50 = vld [vmem:[%s4253_s3 + $0x9a0] sm:$0xff]  ;;  %v1664_v52 = vld [vmem:[%s4253_s3 + $0x688] sm:$0xff] }
 0x2a8   : > { %2210 = vmatpush.msra.mxu2 %v1565_v54  ;;  %2230 = vmatpush.msra.mxu3 %v1613_v55  ;;  %v1811_v51 = vld [vmem:[%s4253_s3 + $0xb20] sm:$0xff]  ;;  %v1712_v53 = vld [vmem:[%s4253_s3 + $0x808] sm:$0xff] }
 0x2a9   : > { %2171 = vmatpush.msra.mxu0 %v1466_v22  ;;  %2191 = vmatpush.msra.mxu1 %v1514_v56  ;;  %v1760_v54 = vld [vmem:[%s4253_s3 + $0x988] sm:$0xff]  ;;  %v1661_v22 = vld [vmem:[%s4253_s3 + $0x670] sm:$0xff] }
 0x2aa   : > { %2211 = vmatpush.msra.mxu2 %v1562_v57  ;;  %2231 = vmatpush.msra.mxu3 %v1610_v58  ;;  %v1808_v55 = vld [vmem:[%s4253_s3 + $0xb08] sm:$0xff]  ;;  %v1709_v56 = vld [vmem:[%s4253_s3 + $0x7f0] sm:$0xff] }
 0x2ab   : > { %2172 = vmatpush.msra.mxu0 %v1463_v59  ;;  %2192 = vmatpush.msra.mxu1 %v1511_v60  ;;  %v1757_v59 = vld [vmem:[%s4253_s3 + $0x970] sm:$0xff] }
 0x2ac   : > { %2212 = vmatpush.msra.mxu2 %v1559_v62  ;;  %2232 = vmatpush.msra.mxu3 %v1607_v63  ;;  %v1805_v60 = vld [vmem:[%s4253_s3 + $0xaf0] sm:$0xff]  ;;  %v1658_v63 = vld [vmem:[%s4253_s3 + $0x658] sm:$0xff] }
 0x2ad   : > { %2173 = vmatpush.msra.mxu0 %v1460_v30  ;;  %2193 = vmatpush.msra.mxu1 %v1508_v4  ;;  %v1706_v30 = vld [vmem:[%s4253_s3 + $0x7d8] sm:$0xff] }
 0x2ae   : > { %2213 = vmatpush.msra.mxu2 %v1556_v33  ;;  %2233 = vmatpush.msra.mxu3 %v1604_v5  ;;  %v1754_v4 = vld [vmem:[%s4253_s3 + $0x958] sm:$0xff]  ;;  %v1655_v5 = vld [vmem:[%s4253_s3 + $0x640] sm:$0xff] }
 0x2af   : > { %2174 = vmatpush.msra.mxu0 %v1457_v8  ;;  %2194 = vmatpush.msra.mxu1 %v1505_v9  ;;  %v1802_v33 = vld [vmem:[%s4253_s3 + $0xad8] sm:$0xff]  ;;  %v1703_v8 = vld [vmem:[%s4253_s3 + $0x7c0] sm:$0xff] }
 0x2b0   : > { %2214 = vmatpush.msra.mxu2 %v1553_v10  ;;  %2234 = vmatpush.msra.mxu3 %v1601_v11  ;;  %v1751_v9 = vld [vmem:[%s4253_s3 + $0x940] sm:$0xff]  ;;  %v1652_v11 = vld [vmem:[%s4253_s3 + $0x628] sm:$0xff] }
 0x2b1   : > { %2175 = vmatmul.f32.vlgmr.msra.gmra.mxu0 %v3433_v40  ;;  %2195 = vmatmul.f32.vlgmr.msra.gmra.mxu1 %v3435_v41  ;;  %v1739_v40 = vld [vmem:[%s4253_s3 + $0x8e0] sm:$0xff] }
 0x2b2   : > { %2215 = vmatmul.f32.vlgmr.msra.gmra.mxu2 %v3437_v42  ;;  %2235 = vmatmul.f32.vlgmr.msra.gmra.mxu3 %v3439_v43  ;;  %v1787_v41 = vld [vmem:[%s4253_s3 + $0xa60] sm:$0xff]  ;;  %v1688_v43 = vld [vmem:[%s4253_s3 + $0x748] sm:$0xff] }
 0x2b3   : > { %2239 = vmatpush.msrb.mxu0 %v1694_v12  ;;  %2259 = vmatpush.msrb.mxu1 %v1742_v13  ;;  %v1835_v42 = vld [vmem:[%s4253_s3 + $0xbe0] sm:$0xff]  ;;  %v1700_v12 = vld [vmem:[%s4253_s3 + $0x7a8] sm:$0xff] }
 0x2b4   : > { %2279 = vmatpush.msrb.mxu2 %v1790_v14  ;;  %2299 = vmatpush.msrb.mxu3 %v1838_v15  ;;  %v1799_v10 = vld [vmem:[%s4253_s3 + $0xac0] sm:$0xff]  ;;  %v1748_v13 = vld [vmem:[%s4253_s3 + $0x928] sm:$0xff] }
 0x2b5   : > { %2240 = vmatpush.msrb.mxu0 %v1691_v16  ;;  %2260 = vmatpush.msrb.mxu1 %v1739_v40  ;;  %v1796_v14 = vld [vmem:[%s4253_s3 + $0xaa8] sm:$0xff]  ;;  %v1649_v16 = vld [vmem:[%s4253_s3 + $0x610] sm:$0xff] }
 0x2b6   : > { %2280 = vmatpush.msrb.mxu2 %v1787_v41  ;;  %2300 = vmatpush.msrb.mxu3 %v1835_v42  ;;  %v1697_v40 = vld [vmem:[%s4253_s3 + $0x790] sm:$0xff] }
 0x2b7   : > { %2241 = vmatpush.msrb.mxu0 %v1688_v43  ;;  %2261 = vmatpush.msrb.mxu1 %v1736_v17  ;;  %v1745_v42 = vld [vmem:[%s4253_s3 + $0x910] sm:$0xff] }
 0x2b8   : > { %2281 = vmatpush.msrb.mxu2 %v1784_v18  ;;  %2301 = vmatpush.msrb.mxu3 %v1832_v19  ;;  %v1793_v43 = vld [vmem:[%s4253_s3 + $0xa90] sm:$0xff] }
 0x2b9   : > { %2242 = vmatpush.msrb.mxu0 %v1685_v20  ;;  %2262 = vmatpush.msrb.mxu1 %v1733_v61 }
 0x2ba   : > { %2282 = vmatpush.msrb.mxu2 %v1781_v21  ;;  %2302 = vmatpush.msrb.mxu3 %v1829_v23 }
 0x2bb   : > { %2243 = vmatpush.msrb.mxu0 %v1682_v1  ;;  %2263 = vmatpush.msrb.mxu1 %v1730_v24 }
 0x2bc   : > { %2283 = vmatpush.msrb.mxu2 %v1778_v25  ;;  %2303 = vmatpush.msrb.mxu3 %v1826_v26 }
 0x2bd   : > { %2244 = vmatpush.msrb.mxu0 %v1679_v6  ;;  %2264 = vmatpush.msrb.mxu1 %v1727_v7 }
 0x2be   : > { %2284 = vmatpush.msrb.mxu2 %v1775_v28  ;;  %2304 = vmatpush.msrb.mxu3 %v1823_v29 }
 0x2bf   : > { %2245 = vmatpush.msrb.mxu0 %v1676_v31  ;;  %2265 = vmatpush.msrb.mxu1 %v1724_v32 }
 0x2c0   : > { %2285 = vmatpush.msrb.mxu2 %v1772_v34  ;;  %2305 = vmatpush.msrb.mxu3 %v1820_v35 }
 0x2c1   : > { %2246 = vmatpush.msrb.mxu0 %v1673_v36  ;;  %2266 = vmatpush.msrb.mxu1 %v1721_v37 }
 0x2c2   : > { %2286 = vmatpush.msrb.mxu2 %v1769_v38  ;;  %2306 = vmatpush.msrb.mxu3 %v1817_v39 }
 0x2c3   : > { %2247 = vmatpush.msrb.mxu0 %v1670_v44  ;;  %2267 = vmatpush.msrb.mxu1 %v1718_v45 }
 0x2c4   : > { %2287 = vmatpush.msrb.mxu2 %v1766_v46  ;;  %2307 = vmatpush.msrb.mxu3 %v1814_v47 }
 0x2c5   : > { %2248 = vmatpush.msrb.mxu0 %v1667_v48  ;;  %2268 = vmatpush.msrb.mxu1 %v1715_v49 }
 0x2c6   : > { %2288 = vmatpush.msrb.mxu2 %v1763_v50  ;;  %2308 = vmatpush.msrb.mxu3 %v1811_v51  ;;  %v1856_v57 = vpop.f32.mrf.mxu0  ;;  %v1876_v58 = vpop.f32.mrf.mxu1 }
 0x2c7   : > { %2249 = vmatpush.msrb.mxu0 %v1664_v52  ;;  %2269 = vmatpush.msrb.mxu1 %v1712_v53  ;;  %v1877_v62 = vadd.f32 %v1876_v58, %v1856_v57  ;;  %v2319_v57 = vld [vmem:[%s4254_s4] sm:$0x1] }
 0x2c8   : > { %2289 = vmatpush.msrb.mxu2 %v1760_v54  ;;  %2309 = vmatpush.msrb.mxu3 %v1808_v55 }
 0x2c9   : > { %2250 = vmatpush.msrb.mxu0 %v1661_v22  ;;  %2270 = vmatpush.msrb.mxu1 %v1709_v56 }
 0x2ca   : > { %2290 = vmatpush.msrb.mxu2 %v1757_v59  ;;  %2310 = vmatpush.msrb.mxu3 %v1805_v60 }
 0x2cb   : > { %2251 = vmatpush.msrb.mxu0 %v1658_v63  ;;  %2271 = vmatpush.msrb.mxu1 %v1706_v30 }
 0x2cc   : > { %2291 = vmatpush.msrb.mxu2 %v1754_v4  ;;  %2311 = vmatpush.msrb.mxu3 %v1802_v33 }
 0x2cd   : > { %2252 = vmatpush.msrb.mxu0 %v1655_v5  ;;  %2272 = vmatpush.msrb.mxu1 %v1703_v8  ;;  %v1896_v15 = vpop.f32.mrf.mxu2  ;;  %v1916_v17 = vpop.f32.mrf.mxu3 }
 0x2ce   : > { %2292 = vmatpush.msrb.mxu2 %v1751_v9  ;;  %2312 = vmatpush.msrb.mxu3 %v1799_v10  ;;  %v1897_v41 = vadd.f32 %v1896_v15, %v1877_v62 }
 0x2cf   : > { %2253 = vmatpush.msrb.mxu0 %v1652_v11  ;;  %2273 = vmatpush.msrb.mxu1 %v1700_v12 }
 0x2d0   : > { %2293 = vmatpush.msrb.mxu2 %v1748_v13  ;;  %2313 = vmatpush.msrb.mxu3 %v1796_v14  ;;  %v1917_v18 = vadd.f32 %v1916_v17, %v1897_v41  ;;  %v1936_v19 = vpop.f32.mrf.mxu0  ;;  %v1956_v61 = vpop.f32.mrf.mxu1 }
 0x2d1   : > { %2254 = vmatpush.msrb.mxu0 %v1649_v16  ;;  %2274 = vmatpush.msrb.mxu1 %v1697_v40 }
 0x2d2   : > { %2294 = vmatpush.msrb.mxu2 %v1745_v42  ;;  %2314 = vmatpush.msrb.mxu3 %v1793_v43  ;;  %v1937_v20 = vadd.f32 %v1936_v19, %v1917_v18 }
 0x2d3   : > { %2255 = vmatmul.f32.vlgmr.msrb.gmra.mxu0 %v3493_v27  ;;  %2275 = vmatmul.f32.vlgmr.msrb.gmra.mxu1 %v3495_v0 }
 0x2d4   : > { %2295 = vmatmul.f32.vlgmr.msrb.gmra.mxu2 %v3497_v2  ;;  %2315 = vmatmul.f32.vlgmr.msrb.gmra.mxu3 %v3499_v3  ;;  %v1957_v21 = vadd.f32 %v1956_v61, %v1937_v20 }
 0x2d7   : > { %v1976_v23 = vpop.f32.mrf.mxu2  ;;  %v1996_v24 = vpop.f32.mrf.mxu3 }
 0x2d8   : > { %v1977_v1 = vadd.f32 %v1976_v23, %v1957_v21 }
 0x2da   : > { %v1997_v25 = vadd.f32 %v1996_v24, %v1977_v1 }
 0x2dc   : > { %v2320_v58 = vadd.f32 %v2319_v57, %v1997_v25 }
 0x2ea   : > { %v2016_v26 = vpop.f32.mrf.mxu0  ;;  %v2036_v6 = vpop.f32.mrf.mxu1 }
 0x2eb   : > { %v2037_v28 = vadd.f32 %v2036_v6, %v2016_v26 }
 0x2f1   : > { %v2056_v7 = vpop.f32.mrf.mxu2  ;;  %v2076_v31 = vpop.f32.mrf.mxu3 }
 0x2f2   : > { %v2057_v29 = vadd.f32 %v2056_v7, %v2037_v28 }
 0x2f4   : > { %v2077_v32 = vadd.f32 %v2076_v31, %v2057_v29 }
 0x30c   : > { %v2096_v27 = vpop.f32.mrf.mxu0  ;;  %v2116_v0 = vpop.f32.mrf.mxu1 }
 0x30d   : > { %v2097_v34 = vadd.f32 %v2096_v27, %v2077_v32 }
 0x30f   : > { %v2117_v35 = vadd.f32 %v2116_v0, %v2097_v34 }
 0x313   : > { %v2136_v36 = vpop.f32.mrf.mxu2  ;;  %v2156_v37 = vpop.f32.mrf.mxu3 }
 0x314   : > { %v2137_v2 = vadd.f32 %v2136_v36, %v2117_v35 }
 0x316   : > { %v2157_v3 = vadd.f32 %v2156_v37, %v2137_v2 }
 0x318   : > { %2322 = vst [vmem:[#allocation1] sm:$0xff] %v2157_v3 }
 0x31f   : > { %v2324_v56 = vld [vmem:[#allocation1 + $0x1] ss:$9 sm:$0xff] }
 0x320   : > { %v2326_v59 = vadd.f32 %v2324_v56, %v2320_v58 }
 0x32e   : > { %v2176_v38 = vpop.f32.mrf.mxu0  ;;  %v2196_v39 = vpop.f32.mrf.mxu1 }
 0x32f   : > { %v2197_v45 = vadd.f32 %v2196_v39, %v2176_v38 }
 0x335   : > { %v2216_v44 = vpop.f32.mrf.mxu2  ;;  %v2236_v47 = vpop.f32.mrf.mxu3 }
 0x336   : > { %v2217_v46 = vadd.f32 %v2216_v44, %v2197_v45 }
 0x338   : > { %v2237_v48 = vadd.f32 %v2236_v47, %v2217_v46 }
 0x350   : > { %v2256_v49 = vpop.f32.mrf.mxu0  ;;  %v2276_v51 = vpop.f32.mrf.mxu1 }
 0x351   : > { %v2257_v50 = vadd.f32 %v2256_v49, %v2237_v48 }
 0x353   : > { %v2277_v52 = vadd.f32 %v2276_v51, %v2257_v50 }
 0x357   : > { %v2296_v53 = vpop.f32.mrf.mxu2  ;;  %v2316_v55 = vpop.f32.mrf.mxu3 }
 0x358   : > { %v2297_v54 = vadd.f32 %v2296_v53, %v2277_v52 }
 0x35a   : > { %v2317_v22 = vadd.f32 %v2316_v55, %v2297_v54 }
 0x35c   : > { %2328 = vst [vmem:[#allocation1] sm:$0xff] %v2317_v22 }
 0x363   : > { %v2330_v60 = vld [vmem:[#allocation1 + $0x2] ss:$9 sm:$0xff] }
 0x364   : > { %v2332_v62 = vadd.f32 %v2330_v60, %v2326_v59 }
 0x366   : > { %v2334_v63 = vmul.f32 %v2332_v62, %v2332_v62  ;;  %v2333_v9 = vmul.f32 0.5, %v2332_v62 }
 0x368   : > { %v2335_v30 = vmul.f32 %v2334_v63, %v2332_v62 }
 0x36a   : > { %v2336_v4 = vmul.f32 0.044715, %v2335_v30 }
 0x36c   : > { %v2337_v33 = vadd.f32 %v2336_v4, %v2332_v62 }
 0x36e   : > { %v2338_v5 = vmul.f32 0.7978846, %v2337_v33 }
 0x370   : > { %2412 = vtanh.f32 %v2338_v5 }
 0x376   : > { %v2413_v8 = vpop.eup %2412 }
 0x377   : > { %v2340_v10 = vadd.f32 1.0, %v2413_v8 }
 0x379   : > { %v2341_v11 = vmul.f32 %v2340_v10, %v2333_v9 }
 0x37b   : > { %2342 = vst [vmem:[%s4255_s5] sm:$0x1] %v2341_v11 }
 0x37c PF: > { %s15_s18 = sadd.s32 1, %s2420_s18  }
 0x37d   : > { %p12_p7 = scmp.ge.s32.totalorder %s15_s18, 4  }
 0x37f   :  { %14 = sbr.rel (!%p12_p7) target bundleno = 1 (0x1), region = 79 }

// kernel: squeeze.3
= control target key start
LH: loop header
LB: loop body
LE: loop exit
PB: predicated region body
PF: predicated region fallthrough
CT: control target
= control target key end

     0   :  { %s65_s8 = smov 126   ;;  %s66_s9 = smov 118   ;;  %vm7_vm0 = vcmask 15360   ;;  %s91_s0 = inlined_call_operand.vmem [shape: f32[12], index: 0, kind: input, shape index: {}]   ;;  %s92_s1 = inlined_call_operand.vmem [shape: f32[1,3,2,2], index: 1, kind: output, shape index: {}]  }
   0x1   :  { %v4_v0 = vld [vmem:[%s91_s0] sm:$0x1]  ;;  %s64_s0 = smov 122   ;;  %s67_s10 = smov 120  }
   0x2   :  { %5 = vst [vmem:[#allocation1] sm:$0x1] %v4_v0  ;;  %s68_s11 = smov 124  }
   0x9   :  { %v21_v1 = vld [vmem:[#allocation1] sm:$0x1]  }
   0xa   :  { %v9_v2 = vld [vmem:[#allocation1] sm:$0x1]   ;;  %22 = vrot.lane.b32.xlu1 %v21_v1, %s64_s0 }
   0xb   :  { %10 = vrot.lane.b32.xlu0 %v9_v2, %s65_s8  ;;  %v33_v3 = vld [vmem:[#allocation1] sm:$0x1]  }
   0xc   :  { %34 = vrot.lane.b32.xlu2 %v33_v3, %s66_s9  ;;  %v27_v4 = vld [vmem:[#allocation1] sm:$0x1]  }
   0xd   :  { %v15_v5 = vld [vmem:[#allocation1] sm:$0x1]  }
   0xe   :  { %v6_v6 = vld [vmem:[#allocation1] sm:$0x1]  }
   0xf   :  { %8 = vst.msk [vmem:[#allocation0] sm:$0x1] %vm7_vm0, %v6_v6  }
  0x12   :  { %28 = vrot.lane.b32.xlu1 %v27_v4, %s67_s10 }
  0x13   :  { %16 = vrot.lane.b32.xlu0 %v15_v5, %s68_s11 }
  0x66   :  { %v35_v7 = vpop.permute.xlu2 %34  }
  0x67   :  { %38 = vst.msk [vmem:[#allocation0 + $0x11] sm:$0x1] %vm7_vm0, %v35_v7  }
  0x7c   :  { %v23_v8 = vpop.permute.xlu1 %22  }
  0x7d   :  { %v11_v9 = vpop.permute.xlu0 %10   ;;  %26 = vst.msk [vmem:[#allocation0 + $0x9] sm:$0x1] %vm7_vm0, %v23_v8  }
  0x7e   :  { %14 = vst.msk [vmem:[#allocation0 + $0x1] sm:$0x1] %vm7_vm0, %v11_v9  }
  0x84   :  { %v29_v10 = vpop.permute.xlu1 %28  }
  0x85   :  { %v17_v11 = vpop.permute.xlu0 %16   ;;  %v41_v12 = vld [vmem:[#allocation0] sm:$0x3]  ;;  %32 = vst.msk [vmem:[#allocation0 + $0x10] sm:$0x1] %vm7_vm0, %v29_v10  }
  0x86   :  { %44 = vst [vmem:[%s92_s1] sm:$0x3] %v41_v12 }
  0x87   :  { %20 = vst.msk [vmem:[#allocation0 + $0x8] sm:$0x1] %vm7_vm0, %v17_v11  }
  0x8c   :  { %v52_v13 = vld [vmem:[#allocation0 + $0x10] sm:$0x3] }
  0x8d   :  { %58 = vst [vmem:[%s92_s1 + $0x4] sm:$0x3] %v52_v13 }
  0x8e   :  { %v46_v14 = vld [vmem:[#allocation0 + $0x8] sm:$0x3] }
  0x8f   :  { %57 = vst [vmem:[%s92_s1 + $0x2] sm:$0x3] %v46_v14 }

</bundles_post_ra>
